<compile_context>
chip_gen: v7x
topology: tpu7x:2x2x1
jax: 0.10.0
libtpu: 0.0.40
codegen_flags: <defaults>
</compile_context>

<pallas_src>
import functools

import jax
import jax.numpy as jnp
from jax.experimental import pallas as pl
from jax.experimental.pallas import tpu as pltpu


def _conv2d_lrelu_kernel(x_ref, w_ref, b_ref, out_ref, col_ref, *,
                         Ho, Wo, Cin, K, LP, IB, slope, dense_cols):
    """IB images per grid step: im2col (dense lane stores) -> one deep MXU matmul
    -> bias + LeakyReLU -> lane-dense packed store.

    Packed-pixel layout: row r of image i's (HWP, LP*Cout) output slab holds the LP pixels
    { (j*rpl + r//Wo, r%Wo) : j in [0, LP) }; the block-diagonal weight produces that
    packing directly so every store is full-lane-width.
    """
    rpl = Ho // LP                 # image rows per packed-pixel group
    HWP = rpl * Wo                 # packed rows per image
    KKC = K * K * Cin

    def tap_slice(i, j, kh, kw):
        # (rpl, Wo, Cin) window of the zero-padded image -> (rpl*Wo, Cin).
        # Only leading dims are merged; the lane (Cin) axis is untouched.
        return x_ref[i, j * rpl + kh: j * rpl + kh + rpl, kw: kw + Wo, :].reshape(
            rpl * Wo, Cin)

    if dense_cols:
        # Group GRP consecutive Cin-wide tap blocks into one full 128-lane store; the
        # lane concats run on otherwise-idle VPU/XLU slots, the stores are unmasked.
        GRP = 128 // Cin
        n_tiles = (LP * K * K) // GRP
        for i in range(IB):
            for m in range(n_tiles):
                parts = []
                for g in range(GRP):
                    blk = m * GRP + g
                    j, t = blk // (K * K), blk % (K * K)
                    parts.append(tap_slice(i, j, t // K, t % K))
                col_ref[i * HWP:(i + 1) * HWP, m * 128:(m + 1) * 128] = (
                    jnp.concatenate(parts, axis=-1).astype(col_ref.dtype))
    else:
        # Fallback: one (HWP, Cin) store per tap block (masked if Cin < 128).
        for i in range(IB):
            for j in range(LP):
                for kh in range(K):
                    for kw in range(K):
                        t = kh * K + kw
                        col_ref[i * HWP:(i + 1) * HWP,
                                j * KKC + t * Cin: j * KKC + (t + 1) * Cin] = (
                            tap_slice(i, j, kh, kw).astype(col_ref.dtype))

    # Single (LP*K*K*Cin)-deep MXU matmul, bf16 x bf16 -> f32 accumulation; the result is
    # already in the lane-dense packed layout (IB*HWP, LP*Cout).
    acc = jnp.dot(col_ref[...], w_ref[...], preferred_element_type=jnp.float32)
    y = acc + b_ref[...]                       # bias, tiled LP x along lanes
    y = jnp.maximum(y, slope * y)              # LeakyReLU (requires 0 <= slope <= 1)
    out_ref[...] = y.reshape(out_ref.shape).astype(out_ref.dtype)


def conv2d_layer(x_nchw, weight_hwio, bias, *, padding=1, negative_slope=0.2,
                 images_per_block=None):
    """Fused zero-pad + Conv2d(stride=1, dilation=1) + LeakyReLU.  NCHW in / NCHW out.

    images_per_block: images processed per grid step.  Default = full batch (best on
    single-TC v5e/v6e); on dual-TC v7x pass B//2 so each TensorCore takes half the batch.
    """
    B, Cin, H, W = x_nchw.shape
    K = weight_hwio.shape[0]
    Cout = weight_hwio.shape[3]
    P = int(padding)
    assert weight_hwio.shape == (K, K, Cin, Cout)
    assert 0.0 <= negative_slope <= 1.0, "max(y, a*y) LeakyReLU form needs 0<=a<=1"
    Ho = H + 2 * P - K + 1
    Wo = W + 2 * P - K + 1
    assert Ho > 0 and Wo > 0

    IB = B if images_per_block is None else int(images_per_block)
    assert B % IB == 0

    # Lane-packing factor: pack LP output pixels per 128-lane row when shapes allow it.
    LP = 128 // Cout if (128 % Cout == 0 and Ho % max(128 // Cout, 1) == 0) else 1
    rpl = Ho // LP
    HWP = rpl * Wo                     # packed rows per image
    KKC = K * K * Cin
    LPC = LP * Cout
    # Dense im2col stores need the tap blocks to tile the lane axis into full 128s.
    dense_cols = (128 % Cin == 0) and ((LP * K * K * Cin) % 128 == 0)

    # NCHW -> NHWC; zero-pad on the host so it folds into the input staging and the kernel
    # has no halo-zero / interior-copy phase (and no misaligned pad scratch).
    x = jnp.transpose(x_nchw, (0, 2, 3, 1)).astype(jnp.float32)
    xp = jnp.pad(x, ((0, 0), (P, P), (P, P), (0, 0)))
    Hp, Wp = H + 2 * P, W + 2 * P

    # Host-side weight prep: HWIO -> (K*K*Cin, Cout), then LP-way block-diagonal (bf16) so
    # the single matmul emits the packed (IB*HWP, LP*Cout) lane-dense output directly.
    wmat = weight_hwio.astype(jnp.float32).reshape(KKC, Cout)
    wblk = jnp.zeros((LP * KKC, LPC), jnp.float32)
    for j in range(LP):
        wblk = wblk.at[j * KKC:(j + 1) * KKC, j * Cout:(j + 1) * Cout].set(wmat)
    wblk = wblk.astype(jnp.bfloat16)
    b_tiled = jnp.tile(bias.astype(jnp.float32).reshape(1, Cout), (1, LP))  # (1, LP*Cout)

    kernel = functools.partial(_conv2d_lrelu_kernel, Ho=Ho, Wo=Wo, Cin=Cin, K=K,
                               LP=LP, IB=IB, slope=float(negative_slope),
                               dense_cols=dense_cols)

    # VMEM at these shapes: col 288 KiB (bf16), weight 288 KiB (bf16, x2 buffers), padded
    # input block ~0.9 MiB (lane-padded), output 128 KiB -- far under the scoped default.
    # When channel counts grow: add pipeline_mode=pl.Buffered(1) to the constant-index
    # weight/bias specs and tile over output rows before raising vmem_limit_bytes.
    out_packed = pl.pallas_call(
        kernel,
        out_shape=jax.ShapeDtypeStruct((B, HWP, LPC), jnp.float32),
        grid_spec=pltpu.PrefetchScalarGridSpec(
            num_scalar_prefetch=0,
            grid=(B // IB,),
            in_specs=[
                pl.BlockSpec((IB, Hp, Wp, Cin), lambda g: (g, 0, 0, 0)),   # padded NHWC x
                pl.BlockSpec((LP * KKC, LPC), lambda g: (0, 0)),           # block-diag W, bf16
                pl.BlockSpec((1, LPC), lambda g: (0, 0)),                  # lane-tiled bias
            ],
            out_specs=pl.BlockSpec((IB, HWP, LPC), lambda g: (g, 0, 0)),
            scratch_shapes=[
                pltpu.VMEM((IB * HWP, LP * KKC), jnp.bfloat16),            # im2col patches
            ],
        ),
        compiler_params=pltpu.CompilerParams(
            dimension_semantics=("parallel",)),
    )(xp, wblk, b_tiled)

    # Un-pack (B, HWP, LP*Cout) -> NHWC -> NCHW (cheap XLA-side reshape + transpose).
    out_nhwc = (out_packed.reshape(B, rpl, Wo, LP, Cout)
                .transpose(0, 3, 1, 2, 4)
                .reshape(B, Ho, Wo, Cout))
    return jnp.transpose(out_nhwc, (0, 3, 1, 2))


def conv2d_layer_reference(x_nchw, weight_hwio, bias, *, padding=1, negative_slope=0.2):
    """Pure-JAX reference of the PyTorch forward (zero-pad -> conv -> LeakyReLU)."""
    x = jnp.transpose(x_nchw, (0, 2, 3, 1)).astype(jnp.float32)            # NHWC
    y = jax.lax.conv_general_dilated(
        x, weight_hwio.astype(jnp.float32), window_strides=(1, 1),
        padding=((padding, padding), (padding, padding)),
        dimension_numbers=('NHWC', 'HWIO', 'NHWC'))
    y = y + bias.reshape(1, 1, 1, -1)
    y = jnp.where(y > 0, y, negative_slope * y)
    return jnp.transpose(y, (0, 3, 1, 2))


if __name__ == "__main__":
    # Conv2dLayer(in_channels=32, out_channels=32, kernel_size=3, stride=1, padding=1,
    #             pad_type='zero', activation='lrelu', norm='none', sn=False)
    B, Cin, Cout, H, W = 2, 32, 32, 16, 16
    K, P = 3, 1

    key = jax.random.PRNGKey(0)
    kx, kw, kb = jax.random.split(key, 3)
    x = jax.random.normal(kx, (B, Cin, H, W), dtype=jnp.float32)
    # Weight stored HWIO (kh, kw, cin, cout); a PyTorch OIHW weight is permute(2, 3, 1, 0).
    weight = 0.1 * jax.random.normal(kw, (K, K, Cin, Cout), dtype=jnp.float32)
    bias = 0.1 * jax.random.normal(kb, (Cout,), dtype=jnp.float32)

    out = jax.block_until_ready(conv2d_layer(x, weight, bias, padding=P))
    ref = jax.block_until_ready(conv2d_layer_reference(x, weight, bias, padding=P))

    assert out.shape == (B, Cout, H, W), out.shape
    max_err = float(jnp.max(jnp.abs(out - ref)))
    # bf16 im2col/weight with f32 accumulation: tolerance loosened vs the pure-f32 path.
    assert max_err < 5e-2, f"mismatch vs reference: {max_err}"
    print("KERNEL_OK")
</pallas_src>

<mosaic_0001>
module attributes {stable_mosaic.version = 11 : i64} {
  func.func @_conv2d_lrelu_kernel(%arg0: i32, %arg1: memref<2x18x18x32xf32, #tpu.memory_space<vmem>>, %arg2: memref<1152x128xbf16, #tpu.memory_space<vmem>>, %arg3: memref<1x128xf32, #tpu.memory_space<vmem>>, %arg4: memref<2x64x128xf32, #tpu.memory_space<vmem>>, %arg5: memref<128x1152xbf16, #tpu.memory_space<vmem>>) attributes {dimension_semantics = [#tpu.dimension_semantics<parallel>], iteration_bounds = array<i64: 1>, scalar_prefetch = 0 : i64, scratch_operands = 1 : i64, tpu.core_type = #tpu.core_type<tc>, window_params = [{transform_indices = @transform_0, window_bounds = array<i64: 2, 18, 18, 32>}, {pipeline_mode = #tpu.pipeline_mode<synchronous>, transform_indices = @transform_1, window_bounds = array<i64: 1152, 128>}, {pipeline_mode = #tpu.pipeline_mode<synchronous>, transform_indices = @transform_2, window_bounds = array<i64: 1, 128>}, {transform_indices = @transform_3, window_bounds = array<i64: 2, 64, 128>}]} {
    %c0 = arith.constant 0 : index
    %c0_0 = arith.constant 0 : index
    %c0_1 = arith.constant 0 : index
    %c0_2 = arith.constant 0 : index
    %0 = vector.load %arg1[%c0, %c0_0, %c0_1, %c0_2] : memref<2x18x18x32xf32, #tpu.memory_space<vmem>>, vector<1x4x16x32xf32>
    %1 = vector.shape_cast %0 : vector<1x4x16x32xf32> to vector<4x16x32xf32>
    %2 = vector.shape_cast %1 : vector<4x16x32xf32> to vector<64x32xf32>
    %c0_3 = arith.constant 0 : index
    %c0_4 = arith.constant 0 : index
    %c1 = arith.constant 1 : index
    %c0_5 = arith.constant 0 : index
    %3 = vector.load %arg1[%c0_3, %c0_4, %c1, %c0_5] : memref<2x18x18x32xf32, #tpu.memory_space<vmem>>, vector<1x4x16x32xf32>
    %4 = vector.shape_cast %3 : vector<1x4x16x32xf32> to vector<4x16x32xf32>
    %5 = vector.shape_cast %4 : vector<4x16x32xf32> to vector<64x32xf32>
    %c0_6 = arith.constant 0 : index
    %c0_7 = arith.constant 0 : index
    %c2 = arith.constant 2 : index
    %c0_8 = arith.constant 0 : index
    %6 = vector.load %arg1[%c0_6, %c0_7, %c2, %c0_8] : memref<2x18x18x32xf32, #tpu.memory_space<vmem>>, vector<1x4x16x32xf32>
    %7 = vector.shape_cast %6 : vector<1x4x16x32xf32> to vector<4x16x32xf32>
    %8 = vector.shape_cast %7 : vector<4x16x32xf32> to vector<64x32xf32>
    %c0_9 = arith.constant 0 : index
    %c1_10 = arith.constant 1 : index
    %c0_11 = arith.constant 0 : index
    %c0_12 = arith.constant 0 : index
    %9 = vector.load %arg1[%c0_9, %c1_10, %c0_11, %c0_12] : memref<2x18x18x32xf32, #tpu.memory_space<vmem>>, vector<1x4x16x32xf32>
    %10 = vector.shape_cast %9 : vector<1x4x16x32xf32> to vector<4x16x32xf32>
    %11 = vector.shape_cast %10 : vector<4x16x32xf32> to vector<64x32xf32>
    %12 = tpu.concatenate %2, %5, %8, %11 in 1 : vector<64x32xf32>, vector<64x32xf32>, vector<64x32xf32>, vector<64x32xf32> -> vector<64x128xf32>
    %13 = arith.truncf %12 : vector<64x128xf32> to vector<64x128xbf16>
    %c0_13 = arith.constant 0 : index
    %c0_14 = arith.constant 0 : index
    %14 = vector.load %arg5[%c0_13, %c0_14] : memref<128x1152xbf16, #tpu.memory_space<vmem>>, vector<64x128xbf16>
    tpu.vector_store %arg5[%c0_13, %c0_14], %13 {strides = array<i32>} : memref<128x1152xbf16, #tpu.memory_space<vmem>>, vector<64x128xbf16>,
    %c0_15 = arith.constant 0 : index
    %c1_16 = arith.constant 1 : index
    %c1_17 = arith.constant 1 : index
    %c0_18 = arith.constant 0 : index
    %15 = vector.load %arg1[%c0_15, %c1_16, %c1_17, %c0_18] : memref<2x18x18x32xf32, #tpu.memory_space<vmem>>, vector<1x4x16x32xf32>
    %16 = vector.shape_cast %15 : vector<1x4x16x32xf32> to vector<4x16x32xf32>
    %17 = vector.shape_cast %16 : vector<4x16x32xf32> to vector<64x32xf32>
    %c0_19 = arith.constant 0 : index
    %c1_20 = arith.constant 1 : index
    %c2_21 = arith.constant 2 : index
    %c0_22 = arith.constant 0 : index
    %18 = vector.load %arg1[%c0_19, %c1_20, %c2_21, %c0_22] : memref<2x18x18x32xf32, #tpu.memory_space<vmem>>, vector<1x4x16x32xf32>
    %19 = vector.shape_cast %18 : vector<1x4x16x32xf32> to vector<4x16x32xf32>
    %20 = vector.shape_cast %19 : vector<4x16x32xf32> to vector<64x32xf32>
    %c0_23 = arith.constant 0 : index
    %c2_24 = arith.constant 2 : index
    %c0_25 = arith.constant 0 : index
    %c0_26 = arith.constant 0 : index
    %21 = vector.load %arg1[%c0_23, %c2_24, %c0_25, %c0_26] : memref<2x18x18x32xf32, #tpu.memory_space<vmem>>, vector<1x4x16x32xf32>
    %22 = vector.shape_cast %21 : vector<1x4x16x32xf32> to vector<4x16x32xf32>
    %23 = vector.shape_cast %22 : vector<4x16x32xf32> to vector<64x32xf32>
    %c0_27 = arith.constant 0 : index
    %c2_28 = arith.constant 2 : index
    %c1_29 = arith.constant 1 : index
    %c0_30 = arith.constant 0 : index
    %24 = vector.load %arg1[%c0_27, %c2_28, %c1_29, %c0_30] : memref<2x18x18x32xf32, #tpu.memory_space<vmem>>, vector<1x4x16x32xf32>
    %25 = vector.shape_cast %24 : vector<1x4x16x32xf32> to vector<4x16x32xf32>
    %26 = vector.shape_cast %25 : vector<4x16x32xf32> to vector<64x32xf32>
    %27 = tpu.concatenate %17, %20, %23, %26 in 1 : vector<64x32xf32>, vector<64x32xf32>, vector<64x32xf32>, vector<64x32xf32> -> vector<64x128xf32>
    %28 = arith.truncf %27 : vector<64x128xf32> to vector<64x128xbf16>
    %c0_31 = arith.constant 0 : index
    %c128 = arith.constant 128 : index
    %29 = vector.load %arg5[%c0_31, %c128] : memref<128x1152xbf16, #tpu.memory_space<vmem>>, vector<64x128xbf16>
    tpu.vector_store %arg5[%c0_31, %c128], %28 {strides = array<i32>} : memref<128x1152xbf16, #tpu.memory_space<vmem>>, vector<64x128xbf16>,
    %c0_32 = arith.constant 0 : index
    %c2_33 = arith.constant 2 : index
    %c2_34 = arith.constant 2 : index
    %c0_35 = arith.constant 0 : index
    %30 = vector.load %arg1[%c0_32, %c2_33, %c2_34, %c0_35] : memref<2x18x18x32xf32, #tpu.memory_space<vmem>>, vector<1x4x16x32xf32>
    %31 = vector.shape_cast %30 : vector<1x4x16x32xf32> to vector<4x16x32xf32>
    %32 = vector.shape_cast %31 : vector<4x16x32xf32> to vector<64x32xf32>
    %c0_36 = arith.constant 0 : index
    %c4 = arith.constant 4 : index
    %c0_37 = arith.constant 0 : index
    %c0_38 = arith.constant 0 : index
    %33 = vector.load %arg1[%c0_36, %c4, %c0_37, %c0_38] : memref<2x18x18x32xf32, #tpu.memory_space<vmem>>, vector<1x4x16x32xf32>
    %34 = vector.shape_cast %33 : vector<1x4x16x32xf32> to vector<4x16x32xf32>
    %35 = vector.shape_cast %34 : vector<4x16x32xf32> to vector<64x32xf32>
    %c0_39 = arith.constant 0 : index
    %c4_40 = arith.constant 4 : index
    %c1_41 = arith.constant 1 : index
    %c0_42 = arith.constant 0 : index
    %36 = vector.load %arg1[%c0_39, %c4_40, %c1_41, %c0_42] : memref<2x18x18x32xf32, #tpu.memory_space<vmem>>, vector<1x4x16x32xf32>
    %37 = vector.shape_cast %36 : vector<1x4x16x32xf32> to vector<4x16x32xf32>
    %38 = vector.shape_cast %37 : vector<4x16x32xf32> to vector<64x32xf32>
    %c0_43 = arith.constant 0 : index
    %c4_44 = arith.constant 4 : index
    %c2_45 = arith.constant 2 : index
    %c0_46 = arith.constant 0 : index
    %39 = vector.load %arg1[%c0_43, %c4_44, %c2_45, %c0_46] : memref<2x18x18x32xf32, #tpu.memory_space<vmem>>, vector<1x4x16x32xf32>
    %40 = vector.shape_cast %39 : vector<1x4x16x32xf32> to vector<4x16x32xf32>
    %41 = vector.shape_cast %40 : vector<4x16x32xf32> to vector<64x32xf32>
    %42 = tpu.concatenate %32, %35, %38, %41 in 1 : vector<64x32xf32>, vector<64x32xf32>, vector<64x32xf32>, vector<64x32xf32> -> vector<64x128xf32>
    %43 = arith.truncf %42 : vector<64x128xf32> to vector<64x128xbf16>
    %c0_47 = arith.constant 0 : index
    %c256 = arith.constant 256 : index
    %44 = vector.load %arg5[%c0_47, %c256] : memref<128x1152xbf16, #tpu.memory_space<vmem>>, vector<64x128xbf16>
    tpu.vector_store %arg5[%c0_47, %c256], %43 {strides = array<i32>} : memref<128x1152xbf16, #tpu.memory_space<vmem>>, vector<64x128xbf16>,
    %c0_48 = arith.constant 0 : index
    %c5 = arith.constant 5 : index
    %c0_49 = arith.constant 0 : index
    %c0_50 = arith.constant 0 : index
    %45 = vector.load %arg1[%c0_48, %c5, %c0_49, %c0_50] : memref<2x18x18x32xf32, #tpu.memory_space<vmem>>, vector<1x4x16x32xf32>
    %46 = vector.shape_cast %45 : vector<1x4x16x32xf32> to vector<4x16x32xf32>
    %47 = vector.shape_cast %46 : vector<4x16x32xf32> to vector<64x32xf32>
    %c0_51 = arith.constant 0 : index
    %c5_52 = arith.constant 5 : index
    %c1_53 = arith.constant 1 : index
    %c0_54 = arith.constant 0 : index
    %48 = vector.load %arg1[%c0_51, %c5_52, %c1_53, %c0_54] : memref<2x18x18x32xf32, #tpu.memory_space<vmem>>, vector<1x4x16x32xf32>
    %49 = vector.shape_cast %48 : vector<1x4x16x32xf32> to vector<4x16x32xf32>
    %50 = vector.shape_cast %49 : vector<4x16x32xf32> to vector<64x32xf32>
    %c0_55 = arith.constant 0 : index
    %c5_56 = arith.constant 5 : index
    %c2_57 = arith.constant 2 : index
    %c0_58 = arith.constant 0 : index
    %51 = vector.load %arg1[%c0_55, %c5_56, %c2_57, %c0_58] : memref<2x18x18x32xf32, #tpu.memory_space<vmem>>, vector<1x4x16x32xf32>
    %52 = vector.shape_cast %51 : vector<1x4x16x32xf32> to vector<4x16x32xf32>
    %53 = vector.shape_cast %52 : vector<4x16x32xf32> to vector<64x32xf32>
    %c0_59 = arith.constant 0 : index
    %c6 = arith.constant 6 : index
    %c0_60 = arith.constant 0 : index
    %c0_61 = arith.constant 0 : index
    %54 = vector.load %arg1[%c0_59, %c6, %c0_60, %c0_61] : memref<2x18x18x32xf32, #tpu.memory_space<vmem>>, vector<1x4x16x32xf32>
    %55 = vector.shape_cast %54 : vector<1x4x16x32xf32> to vector<4x16x32xf32>
    %56 = vector.shape_cast %55 : vector<4x16x32xf32> to vector<64x32xf32>
    %57 = tpu.concatenate %47, %50, %53, %56 in 1 : vector<64x32xf32>, vector<64x32xf32>, vector<64x32xf32>, vector<64x32xf32> -> vector<64x128xf32>
    %58 = arith.truncf %57 : vector<64x128xf32> to vector<64x128xbf16>
    %c0_62 = arith.constant 0 : index
    %c384 = arith.constant 384 : index
    %59 = vector.load %arg5[%c0_62, %c384] : memref<128x1152xbf16, #tpu.memory_space<vmem>>, vector<64x128xbf16>
    tpu.vector_store %arg5[%c0_62, %c384], %58 {strides = array<i32>} : memref<128x1152xbf16, #tpu.memory_space<vmem>>, vector<64x128xbf16>,
    %c0_63 = arith.constant 0 : index
    %c6_64 = arith.constant 6 : index
    %c1_65 = arith.constant 1 : index
    %c0_66 = arith.constant 0 : index
    %60 = vector.load %arg1[%c0_63, %c6_64, %c1_65, %c0_66] : memref<2x18x18x32xf32, #tpu.memory_space<vmem>>, vector<1x4x16x32xf32>
    %61 = vector.shape_cast %60 : vector<1x4x16x32xf32> to vector<4x16x32xf32>
    %62 = vector.shape_cast %61 : vector<4x16x32xf32> to vector<64x32xf32>
    %c0_67 = arith.constant 0 : index
    %c6_68 = arith.constant 6 : index
    %c2_69 = arith.constant 2 : index
    %c0_70 = arith.constant 0 : index
    %63 = vector.load %arg1[%c0_67, %c6_68, %c2_69, %c0_70] : memref<2x18x18x32xf32, #tpu.memory_space<vmem>>, vector<1x4x16x32xf32>
    %64 = vector.shape_cast %63 : vector<1x4x16x32xf32> to vector<4x16x32xf32>
    %65 = vector.shape_cast %64 : vector<4x16x32xf32> to vector<64x32xf32>
    %c0_71 = arith.constant 0 : index
    %c8 = arith.constant 8 : index
    %c0_72 = arith.constant 0 : index
    %c0_73 = arith.constant 0 : index
    %66 = vector.load %arg1[%c0_71, %c8, %c0_72, %c0_73] : memref<2x18x18x32xf32, #tpu.memory_space<vmem>>, vector<1x4x16x32xf32>
    %67 = vector.shape_cast %66 : vector<1x4x16x32xf32> to vector<4x16x32xf32>
    %68 = vector.shape_cast %67 : vector<4x16x32xf32> to vector<64x32xf32>
    %c0_74 = arith.constant 0 : index
    %c8_75 = arith.constant 8 : index
    %c1_76 = arith.constant 1 : index
    %c0_77 = arith.constant 0 : index
    %69 = vector.load %arg1[%c0_74, %c8_75, %c1_76, %c0_77] : memref<2x18x18x32xf32, #tpu.memory_space<vmem>>, vector<1x4x16x32xf32>
    %70 = vector.shape_cast %69 : vector<1x4x16x32xf32> to vector<4x16x32xf32>
    %71 = vector.shape_cast %70 : vector<4x16x32xf32> to vector<64x32xf32>
    %72 = tpu.concatenate %62, %65, %68, %71 in 1 : vector<64x32xf32>, vector<64x32xf32>, vector<64x32xf32>, vector<64x32xf32> -> vector<64x128xf32>
    %73 = arith.truncf %72 : vector<64x128xf32> to vector<64x128xbf16>
    %c0_78 = arith.constant 0 : index
    %c512 = arith.constant 512 : index
    %74 = vector.load %arg5[%c0_78, %c512] : memref<128x1152xbf16, #tpu.memory_space<vmem>>, vector<64x128xbf16>
    tpu.vector_store %arg5[%c0_78, %c512], %73 {strides = array<i32>} : memref<128x1152xbf16, #tpu.memory_space<vmem>>, vector<64x128xbf16>,
    %c0_79 = arith.constant 0 : index
    %c8_80 = arith.constant 8 : index
    %c2_81 = arith.constant 2 : index
    %c0_82 = arith.constant 0 : index
    %75 = vector.load %arg1[%c0_79, %c8_80, %c2_81, %c0_82] : memref<2x18x18x32xf32, #tpu.memory_space<vmem>>, vector<1x4x16x32xf32>
    %76 = vector.shape_cast %75 : vector<1x4x16x32xf32> to vector<4x16x32xf32>
    %77 = vector.shape_cast %76 : vector<4x16x32xf32> to vector<64x32xf32>
    %c0_83 = arith.constant 0 : index
    %c9 = arith.constant 9 : index
    %c0_84 = arith.constant 0 : index
    %c0_85 = arith.constant 0 : index
    %78 = vector.load %arg1[%c0_83, %c9, %c0_84, %c0_85] : memref<2x18x18x32xf32, #tpu.memory_space<vmem>>, vector<1x4x16x32xf32>
    %79 = vector.shape_cast %78 : vector<1x4x16x32xf32> to vector<4x16x32xf32>
    %80 = vector.shape_cast %79 : vector<4x16x32xf32> to vector<64x32xf32>
    %c0_86 = arith.constant 0 : index
    %c9_87 = arith.constant 9 : index
    %c1_88 = arith.constant 1 : index
    %c0_89 = arith.constant 0 : index
    %81 = vector.load %arg1[%c0_86, %c9_87, %c1_88, %c0_89] : memref<2x18x18x32xf32, #tpu.memory_space<vmem>>, vector<1x4x16x32xf32>
    %82 = vector.shape_cast %81 : vector<1x4x16x32xf32> to vector<4x16x32xf32>
    %83 = vector.shape_cast %82 : vector<4x16x32xf32> to vector<64x32xf32>
    %c0_90 = arith.constant 0 : index
    %c9_91 = arith.constant 9 : index
    %c2_92 = arith.constant 2 : index
    %c0_93 = arith.constant 0 : index
    %84 = vector.load %arg1[%c0_90, %c9_91, %c2_92, %c0_93] : memref<2x18x18x32xf32, #tpu.memory_space<vmem>>, vector<1x4x16x32xf32>
    %85 = vector.shape_cast %84 : vector<1x4x16x32xf32> to vector<4x16x32xf32>
    %86 = vector.shape_cast %85 : vector<4x16x32xf32> to vector<64x32xf32>
    %87 = tpu.concatenate %77, %80, %83, %86 in 1 : vector<64x32xf32>, vector<64x32xf32>, vector<64x32xf32>, vector<64x32xf32> -> vector<64x128xf32>
    %88 = arith.truncf %87 : vector<64x128xf32> to vector<64x128xbf16>
    %c0_94 = arith.constant 0 : index
    %c640 = arith.constant 640 : index
    %89 = vector.load %arg5[%c0_94, %c640] : memref<128x1152xbf16, #tpu.memory_space<vmem>>, vector<64x128xbf16>
    tpu.vector_store %arg5[%c0_94, %c640], %88 {strides = array<i32>} : memref<128x1152xbf16, #tpu.memory_space<vmem>>, vector<64x128xbf16>,
    %c0_95 = arith.constant 0 : index
    %c10 = arith.constant 10 : index
    %c0_96 = arith.constant 0 : index
    %c0_97 = arith.constant 0 : index
    %90 = vector.load %arg1[%c0_95, %c10, %c0_96, %c0_97] : memref<2x18x18x32xf32, #tpu.memory_space<vmem>>, vector<1x4x16x32xf32>
    %91 = vector.shape_cast %90 : vector<1x4x16x32xf32> to vector<4x16x32xf32>
    %92 = vector.shape_cast %91 : vector<4x16x32xf32> to vector<64x32xf32>
    %c0_98 = arith.constant 0 : index
    %c10_99 = arith.constant 10 : index
    %c1_100 = arith.constant 1 : index
    %c0_101 = arith.constant 0 : index
    %93 = vector.load %arg1[%c0_98, %c10_99, %c1_100, %c0_101] : memref<2x18x18x32xf32, #tpu.memory_space<vmem>>, vector<1x4x16x32xf32>
    %94 = vector.shape_cast %93 : vector<1x4x16x32xf32> to vector<4x16x32xf32>
    %95 = vector.shape_cast %94 : vector<4x16x32xf32> to vector<64x32xf32>
    %c0_102 = arith.constant 0 : index
    %c10_103 = arith.constant 10 : index
    %c2_104 = arith.constant 2 : index
    %c0_105 = arith.constant 0 : index
    %96 = vector.load %arg1[%c0_102, %c10_103, %c2_104, %c0_105] : memref<2x18x18x32xf32, #tpu.memory_space<vmem>>, vector<1x4x16x32xf32>
    %97 = vector.shape_cast %96 : vector<1x4x16x32xf32> to vector<4x16x32xf32>
    %98 = vector.shape_cast %97 : vector<4x16x32xf32> to vector<64x32xf32>
    %c0_106 = arith.constant 0 : index
    %c12 = arith.constant 12 : index
    %c0_107 = arith.constant 0 : index
    %c0_108 = arith.constant 0 : index
    %99 = vector.load %arg1[%c0_106, %c12, %c0_107, %c0_108] : memref<2x18x18x32xf32, #tpu.memory_space<vmem>>, vector<1x4x16x32xf32>
    %100 = vector.shape_cast %99 : vector<1x4x16x32xf32> to vector<4x16x32xf32>
    %101 = vector.shape_cast %100 : vector<4x16x32xf32> to vector<64x32xf32>
    %102 = tpu.concatenate %92, %95, %98, %101 in 1 : vector<64x32xf32>, vector<64x32xf32>, vector<64x32xf32>, vector<64x32xf32> -> vector<64x128xf32>
    %103 = arith.truncf %102 : vector<64x128xf32> to vector<64x128xbf16>
    %c0_109 = arith.constant 0 : index
    %c768 = arith.constant 768 : index
    %104 = vector.load %arg5[%c0_109, %c768] : memref<128x1152xbf16, #tpu.memory_space<vmem>>, vector<64x128xbf16>
    tpu.vector_store %arg5[%c0_109, %c768], %103 {strides = array<i32>} : memref<128x1152xbf16, #tpu.memory_space<vmem>>, vector<64x128xbf16>,
    %c0_110 = arith.constant 0 : index
    %c12_111 = arith.constant 12 : index
    %c1_112 = arith.constant 1 : index
    %c0_113 = arith.constant 0 : index
    %105 = vector.load %arg1[%c0_110, %c12_111, %c1_112, %c0_113] : memref<2x18x18x32xf32, #tpu.memory_space<vmem>>, vector<1x4x16x32xf32>
    %106 = vector.shape_cast %105 : vector<1x4x16x32xf32> to vector<4x16x32xf32>
    %107 = vector.shape_cast %106 : vector<4x16x32xf32> to vector<64x32xf32>
    %c0_114 = arith.constant 0 : index
    %c12_115 = arith.constant 12 : index
    %c2_116 = arith.constant 2 : index
    %c0_117 = arith.constant 0 : index
    %108 = vector.load %arg1[%c0_114, %c12_115, %c2_116, %c0_117] : memref<2x18x18x32xf32, #tpu.memory_space<vmem>>, vector<1x4x16x32xf32>
    %109 = vector.shape_cast %108 : vector<1x4x16x32xf32> to vector<4x16x32xf32>
    %110 = vector.shape_cast %109 : vector<4x16x32xf32> to vector<64x32xf32>
    %c0_118 = arith.constant 0 : index
    %c13 = arith.constant 13 : index
    %c0_119 = arith.constant 0 : index
    %c0_120 = arith.constant 0 : index
    %111 = vector.load %arg1[%c0_118, %c13, %c0_119, %c0_120] : memref<2x18x18x32xf32, #tpu.memory_space<vmem>>, vector<1x4x16x32xf32>
    %112 = vector.shape_cast %111 : vector<1x4x16x32xf32> to vector<4x16x32xf32>
    %113 = vector.shape_cast %112 : vector<4x16x32xf32> to vector<64x32xf32>
    %c0_121 = arith.constant 0 : index
    %c13_122 = arith.constant 13 : index
    %c1_123 = arith.constant 1 : index
    %c0_124 = arith.constant 0 : index
    %114 = vector.load %arg1[%c0_121, %c13_122, %c1_123, %c0_124] : memref<2x18x18x32xf32, #tpu.memory_space<vmem>>, vector<1x4x16x32xf32>
    %115 = vector.shape_cast %114 : vector<1x4x16x32xf32> to vector<4x16x32xf32>
    %116 = vector.shape_cast %115 : vector<4x16x32xf32> to vector<64x32xf32>
    %117 = tpu.concatenate %107, %110, %113, %116 in 1 : vector<64x32xf32>, vector<64x32xf32>, vector<64x32xf32>, vector<64x32xf32> -> vector<64x128xf32>
    %118 = arith.truncf %117 : vector<64x128xf32> to vector<64x128xbf16>
    %c0_125 = arith.constant 0 : index
    %c896 = arith.constant 896 : index
    %119 = vector.load %arg5[%c0_125, %c896] : memref<128x1152xbf16, #tpu.memory_space<vmem>>, vector<64x128xbf16>
    tpu.vector_store %arg5[%c0_125, %c896], %118 {strides = array<i32>} : memref<128x1152xbf16, #tpu.memory_space<vmem>>, vector<64x128xbf16>,
    %c0_126 = arith.constant 0 : index
    %c13_127 = arith.constant 13 : index
    %c2_128 = arith.constant 2 : index
    %c0_129 = arith.constant 0 : index
    %120 = vector.load %arg1[%c0_126, %c13_127, %c2_128, %c0_129] : memref<2x18x18x32xf32, #tpu.memory_space<vmem>>, vector<1x4x16x32xf32>
    %121 = vector.shape_cast %120 : vector<1x4x16x32xf32> to vector<4x16x32xf32>
    %122 = vector.shape_cast %121 : vector<4x16x32xf32> to vector<64x32xf32>
    %c0_130 = arith.constant 0 : index
    %c14 = arith.constant 14 : index
    %c0_131 = arith.constant 0 : index
    %c0_132 = arith.constant 0 : index
    %123 = vector.load %arg1[%c0_130, %c14, %c0_131, %c0_132] : memref<2x18x18x32xf32, #tpu.memory_space<vmem>>, vector<1x4x16x32xf32>
    %124 = vector.shape_cast %123 : vector<1x4x16x32xf32> to vector<4x16x32xf32>
    %125 = vector.shape_cast %124 : vector<4x16x32xf32> to vector<64x32xf32>
    %c0_133 = arith.constant 0 : index
    %c14_134 = arith.constant 14 : index
    %c1_135 = arith.constant 1 : index
    %c0_136 = arith.constant 0 : index
    %126 = vector.load %arg1[%c0_133, %c14_134, %c1_135, %c0_136] : memref<2x18x18x32xf32, #tpu.memory_space<vmem>>, vector<1x4x16x32xf32>
    %127 = vector.shape_cast %126 : vector<1x4x16x32xf32> to vector<4x16x32xf32>
    %128 = vector.shape_cast %127 : vector<4x16x32xf32> to vector<64x32xf32>
    %c0_137 = arith.constant 0 : index
    %c14_138 = arith.constant 14 : index
    %c2_139 = arith.constant 2 : index
    %c0_140 = arith.constant 0 : index
    %129 = vector.load %arg1[%c0_137, %c14_138, %c2_139, %c0_140] : memref<2x18x18x32xf32, #tpu.memory_space<vmem>>, vector<1x4x16x32xf32>
    %130 = vector.shape_cast %129 : vector<1x4x16x32xf32> to vector<4x16x32xf32>
    %131 = vector.shape_cast %130 : vector<4x16x32xf32> to vector<64x32xf32>
    %132 = tpu.concatenate %122, %125, %128, %131 in 1 : vector<64x32xf32>, vector<64x32xf32>, vector<64x32xf32>, vector<64x32xf32> -> vector<64x128xf32>
    %133 = arith.truncf %132 : vector<64x128xf32> to vector<64x128xbf16>
    %c0_141 = arith.constant 0 : index
    %c1024 = arith.constant 1024 : index
    %134 = vector.load %arg5[%c0_141, %c1024] : memref<128x1152xbf16, #tpu.memory_space<vmem>>, vector<64x128xbf16>
    tpu.vector_store %arg5[%c0_141, %c1024], %133 {strides = array<i32>} : memref<128x1152xbf16, #tpu.memory_space<vmem>>, vector<64x128xbf16>,
    %c1_142 = arith.constant 1 : index
    %c0_143 = arith.constant 0 : index
    %c0_144 = arith.constant 0 : index
    %c0_145 = arith.constant 0 : index
    %135 = vector.load %arg1[%c1_142, %c0_143, %c0_144, %c0_145] : memref<2x18x18x32xf32, #tpu.memory_space<vmem>>, vector<1x4x16x32xf32>
    %136 = vector.shape_cast %135 : vector<1x4x16x32xf32> to vector<4x16x32xf32>
    %137 = vector.shape_cast %136 : vector<4x16x32xf32> to vector<64x32xf32>
    %c1_146 = arith.constant 1 : index
    %c0_147 = arith.constant 0 : index
    %c1_148 = arith.constant 1 : index
    %c0_149 = arith.constant 0 : index
    %138 = vector.load %arg1[%c1_146, %c0_147, %c1_148, %c0_149] : memref<2x18x18x32xf32, #tpu.memory_space<vmem>>, vector<1x4x16x32xf32>
    %139 = vector.shape_cast %138 : vector<1x4x16x32xf32> to vector<4x16x32xf32>
    %140 = vector.shape_cast %139 : vector<4x16x32xf32> to vector<64x32xf32>
    %c1_150 = arith.constant 1 : index
    %c0_151 = arith.constant 0 : index
    %c2_152 = arith.constant 2 : index
    %c0_153 = arith.constant 0 : index
    %141 = vector.load %arg1[%c1_150, %c0_151, %c2_152, %c0_153] : memref<2x18x18x32xf32, #tpu.memory_space<vmem>>, vector<1x4x16x32xf32>
    %142 = vector.shape_cast %141 : vector<1x4x16x32xf32> to vector<4x16x32xf32>
    %143 = vector.shape_cast %142 : vector<4x16x32xf32> to vector<64x32xf32>
    %c1_154 = arith.constant 1 : index
    %c1_155 = arith.constant 1 : index
    %c0_156 = arith.constant 0 : index
    %c0_157 = arith.constant 0 : index
    %144 = vector.load %arg1[%c1_154, %c1_155, %c0_156, %c0_157] : memref<2x18x18x32xf32, #tpu.memory_space<vmem>>, vector<1x4x16x32xf32>
    %145 = vector.shape_cast %144 : vector<1x4x16x32xf32> to vector<4x16x32xf32>
    %146 = vector.shape_cast %145 : vector<4x16x32xf32> to vector<64x32xf32>
    %147 = tpu.concatenate %137, %140, %143, %146 in 1 : vector<64x32xf32>, vector<64x32xf32>, vector<64x32xf32>, vector<64x32xf32> -> vector<64x128xf32>
    %148 = arith.truncf %147 : vector<64x128xf32> to vector<64x128xbf16>
    %c64 = arith.constant 64 : index
    %c0_158 = arith.constant 0 : index
    %149 = vector.load %arg5[%c64, %c0_158] : memref<128x1152xbf16, #tpu.memory_space<vmem>>, vector<64x128xbf16>
    tpu.vector_store %arg5[%c64, %c0_158], %148 {strides = array<i32>} : memref<128x1152xbf16, #tpu.memory_space<vmem>>, vector<64x128xbf16>,
    %c1_159 = arith.constant 1 : index
    %c1_160 = arith.constant 1 : index
    %c1_161 = arith.constant 1 : index
    %c0_162 = arith.constant 0 : index
    %150 = vector.load %arg1[%c1_159, %c1_160, %c1_161, %c0_162] : memref<2x18x18x32xf32, #tpu.memory_space<vmem>>, vector<1x4x16x32xf32>
    %151 = vector.shape_cast %150 : vector<1x4x16x32xf32> to vector<4x16x32xf32>
    %152 = vector.shape_cast %151 : vector<4x16x32xf32> to vector<64x32xf32>
    %c1_163 = arith.constant 1 : index
    %c1_164 = arith.constant 1 : index
    %c2_165 = arith.constant 2 : index
    %c0_166 = arith.constant 0 : index
    %153 = vector.load %arg1[%c1_163, %c1_164, %c2_165, %c0_166] : memref<2x18x18x32xf32, #tpu.memory_space<vmem>>, vector<1x4x16x32xf32>
    %154 = vector.shape_cast %153 : vector<1x4x16x32xf32> to vector<4x16x32xf32>
    %155 = vector.shape_cast %154 : vector<4x16x32xf32> to vector<64x32xf32>
    %c1_167 = arith.constant 1 : index
    %c2_168 = arith.constant 2 : index
    %c0_169 = arith.constant 0 : index
    %c0_170 = arith.constant 0 : index
    %156 = vector.load %arg1[%c1_167, %c2_168, %c0_169, %c0_170] : memref<2x18x18x32xf32, #tpu.memory_space<vmem>>, vector<1x4x16x32xf32>
    %157 = vector.shape_cast %156 : vector<1x4x16x32xf32> to vector<4x16x32xf32>
    %158 = vector.shape_cast %157 : vector<4x16x32xf32> to vector<64x32xf32>
    %c1_171 = arith.constant 1 : index
    %c2_172 = arith.constant 2 : index
    %c1_173 = arith.constant 1 : index
    %c0_174 = arith.constant 0 : index
    %159 = vector.load %arg1[%c1_171, %c2_172, %c1_173, %c0_174] : memref<2x18x18x32xf32, #tpu.memory_space<vmem>>, vector<1x4x16x32xf32>
    %160 = vector.shape_cast %159 : vector<1x4x16x32xf32> to vector<4x16x32xf32>
    %161 = vector.shape_cast %160 : vector<4x16x32xf32> to vector<64x32xf32>
    %162 = tpu.concatenate %152, %155, %158, %161 in 1 : vector<64x32xf32>, vector<64x32xf32>, vector<64x32xf32>, vector<64x32xf32> -> vector<64x128xf32>
    %163 = arith.truncf %162 : vector<64x128xf32> to vector<64x128xbf16>
    %c64_175 = arith.constant 64 : index
    %c128_176 = arith.constant 128 : index
    %164 = vector.load %arg5[%c64_175, %c128_176] : memref<128x1152xbf16, #tpu.memory_space<vmem>>, vector<64x128xbf16>
    tpu.vector_store %arg5[%c64_175, %c128_176], %163 {strides = array<i32>} : memref<128x1152xbf16, #tpu.memory_space<vmem>>, vector<64x128xbf16>,
    %c1_177 = arith.constant 1 : index
    %c2_178 = arith.constant 2 : index
    %c2_179 = arith.constant 2 : index
    %c0_180 = arith.constant 0 : index
    %165 = vector.load %arg1[%c1_177, %c2_178, %c2_179, %c0_180] : memref<2x18x18x32xf32, #tpu.memory_space<vmem>>, vector<1x4x16x32xf32>
    %166 = vector.shape_cast %165 : vector<1x4x16x32xf32> to vector<4x16x32xf32>
    %167 = vector.shape_cast %166 : vector<4x16x32xf32> to vector<64x32xf32>
    %c1_181 = arith.constant 1 : index
    %c4_182 = arith.constant 4 : index
    %c0_183 = arith.constant 0 : index
    %c0_184 = arith.constant 0 : index
    %168 = vector.load %arg1[%c1_181, %c4_182, %c0_183, %c0_184] : memref<2x18x18x32xf32, #tpu.memory_space<vmem>>, vector<1x4x16x32xf32>
    %169 = vector.shape_cast %168 : vector<1x4x16x32xf32> to vector<4x16x32xf32>
    %170 = vector.shape_cast %169 : vector<4x16x32xf32> to vector<64x32xf32>
    %c1_185 = arith.constant 1 : index
    %c4_186 = arith.constant 4 : index
    %c1_187 = arith.constant 1 : index
    %c0_188 = arith.constant 0 : index
    %171 = vector.load %arg1[%c1_185, %c4_186, %c1_187, %c0_188] : memref<2x18x18x32xf32, #tpu.memory_space<vmem>>, vector<1x4x16x32xf32>
    %172 = vector.shape_cast %171 : vector<1x4x16x32xf32> to vector<4x16x32xf32>
    %173 = vector.shape_cast %172 : vector<4x16x32xf32> to vector<64x32xf32>
    %c1_189 = arith.constant 1 : index
    %c4_190 = arith.constant 4 : index
    %c2_191 = arith.constant 2 : index
    %c0_192 = arith.constant 0 : index
    %174 = vector.load %arg1[%c1_189, %c4_190, %c2_191, %c0_192] : memref<2x18x18x32xf32, #tpu.memory_space<vmem>>, vector<1x4x16x32xf32>
    %175 = vector.shape_cast %174 : vector<1x4x16x32xf32> to vector<4x16x32xf32>
    %176 = vector.shape_cast %175 : vector<4x16x32xf32> to vector<64x32xf32>
    %177 = tpu.concatenate %167, %170, %173, %176 in 1 : vector<64x32xf32>, vector<64x32xf32>, vector<64x32xf32>, vector<64x32xf32> -> vector<64x128xf32>
    %178 = arith.truncf %177 : vector<64x128xf32> to vector<64x128xbf16>
    %c64_193 = arith.constant 64 : index
    %c256_194 = arith.constant 256 : index
    %179 = vector.load %arg5[%c64_193, %c256_194] : memref<128x1152xbf16, #tpu.memory_space<vmem>>, vector<64x128xbf16>
    tpu.vector_store %arg5[%c64_193, %c256_194], %178 {strides = array<i32>} : memref<128x1152xbf16, #tpu.memory_space<vmem>>, vector<64x128xbf16>,
    %c1_195 = arith.constant 1 : index
    %c5_196 = arith.constant 5 : index
    %c0_197 = arith.constant 0 : index
    %c0_198 = arith.constant 0 : index
    %180 = vector.load %arg1[%c1_195, %c5_196, %c0_197, %c0_198] : memref<2x18x18x32xf32, #tpu.memory_space<vmem>>, vector<1x4x16x32xf32>
    %181 = vector.shape_cast %180 : vector<1x4x16x32xf32> to vector<4x16x32xf32>
    %182 = vector.shape_cast %181 : vector<4x16x32xf32> to vector<64x32xf32>
    %c1_199 = arith.constant 1 : index
    %c5_200 = arith.constant 5 : index
    %c1_201 = arith.constant 1 : index
    %c0_202 = arith.constant 0 : index
    %183 = vector.load %arg1[%c1_199, %c5_200, %c1_201, %c0_202] : memref<2x18x18x32xf32, #tpu.memory_space<vmem>>, vector<1x4x16x32xf32>
    %184 = vector.shape_cast %183 : vector<1x4x16x32xf32> to vector<4x16x32xf32>
    %185 = vector.shape_cast %184 : vector<4x16x32xf32> to vector<64x32xf32>
    %c1_203 = arith.constant 1 : index
    %c5_204 = arith.constant 5 : index
    %c2_205 = arith.constant 2 : index
    %c0_206 = arith.constant 0 : index
    %186 = vector.load %arg1[%c1_203, %c5_204, %c2_205, %c0_206] : memref<2x18x18x32xf32, #tpu.memory_space<vmem>>, vector<1x4x16x32xf32>
    %187 = vector.shape_cast %186 : vector<1x4x16x32xf32> to vector<4x16x32xf32>
    %188 = vector.shape_cast %187 : vector<4x16x32xf32> to vector<64x32xf32>
    %c1_207 = arith.constant 1 : index
    %c6_208 = arith.constant 6 : index
    %c0_209 = arith.constant 0 : index
    %c0_210 = arith.constant 0 : index
    %189 = vector.load %arg1[%c1_207, %c6_208, %c0_209, %c0_210] : memref<2x18x18x32xf32, #tpu.memory_space<vmem>>, vector<1x4x16x32xf32>
    %190 = vector.shape_cast %189 : vector<1x4x16x32xf32> to vector<4x16x32xf32>
    %191 = vector.shape_cast %190 : vector<4x16x32xf32> to vector<64x32xf32>
    %192 = tpu.concatenate %182, %185, %188, %191 in 1 : vector<64x32xf32>, vector<64x32xf32>, vector<64x32xf32>, vector<64x32xf32> -> vector<64x128xf32>
    %193 = arith.truncf %192 : vector<64x128xf32> to vector<64x128xbf16>
    %c64_211 = arith.constant 64 : index
    %c384_212 = arith.constant 384 : index
    %194 = vector.load %arg5[%c64_211, %c384_212] : memref<128x1152xbf16, #tpu.memory_space<vmem>>, vector<64x128xbf16>
    tpu.vector_store %arg5[%c64_211, %c384_212], %193 {strides = array<i32>} : memref<128x1152xbf16, #tpu.memory_space<vmem>>, vector<64x128xbf16>,
    %c1_213 = arith.constant 1 : index
    %c6_214 = arith.constant 6 : index
    %c1_215 = arith.constant 1 : index
    %c0_216 = arith.constant 0 : index
    %195 = vector.load %arg1[%c1_213, %c6_214, %c1_215, %c0_216] : memref<2x18x18x32xf32, #tpu.memory_space<vmem>>, vector<1x4x16x32xf32>
    %196 = vector.shape_cast %195 : vector<1x4x16x32xf32> to vector<4x16x32xf32>
    %197 = vector.shape_cast %196 : vector<4x16x32xf32> to vector<64x32xf32>
    %c1_217 = arith.constant 1 : index
    %c6_218 = arith.constant 6 : index
    %c2_219 = arith.constant 2 : index
    %c0_220 = arith.constant 0 : index
    %198 = vector.load %arg1[%c1_217, %c6_218, %c2_219, %c0_220] : memref<2x18x18x32xf32, #tpu.memory_space<vmem>>, vector<1x4x16x32xf32>
    %199 = vector.shape_cast %198 : vector<1x4x16x32xf32> to vector<4x16x32xf32>
    %200 = vector.shape_cast %199 : vector<4x16x32xf32> to vector<64x32xf32>
    %c1_221 = arith.constant 1 : index
    %c8_222 = arith.constant 8 : index
    %c0_223 = arith.constant 0 : index
    %c0_224 = arith.constant 0 : index
    %201 = vector.load %arg1[%c1_221, %c8_222, %c0_223, %c0_224] : memref<2x18x18x32xf32, #tpu.memory_space<vmem>>, vector<1x4x16x32xf32>
    %202 = vector.shape_cast %201 : vector<1x4x16x32xf32> to vector<4x16x32xf32>
    %203 = vector.shape_cast %202 : vector<4x16x32xf32> to vector<64x32xf32>
    %c1_225 = arith.constant 1 : index
    %c8_226 = arith.constant 8 : index
    %c1_227 = arith.constant 1 : index
    %c0_228 = arith.constant 0 : index
    %204 = vector.load %arg1[%c1_225, %c8_226, %c1_227, %c0_228] : memref<2x18x18x32xf32, #tpu.memory_space<vmem>>, vector<1x4x16x32xf32>
    %205 = vector.shape_cast %204 : vector<1x4x16x32xf32> to vector<4x16x32xf32>
    %206 = vector.shape_cast %205 : vector<4x16x32xf32> to vector<64x32xf32>
    %207 = tpu.concatenate %197, %200, %203, %206 in 1 : vector<64x32xf32>, vector<64x32xf32>, vector<64x32xf32>, vector<64x32xf32> -> vector<64x128xf32>
    %208 = arith.truncf %207 : vector<64x128xf32> to vector<64x128xbf16>
    %c64_229 = arith.constant 64 : index
    %c512_230 = arith.constant 512 : index
    %209 = vector.load %arg5[%c64_229, %c512_230] : memref<128x1152xbf16, #tpu.memory_space<vmem>>, vector<64x128xbf16>
    tpu.vector_store %arg5[%c64_229, %c512_230], %208 {strides = array<i32>} : memref<128x1152xbf16, #tpu.memory_space<vmem>>, vector<64x128xbf16>,
    %c1_231 = arith.constant 1 : index
    %c8_232 = arith.constant 8 : index
    %c2_233 = arith.constant 2 : index
    %c0_234 = arith.constant 0 : index
    %210 = vector.load %arg1[%c1_231, %c8_232, %c2_233, %c0_234] : memref<2x18x18x32xf32, #tpu.memory_space<vmem>>, vector<1x4x16x32xf32>
    %211 = vector.shape_cast %210 : vector<1x4x16x32xf32> to vector<4x16x32xf32>
    %212 = vector.shape_cast %211 : vector<4x16x32xf32> to vector<64x32xf32>
    %c1_235 = arith.constant 1 : index
    %c9_236 = arith.constant 9 : index
    %c0_237 = arith.constant 0 : index
    %c0_238 = arith.constant 0 : index
    %213 = vector.load %arg1[%c1_235, %c9_236, %c0_237, %c0_238] : memref<2x18x18x32xf32, #tpu.memory_space<vmem>>, vector<1x4x16x32xf32>
    %214 = vector.shape_cast %213 : vector<1x4x16x32xf32> to vector<4x16x32xf32>
    %215 = vector.shape_cast %214 : vector<4x16x32xf32> to vector<64x32xf32>
    %c1_239 = arith.constant 1 : index
    %c9_240 = arith.constant 9 : index
    %c1_241 = arith.constant 1 : index
    %c0_242 = arith.constant 0 : index
    %216 = vector.load %arg1[%c1_239, %c9_240, %c1_241, %c0_242] : memref<2x18x18x32xf32, #tpu.memory_space<vmem>>, vector<1x4x16x32xf32>
    %217 = vector.shape_cast %216 : vector<1x4x16x32xf32> to vector<4x16x32xf32>
    %218 = vector.shape_cast %217 : vector<4x16x32xf32> to vector<64x32xf32>
    %c1_243 = arith.constant 1 : index
    %c9_244 = arith.constant 9 : index
    %c2_245 = arith.constant 2 : index
    %c0_246 = arith.constant 0 : index
    %219 = vector.load %arg1[%c1_243, %c9_244, %c2_245, %c0_246] : memref<2x18x18x32xf32, #tpu.memory_space<vmem>>, vector<1x4x16x32xf32>
    %220 = vector.shape_cast %219 : vector<1x4x16x32xf32> to vector<4x16x32xf32>
    %221 = vector.shape_cast %220 : vector<4x16x32xf32> to vector<64x32xf32>
    %222 = tpu.concatenate %212, %215, %218, %221 in 1 : vector<64x32xf32>, vector<64x32xf32>, vector<64x32xf32>, vector<64x32xf32> -> vector<64x128xf32>
    %223 = arith.truncf %222 : vector<64x128xf32> to vector<64x128xbf16>
    %c64_247 = arith.constant 64 : index
    %c640_248 = arith.constant 640 : index
    %224 = vector.load %arg5[%c64_247, %c640_248] : memref<128x1152xbf16, #tpu.memory_space<vmem>>, vector<64x128xbf16>
    tpu.vector_store %arg5[%c64_247, %c640_248], %223 {strides = array<i32>} : memref<128x1152xbf16, #tpu.memory_space<vmem>>, vector<64x128xbf16>,
    %c1_249 = arith.constant 1 : index
    %c10_250 = arith.constant 10 : index
    %c0_251 = arith.constant 0 : index
    %c0_252 = arith.constant 0 : index
    %225 = vector.load %arg1[%c1_249, %c10_250, %c0_251, %c0_252] : memref<2x18x18x32xf32, #tpu.memory_space<vmem>>, vector<1x4x16x32xf32>
    %226 = vector.shape_cast %225 : vector<1x4x16x32xf32> to vector<4x16x32xf32>
    %227 = vector.shape_cast %226 : vector<4x16x32xf32> to vector<64x32xf32>
    %c1_253 = arith.constant 1 : index
    %c10_254 = arith.constant 10 : index
    %c1_255 = arith.constant 1 : index
    %c0_256 = arith.constant 0 : index
    %228 = vector.load %arg1[%c1_253, %c10_254, %c1_255, %c0_256] : memref<2x18x18x32xf32, #tpu.memory_space<vmem>>, vector<1x4x16x32xf32>
    %229 = vector.shape_cast %228 : vector<1x4x16x32xf32> to vector<4x16x32xf32>
    %230 = vector.shape_cast %229 : vector<4x16x32xf32> to vector<64x32xf32>
    %c1_257 = arith.constant 1 : index
    %c10_258 = arith.constant 10 : index
    %c2_259 = arith.constant 2 : index
    %c0_260 = arith.constant 0 : index
    %231 = vector.load %arg1[%c1_257, %c10_258, %c2_259, %c0_260] : memref<2x18x18x32xf32, #tpu.memory_space<vmem>>, vector<1x4x16x32xf32>
    %232 = vector.shape_cast %231 : vector<1x4x16x32xf32> to vector<4x16x32xf32>
    %233 = vector.shape_cast %232 : vector<4x16x32xf32> to vector<64x32xf32>
    %c1_261 = arith.constant 1 : index
    %c12_262 = arith.constant 12 : index
    %c0_263 = arith.constant 0 : index
    %c0_264 = arith.constant 0 : index
    %234 = vector.load %arg1[%c1_261, %c12_262, %c0_263, %c0_264] : memref<2x18x18x32xf32, #tpu.memory_space<vmem>>, vector<1x4x16x32xf32>
    %235 = vector.shape_cast %234 : vector<1x4x16x32xf32> to vector<4x16x32xf32>
    %236 = vector.shape_cast %235 : vector<4x16x32xf32> to vector<64x32xf32>
    %237 = tpu.concatenate %227, %230, %233, %236 in 1 : vector<64x32xf32>, vector<64x32xf32>, vector<64x32xf32>, vector<64x32xf32> -> vector<64x128xf32>
    %238 = arith.truncf %237 : vector<64x128xf32> to vector<64x128xbf16>
    %c64_265 = arith.constant 64 : index
    %c768_266 = arith.constant 768 : index
    %239 = vector.load %arg5[%c64_265, %c768_266] : memref<128x1152xbf16, #tpu.memory_space<vmem>>, vector<64x128xbf16>
    tpu.vector_store %arg5[%c64_265, %c768_266], %238 {strides = array<i32>} : memref<128x1152xbf16, #tpu.memory_space<vmem>>, vector<64x128xbf16>,
    %c1_267 = arith.constant 1 : index
    %c12_268 = arith.constant 12 : index
    %c1_269 = arith.constant 1 : index
    %c0_270 = arith.constant 0 : index
    %240 = vector.load %arg1[%c1_267, %c12_268, %c1_269, %c0_270] : memref<2x18x18x32xf32, #tpu.memory_space<vmem>>, vector<1x4x16x32xf32>
    %241 = vector.shape_cast %240 : vector<1x4x16x32xf32> to vector<4x16x32xf32>
    %242 = vector.shape_cast %241 : vector<4x16x32xf32> to vector<64x32xf32>
    %c1_271 = arith.constant 1 : index
    %c12_272 = arith.constant 12 : index
    %c2_273 = arith.constant 2 : index
    %c0_274 = arith.constant 0 : index
    %243 = vector.load %arg1[%c1_271, %c12_272, %c2_273, %c0_274] : memref<2x18x18x32xf32, #tpu.memory_space<vmem>>, vector<1x4x16x32xf32>
    %244 = vector.shape_cast %243 : vector<1x4x16x32xf32> to vector<4x16x32xf32>
    %245 = vector.shape_cast %244 : vector<4x16x32xf32> to vector<64x32xf32>
    %c1_275 = arith.constant 1 : index
    %c13_276 = arith.constant 13 : index
    %c0_277 = arith.constant 0 : index
    %c0_278 = arith.constant 0 : index
    %246 = vector.load %arg1[%c1_275, %c13_276, %c0_277, %c0_278] : memref<2x18x18x32xf32, #tpu.memory_space<vmem>>, vector<1x4x16x32xf32>
    %247 = vector.shape_cast %246 : vector<1x4x16x32xf32> to vector<4x16x32xf32>
    %248 = vector.shape_cast %247 : vector<4x16x32xf32> to vector<64x32xf32>
    %c1_279 = arith.constant 1 : index
    %c13_280 = arith.constant 13 : index
    %c1_281 = arith.constant 1 : index
    %c0_282 = arith.constant 0 : index
    %249 = vector.load %arg1[%c1_279, %c13_280, %c1_281, %c0_282] : memref<2x18x18x32xf32, #tpu.memory_space<vmem>>, vector<1x4x16x32xf32>
    %250 = vector.shape_cast %249 : vector<1x4x16x32xf32> to vector<4x16x32xf32>
    %251 = vector.shape_cast %250 : vector<4x16x32xf32> to vector<64x32xf32>
    %252 = tpu.concatenate %242, %245, %248, %251 in 1 : vector<64x32xf32>, vector<64x32xf32>, vector<64x32xf32>, vector<64x32xf32> -> vector<64x128xf32>
    %253 = arith.truncf %252 : vector<64x128xf32> to vector<64x128xbf16>
    %c64_283 = arith.constant 64 : index
    %c896_284 = arith.constant 896 : index
    %254 = vector.load %arg5[%c64_283, %c896_284] : memref<128x1152xbf16, #tpu.memory_space<vmem>>, vector<64x128xbf16>
    tpu.vector_store %arg5[%c64_283, %c896_284], %253 {strides = array<i32>} : memref<128x1152xbf16, #tpu.memory_space<vmem>>, vector<64x128xbf16>,
    %c1_285 = arith.constant 1 : index
    %c13_286 = arith.constant 13 : index
    %c2_287 = arith.constant 2 : index
    %c0_288 = arith.constant 0 : index
    %255 = vector.load %arg1[%c1_285, %c13_286, %c2_287, %c0_288] : memref<2x18x18x32xf32, #tpu.memory_space<vmem>>, vector<1x4x16x32xf32>
    %256 = vector.shape_cast %255 : vector<1x4x16x32xf32> to vector<4x16x32xf32>
    %257 = vector.shape_cast %256 : vector<4x16x32xf32> to vector<64x32xf32>
    %c1_289 = arith.constant 1 : index
    %c14_290 = arith.constant 14 : index
    %c0_291 = arith.constant 0 : index
    %c0_292 = arith.constant 0 : index
    %258 = vector.load %arg1[%c1_289, %c14_290, %c0_291, %c0_292] : memref<2x18x18x32xf32, #tpu.memory_space<vmem>>, vector<1x4x16x32xf32>
    %259 = vector.shape_cast %258 : vector<1x4x16x32xf32> to vector<4x16x32xf32>
    %260 = vector.shape_cast %259 : vector<4x16x32xf32> to vector<64x32xf32>
    %c1_293 = arith.constant 1 : index
    %c14_294 = arith.constant 14 : index
    %c1_295 = arith.constant 1 : index
    %c0_296 = arith.constant 0 : index
    %261 = vector.load %arg1[%c1_293, %c14_294, %c1_295, %c0_296] : memref<2x18x18x32xf32, #tpu.memory_space<vmem>>, vector<1x4x16x32xf32>
    %262 = vector.shape_cast %261 : vector<1x4x16x32xf32> to vector<4x16x32xf32>
    %263 = vector.shape_cast %262 : vector<4x16x32xf32> to vector<64x32xf32>
    %c1_297 = arith.constant 1 : index
    %c14_298 = arith.constant 14 : index
    %c2_299 = arith.constant 2 : index
    %c0_300 = arith.constant 0 : index
    %264 = vector.load %arg1[%c1_297, %c14_298, %c2_299, %c0_300] : memref<2x18x18x32xf32, #tpu.memory_space<vmem>>, vector<1x4x16x32xf32>
    %265 = vector.shape_cast %264 : vector<1x4x16x32xf32> to vector<4x16x32xf32>
    %266 = vector.shape_cast %265 : vector<4x16x32xf32> to vector<64x32xf32>
    %267 = tpu.concatenate %257, %260, %263, %266 in 1 : vector<64x32xf32>, vector<64x32xf32>, vector<64x32xf32>, vector<64x32xf32> -> vector<64x128xf32>
    %268 = arith.truncf %267 : vector<64x128xf32> to vector<64x128xbf16>
    %c64_301 = arith.constant 64 : index
    %c1024_302 = arith.constant 1024 : index
    %269 = vector.load %arg5[%c64_301, %c1024_302] : memref<128x1152xbf16, #tpu.memory_space<vmem>>, vector<64x128xbf16>
    tpu.vector_store %arg5[%c64_301, %c1024_302], %268 {strides = array<i32>} : memref<128x1152xbf16, #tpu.memory_space<vmem>>, vector<64x128xbf16>,
    %c0_303 = arith.constant 0 : index
    %c0_304 = arith.constant 0 : index
    %270 = vector.load %arg5[%c0_303, %c0_304] : memref<128x1152xbf16, #tpu.memory_space<vmem>>, vector<128x1152xbf16>
    %c0_305 = arith.constant 0 : index
    %c0_306 = arith.constant 0 : index
    %271 = vector.load %arg2[%c0_305, %c0_306] : memref<1152x128xbf16, #tpu.memory_space<vmem>>, vector<1152x128xbf16>
    %cst = arith.constant dense<0.000000e+00> : vector<128x128xf32>
    %272 = tpu.matmul %270, %271, %cst {dimension_numbers = #tpu.dot_dimension_numbers<[1], [0], [0], [1], [0, 0, 1, 1], [], []>} : vector<128x1152xbf16>, vector<1152x128xbf16>, vector<128x128xf32> -> vector<128x128xf32>
    %c0_307 = arith.constant 0 : index
    %c0_308 = arith.constant 0 : index
    %273 = vector.load %arg3[%c0_307, %c0_308] : memref<1x128xf32, #tpu.memory_space<vmem>>, vector<1x128xf32>
    %274 = vector.broadcast %273 : vector<1x128xf32> to vector<128x128xf32>
    %275 = arith.addf %272, %274 : vector<128x128xf32>
    %cst_309 = arith.constant 2.000000e-01 : f32
    %276 = vector.broadcast %cst_309 : f32 to vector<128x128xf32>
    %277 = arith.mulf %276, %275 : vector<128x128xf32>
    %278 = arith.maximumf %275, %277 : vector<128x128xf32>
    %279 = vector.shape_cast %278 : vector<128x128xf32> to vector<2x64x128xf32>
    %c0_310 = arith.constant 0 : index
    %c0_311 = arith.constant 0 : index
    %c0_312 = arith.constant 0 : index
    %280 = vector.load %arg4[%c0_310, %c0_311, %c0_312] : memref<2x64x128xf32, #tpu.memory_space<vmem>>, vector<2x64x128xf32>
    tpu.vector_store %arg4[%c0_310, %c0_311, %c0_312], %279 {strides = array<i32>} : memref<2x64x128xf32, #tpu.memory_space<vmem>>, vector<2x64x128xf32>,
    return
  }
  func.func @transform_0(%arg0: i32) -> (i32, i32, i32, i32) {
    %c0_i32 = arith.constant 0 : i32
    %c0_i32_0 = arith.constant 0 : i32
    %c0_i32_1 = arith.constant 0 : i32
    %c0_i32_2 = arith.constant 0 : i32
    return %arg0, %c0_i32, %c0_i32_0, %c0_i32_1 : i32, i32, i32, i32
  }
  func.func @transform_1(%arg0: i32) -> (i32, i32) {
    %c0_i32 = arith.constant 0 : i32
    %c0_i32_0 = arith.constant 0 : i32
    %c0_i32_1 = arith.constant 0 : i32
    return %c0_i32, %c0_i32_0 : i32, i32
  }
  func.func @transform_2(%arg0: i32) -> (i32, i32) {
    %c0_i32 = arith.constant 0 : i32
    %c0_i32_0 = arith.constant 0 : i32
    %c0_i32_1 = arith.constant 0 : i32
    return %c0_i32, %c0_i32_0 : i32, i32
  }
  func.func @transform_3(%arg0: i32) -> (i32, i32, i32) {
    %c0_i32 = arith.constant 0 : i32
    %c0_i32_0 = arith.constant 0 : i32
    %c0_i32_1 = arith.constant 0 : i32
    return %arg0, %c0_i32, %c0_i32_0 : i32, i32, i32
  }
}

</mosaic_0001>

<bundles_post_ra>
// kernel: tpu_custom_call.1
= control target key start
LH: loop header
LB: loop body
LE: loop exit
PB: predicated region body
PF: predicated region fallthrough
CT: control target
= control target key end

     0   :  { %s6280_s28 = smov 32   ;;  %s6281_s18 = smov 64   ;;  %s9486_s0 = inlined_call_operand.vmem [shape: f32[2,18,18,32], index: 0, kind: input, shape index: {}]   ;;  %s9487_s1 = inlined_call_operand.vmem [shape: bf16[1152,128], index: 1, kind: input, shape index: {}]   ;;  %s9488_s2 = inlined_call_operand.vmem [shape: f32[1,128], index: 2, kind: input, shape index: {}]   ;;  %s9489_s3 = inlined_call_operand.hbm [shape: f32[2,64,128], index: 3, kind: output, shape index: {}]  }
   0x1   :  { %v6309_v0 = vld [vmem:[%s9486_s0 + $0x31] sm:$0xff]  ;;  %v6314_v1 = vld [vmem:[%s9486_s0 + $0x39] sm:$0xff]  ;;  %v24_v2 = vld [vmem:[%s9486_s0 + $0x1] sm:$0xff]  ;;  %s6282_s9 = smov 96  }
   0x2   :  { %v6321_v3 = vpack.i.bf16 %v6314_v1, %v6309_v0  ;;  %v25_v4 = vld [vmem:[%s9486_s0 + $0x9] sm:$0xff]  ;;  %v6334_v6 = vld [vmem:[%s9486_s0 + $0x51] sm:$0xff]  ;;  %v6339_v8 = vld [vmem:[%s9486_s0 + $0x19] sm:$0xff] }
   0x3   :  { %v6329_v5 = vld [vmem:[%s9486_s0 + $0x49] sm:$0xff]  ;;  %v5077_v7 = vpack.i.bf16 %v25_v4, %v24_v2  ;;  %v6344_v9 = vld [vmem:[%s9486_s0 + $0x21] sm:$0xff]  ;;  %v39_v19 = vld [vmem:[%s9486_s0 + $0x52] sm:$0xff] }
   0x4   :  { %5088 = vrot.lane.b32.xlu1 %v6321_v3, %s6280_s28  ;;  %v6350_v10 = vpack.i.bf16 %v6334_v6, %v6329_v5  ;;  %v5082_v11 = vpack.i.bf16 %v6344_v9, %v6339_v8  ;;  %v34_v12 = vld [vmem:[%s9486_s0 + $0x1a] sm:$0xff]  ;;  %v35_v13 = vld [vmem:[%s9486_s0 + $0x22] sm:$0xff]  ;;  %v33_v15 = vld [vmem:[%s9486_s0 + $0xa] sm:$0xff] }
   0x5   :  { %5078 = vrot.lane.b32.xlu0 %v5077_v7, %s6280_s28  ;;  %v32_v14 = vld [vmem:[%s9486_s0 + $0x2] sm:$0xff]  ;;  %v5102_v16 = vpack.i.bf16 %v35_v13, %v34_v12  ;;  %v38_v18 = vld [vmem:[%s9486_s0 + $0x4a] sm:$0xff]  ;;  %v36_v20 = vld [vmem:[%s9486_s0 + $0x32] sm:$0xff] }
   0x6   :  { %v5097_v17 = vpack.i.bf16 %v33_v15, %v32_v14  ;;  %v37_v21 = vld [vmem:[%s9486_s0 + $0x3a] sm:$0xff]  ;;  %v5112_v22 = vpack.i.bf16 %v39_v19, %v38_v18  ;;  %v4128_v24 = vld [vmem:[%s9486_s0 + $0x30] sm:$0xff]  ;;  %v4133_v31 = vld [vmem:[%s9486_s0 + $0x68] sm:$0xff] }
   0x7   :  { %v5107_v23 = vpack.i.bf16 %v37_v21, %v36_v20  ;;  %v4129_v25 = vld [vmem:[%s9486_s0 + $0x38] sm:$0xff]  ;;  %v6398_v27 = vld [vmem:[%s9486_s0 + $0x20] sm:$0xff]  ;;  %v4130_v32 = vld [vmem:[%s9486_s0 + $0x48] sm:$0xff] }
   0x8   :  { %5093 = vrot.lane.b32.xlu1 %v6350_v10, %s6280_s28  ;;  %v6393_v26 = vld [vmem:[%s9486_s0 + $0x18] sm:$0xff]  ;;  %v5122_v28 = vpack.i.bf16 %v4129_v25, %v4128_v24  ;;  %v4132_v30 = vld [vmem:[%s9486_s0 + $0x60] sm:$0xff]  ;;  %v4131_v33 = vld [vmem:[%s9486_s0 + $0x50] sm:$0xff] }
   0x9   :  { %5083 = vrot.lane.b32.xlu0 %v5082_v11, %s6280_s28  ;;  %v5117_v29 = vpack.i.bf16 %v6398_v27, %v6393_v26  ;;  %v6417_v34 = vpack.i.bf16 %v4133_v31, %v4132_v30  ;;  %v5127_v35 = vpack.i.bf16 %v4131_v33, %v4130_v32  ;;  %v4148_v36 = vld [vmem:[%s9486_s0 + $0x62] sm:$0xff]  ;;  %v4149_v37 = vld [vmem:[%s9486_s0 + $0x6a] sm:$0xff]  ;;  %v4156_v44 = vld [vmem:[%s9486_s0 + $0x78] sm:$0xff] }
   0xa   :  { %v6157_v38 = vld [vmem:[%s9487_s1 + $0x40] sm:$0xff]   ;;  %v6159_v40 = vld [vmem:[%s9487_s1 + $0x48] sm:$0xff]   ;;  %v6439_v41 = vpack.i.bf16 %v4149_v37, %v4148_v36  ;;  %v6161_v43 = vld [vmem:[%s9487_s1 + $0x50] sm:$0xff]  }
   0xb   :  { %v6158_v39 = vld [vmem:[%s9487_s1] sm:$0xff]   ;;  %4751 = vmatprep.subr.bf16.mxu0 %v6157_v38  ;;  %v6160_v42 = vld [vmem:[%s9487_s1 + $0x8] sm:$0xff]   ;;  %v6162_v46 = vld [vmem:[%s9487_s1 + $0x10] sm:$0xff]  }
   0xc   :  { %5103 = vrot.lane.b32.xlu1 %v5102_v16, %s6281_s18  ;;  %4752 = vmatpush3.bf16.msra.mxu0 %v6158_v39  ;;  %v4157_v45 = vld [vmem:[%s9486_s0 + $0x80] sm:$0xff]  ;;  %v6163_v47 = vld [vmem:[%s9487_s1 + $0x58] sm:$0xff]   ;;  %v6167_v55 = vld [vmem:[%s9487_s1 + $0x68] sm:$0xff]  }
   0xd   :  { %5098 = vrot.lane.b32.xlu0 %v5097_v17, %s6281_s18  ;;  %4753 = vmatprep.subr.bf16.mxu0 %v6159_v40  ;;  %v5172_v48 = vpack.i.bf16 %v4157_v45, %v4156_v44  ;;  %v6164_v49 = vld [vmem:[%s9487_s1 + $0x18] sm:$0xff]   ;;  %v6165_v50 = vld [vmem:[%s9487_s1 + $0x60] sm:$0xff]   ;;  %v6494_v56 = vld [vmem:[%s9486_s0 + $0x69] sm:$0xff] }
   0xe   :  { %v4164_v51 = vld [vmem:[%s9486_s0 + $0x79] sm:$0xff]  ;;  %v4165_v52 = vld [vmem:[%s9486_s0 + $0x81] sm:$0xff]  ;;  %v6169_v60 = vld [vmem:[%s9487_s1 + $0x70] sm:$0xff]  }
   0xf   :  { %v6166_v53 = vld [vmem:[%s9487_s1 + $0x20] sm:$0xff]   ;;  %v6498_v57 = vpack.i.bf16 %v4165_v52, %v4164_v51  ;;  %v6168_v58 = vld [vmem:[%s9487_s1 + $0x28] sm:$0xff]   ;;  %v4181_v62 = vld [vmem:[%s9486_s0 + $0xb0] sm:$0xff] }
  0x10   :  { %5113 = vrot.lane.b32.xlu1 %v5112_v22, %s6281_s18  ;;  %4754 = vmatpush3.bf16.msra.mxu0 %v6160_v42  ;;  %v6486_v54 = vld [vmem:[%s9486_s0 + $0x61] sm:$0xff]  ;;  %v6170_v63 = vld [vmem:[%s9487_s1 + $0x30] sm:$0xff]   ;;  %v6171_v2 = vld [vmem:[%s9487_s1 + $0x78] sm:$0xff]  }
  0x11   :  { %5108 = vrot.lane.b32.xlu0 %v5107_v23, %s6281_s18  ;;  %4755 = vmatprep.subr.bf16.mxu0 %v6161_v43  ;;  %v5187_v59 = vpack.i.bf16 %v6494_v56, %v6486_v54  ;;  %v4180_v61 = vld [vmem:[%s9486_s0 + $0xa8] sm:$0xff]  ;;  %v4179_v4 = vld [vmem:[%s9486_s0 + $0x98] sm:$0xff]  ;;  %v6173_v11 = vld [vmem:[%s9487_s1 + $0xc0] sm:$0xff]  }
  0x12   :  { %v6172_v7 = vld [vmem:[%s9487_s1 + $0x38] sm:$0xff]   ;;  %v6174_v13 = vld [vmem:[%s9487_s1 + $0x80] sm:$0xff]   ;;  %4815 = vmatprep.subr.bf16.mxu1 %v6173_v11  ;;  %v4188_v14 = vld [vmem:[%s9486_s0 + $0xa9] sm:$0xff] }
  0x13   :  { %v4189_v15 = vld [vmem:[%s9486_s0 + $0xb1] sm:$0xff]  ;;  %4816 = vmatpush3.bf16.msra.mxu1 %v6174_v13  ;;  %v6176_v17 = vld [vmem:[%s9487_s1 + $0x88] sm:$0xff]   ;;  %v4187_v19 = vld [vmem:[%s9486_s0 + $0x99] sm:$0xff] }
  0x14   :  { %5123 = vrot.lane.b32.xlu1 %v5122_v28, %s6282_s9  ;;  %4756 = vmatpush3.bf16.msra.mxu0 %v6162_v46  ;;  %v4186_v18 = vld [vmem:[%s9486_s0 + $0x91] sm:$0xff]  ;;  %v4192_v20 = vld [vmem:[%s9486_s0 + $0x7a] sm:$0xff]  ;;  %v4193_v21 = vld [vmem:[%s9486_s0 + $0x82] sm:$0xff] }
  0x15   :  { %5118 = vrot.lane.b32.xlu0 %v5117_v29, %s6282_s9  ;;  %4757 = vmatprep.subr.bf16.mxu0 %v6163_v47  ;;  %v5227_v24 = vpack.i.bf16 %v4187_v19, %v4186_v18  ;;  %v6178_v25 = vld [vmem:[%s9487_s1 + $0x90] sm:$0xff]   ;;  %v5242_v30 = vpack.i.bf16 %v4193_v21, %v4192_v20  ;;  %v6179_v31 = vld [vmem:[%s9487_s1 + $0xd8] sm:$0xff]   ;;  %v6181_v36 = vld [vmem:[%s9487_s1 + $0xe0] sm:$0xff]  }
  0x16   :  { %v4197_v29 = vld [vmem:[%s9486_s0 + $0xb2] sm:$0xff]  ;;  %v4195_v33 = vld [vmem:[%s9486_s0 + $0x9a] sm:$0xff]  ;;  %v4213_v40 = vld [vmem:[%s9486_s0 + $0xc9] sm:$0xff] }
  0x17   :  { %v4194_v32 = vld [vmem:[%s9486_s0 + $0x92] sm:$0xff]  ;;  %v6182_v38 = vld [vmem:[%s9487_s1 + $0xa0] sm:$0xff]   ;;  %v6184_v42 = vld [vmem:[%s9487_s1 + $0xa8] sm:$0xff]  }
  0x18   :  { %5133 = vrot.lane.b32.xlu1 %v6417_v34, %s6282_s9  ;;  %4758 = vmatpush3.bf16.msra.mxu0 %v6164_v49  ;;  %v5247_v37 = vpack.i.bf16 %v4195_v33, %v4194_v32  ;;  %v4212_v39 = vld [vmem:[%s9486_s0 + $0xc1] sm:$0xff]  ;;  %v6185_v44 = vld [vmem:[%s9487_s1 + $0xf0] sm:$0xff]   ;;  %v6188_v49 = vld [vmem:[%s9487_s1 + $0xb8] sm:$0xff]  }
  0x19   :  { %5128 = vrot.lane.b32.xlu0 %v5127_v35, %s6282_s9  ;;  %4759 = vmatprep.subr.bf16.mxu0 %v6165_v50  ;;  %v5272_v43 = vpack.i.bf16 %v4213_v40, %v4212_v39  ;;  %v6186_v45 = vld [vmem:[%s9487_s1 + $0xb0] sm:$0xff]   ;;  %v4220_v46 = vld [vmem:[%s9486_s0 + $0xc2] sm:$0xff]  ;;  %v4228_v51 = vld [vmem:[%s9486_s0 + $0xd8] sm:$0xff] }
  0x1a   :  { %v4221_v47 = vld [vmem:[%s9486_s0 + $0xca] sm:$0xff]  ;;  %v4229_v52 = vld [vmem:[%s9486_s0 + $0xe0] sm:$0xff] }
  0x1b   :  { %v5292_v50 = vpack.i.bf16 %v4221_v47, %v4220_v46 }
  0x1c   :  { %5143 = vrot.lane.b32.xlu1 %v5107_v23, %s6280_s28  ;;  %4760 = vmatpush3.bf16.msra.mxu0 %v6166_v53  ;;  %v6177_v23 = vld [vmem:[%s9487_s1 + $0xd0] sm:$0xff]   ;;  %v6663_v53 = vld [vmem:[%s9486_s0 + $0xc0] sm:$0xff] }
  0x1d   :  { %5138 = vrot.lane.b32.xlu0 %v5102_v16, %s6280_s28  ;;  %4761 = vmatprep.subr.bf16.mxu0 %v6167_v55  ;;  %v6175_v16 = vld [vmem:[%s9487_s1 + $0xc8] sm:$0xff]  }
  0x1e   :  { %4817 = vmatprep.subr.bf16.mxu1 %v6175_v16  ;;  %v6668_v55 = vld [vmem:[%s9486_s0 + $0xc8] sm:$0xff] }
  0x1f   :  { %4818 = vmatpush3.bf16.msra.mxu1 %v6176_v17 }
  0x20   :  { %5153 = vrot.lane.b32.xlu1 %v6439_v41, %s6280_s28  ;;  %4762 = vmatpush3.bf16.msra.mxu0 %v6168_v58  ;;  %v5307_v58 = vpack.i.bf16 %v6668_v55, %v6663_v53 }
  0x21   :  { %5148 = vrot.lane.b32.xlu0 %v5112_v22, %s6280_s28  ;;  %4763 = vmatprep.subr.bf16.mxu0 %v6169_v60  ;;  %v5232_v22 = vpack.i.bf16 %v4189_v15, %v4188_v14  ;;  %v4245_v60 = vld [vmem:[%s9486_s0 + $0xe2] sm:$0xff] }
  0x22   :  { %4819 = vmatprep.subr.bf16.mxu1 %v6177_v23 }
  0x23   :  { %4820 = vmatpush3.bf16.msra.mxu1 %v6178_v25 }
  0x24   :  { %5163 = vrot.lane.b32.xlu1 %v5127_v35, %s6281_s18  ;;  %4764 = vmatpush3.bf16.msra.mxu0 %v6170_v63  ;;  %v4253_v63 = vld [vmem:[%s9486_s0 + $0x110] sm:$0xff] }
  0x25   :  { %5158 = vrot.lane.b32.xlu0 %v5122_v28, %s6281_s18  ;;  %4765 = vmatprep.subr.bf16.mxu0 %v6171_v2  ;;  %v4196_v28 = vld [vmem:[%s9486_s0 + $0xaa] sm:$0xff] }
  0x26   :  { %4821 = vmatprep.subr.bf16.mxu1 %v6179_v31  ;;  %v5252_v35 = vpack.i.bf16 %v4197_v29, %v4196_v28 }
  0x28   :  { %5173 = vrot.lane.b32.xlu1 %v5172_v48, %s6281_s18  ;;  %4766 = vmatpush3.bf16.msra.mxu0 %v6172_v7 }
  0x29   :  { %5168 = vrot.lane.b32.xlu0 %v6417_v34, %s6281_s18 }
  0x2c   :  { %5183 = vrot.lane.b32.xlu1 %v6350_v10, %s6282_s9  ;;  %v6535_v10 = vpack.i.bf16 %v4181_v62, %v4180_v61  ;;  %v4252_v62 = vld [vmem:[%s9486_s0 + $0x108] sm:$0xff] }
  0x2d   :  { %5178 = vrot.lane.b32.xlu0 %v6321_v3, %s6282_s9  ;;  %v4178_v3 = vld [vmem:[%s9486_s0 + $0x90] sm:$0xff] }
  0x2e   :  { %v6542_v12 = vpack.i.bf16 %v4179_v4, %v4178_v3 }
  0x30   :  { %5193 = vrot.lane.b32.xlu1 %v6498_v57, %s6282_s9 }
  0x31   :  { %5188 = vrot.lane.b32.xlu0 %v5187_v59, %s6282_s9 }
  0x34   :  { %5203 = vrot.lane.b32.xlu1 %v5172_v48, %s6280_s28  ;;  %v6187_v48 = vld [vmem:[%s9487_s1 + $0xf8] sm:$0xff]  }
  0x35   :  { %5198 = vrot.lane.b32.xlu0 %v6417_v34, %s6280_s28  ;;  %v6180_v34 = vld [vmem:[%s9487_s1 + $0x98] sm:$0xff]  }
  0x36   :  { %4822 = vmatpush3.bf16.msra.mxu1 %v6180_v34 }
  0x37   :  { %4823 = vmatprep.subr.bf16.mxu1 %v6181_v36 }
  0x38   :  { %5213 = vrot.lane.b32.xlu1 %v6535_v10, %s6280_s28 }
  0x39   :  { %5208 = vrot.lane.b32.xlu0 %v6542_v12, %s6280_s28 }
  0x3a   :  { %4824 = vmatpush3.bf16.msra.mxu1 %v6182_v38 }
  0x3c   :  { %5223 = vrot.lane.b32.xlu1 %v6498_v57, %s6281_s18 }
  0x3d   :  { %5218 = vrot.lane.b32.xlu0 %v5187_v59, %s6281_s18  ;;  %v4244_v59 = vld [vmem:[%s9486_s0 + $0xda] sm:$0xff] }
  0x3e   :  { %v6685_v61 = vpack.i.bf16 %v4245_v60, %v4244_v59 }
  0x40   :  { %5233 = vrot.lane.b32.xlu1 %v5232_v22, %s6281_s18 }
  0x41   :  { %5228 = vrot.lane.b32.xlu0 %v5227_v24, %s6281_s18 }
  0x44   :  { %5243 = vrot.lane.b32.xlu1 %v5242_v30, %s6282_s9 }
  0x45   :  { %5238 = vrot.lane.b32.xlu0 %v6439_v41, %s6282_s9  ;;  %v6183_v41 = vld [vmem:[%s9487_s1 + $0xe8] sm:$0xff]  }
  0x46   :  { %4825 = vmatprep.subr.bf16.mxu1 %v6183_v41 }
  0x47   :  { %4826 = vmatpush3.bf16.msra.mxu1 %v6184_v42 }
  0x48   :  { %5253 = vrot.lane.b32.xlu1 %v5252_v35, %s6282_s9  ;;  %4827 = vmatprep.subr.bf16.mxu1 %v6185_v44 }
  0x49   :  { %5248 = vrot.lane.b32.xlu0 %v5247_v37, %s6282_s9 }
  0x4b   :  { %4828 = vmatpush3.bf16.msra.mxu1 %v6186_v45 }
  0x4c   :  { %5263 = vrot.lane.b32.xlu1 %v5227_v24, %s6280_s28  ;;  %4829 = vmatprep.subr.bf16.mxu1 %v6187_v48 }
  0x4d   :  { %5258 = vrot.lane.b32.xlu0 %v6498_v57, %s6280_s28  ;;  %v5312_v57 = vpack.i.bf16 %v4229_v52, %v4228_v51 }
  0x4f   :  { %4830 = vmatpush3.bf16.msra.mxu1 %v6188_v49 }
  0x50   :  { %5273 = vrot.lane.b32.xlu1 %v5272_v43, %s6280_s28 }
  0x51   :  { %5268 = vrot.lane.b32.xlu0 %v5232_v22, %s6280_s28 }
  0x54   :  { %5283 = vrot.lane.b32.xlu1 %v5247_v37, %s6281_s18 }
  0x55   :  { %5278 = vrot.lane.b32.xlu0 %v5242_v30, %s6281_s18 }
  0x58   :  { %5293 = vrot.lane.b32.xlu1 %v5292_v50, %s6281_s18 }
  0x59   :  { %5288 = vrot.lane.b32.xlu0 %v5252_v35, %s6281_s18 }
  0x5c   :  { %5303 = vrot.lane.b32.xlu1 %v6535_v10, %s6282_s9 }
  0x5d   :  { %5298 = vrot.lane.b32.xlu0 %v6542_v12, %s6282_s9 }
  0x60   :  { %5313 = vrot.lane.b32.xlu1 %v5312_v57, %s6282_s9 }
  0x61   :  { %5308 = vrot.lane.b32.xlu0 %v5307_v58, %s6282_s9 }
  0x64   :  { %5323 = vrot.lane.b32.xlu1 %v5252_v35, %s6280_s28 }
  0x65   :  { %5318 = vrot.lane.b32.xlu0 %v5247_v37, %s6280_s28 }
  0x68   :  { %5333 = vrot.lane.b32.xlu1 %v6685_v61, %s6280_s28 }
  0x69   :  { %5328 = vrot.lane.b32.xlu0 %v5292_v50, %s6280_s28 }
  0x6a   :  { %8 = vsyncpa [#allocation4], 0  ;;  %v4250_v2 = vld [vmem:[%s9486_s0 + $0xf0] sm:$0xff]  ;;  %v4251_v3 = vld [vmem:[%s9486_s0 + $0xf8] sm:$0xff]  ;;  %v5352_v4 = vpack.i.bf16 %v4253_v63, %v4252_v62  ;;  %vm145_vm0 = vcmask 261120   ;;  %vm154_vm1 = vcmask 523264  }
  0x6b   :  { %v5347_v7 = vpack.i.bf16 %v4251_v3, %v4250_v2  ;;  %v4256_v10 = vld [vmem:[%s9486_s0 + $0xd9] sm:$0xff]  ;;  %v4257_v11 = vld [vmem:[%s9486_s0 + $0xe1] sm:$0xff]  ;;  %v4260_v13 = vld [vmem:[%s9486_s0 + $0x109] sm:$0xff]  ;;  %vm163_vm2 = vcmask 785408  }
  0x6c   :  { %5343 = vrot.lane.b32.xlu1 %v5312_v57, %s6281_s18  ;;  %v5362_v12 = vpack.i.bf16 %v4257_v11, %v4256_v10  ;;  %v4261_v14 = vld [vmem:[%s9486_s0 + $0x111] sm:$0xff]  ;;  %v4259_v16 = vld [vmem:[%s9486_s0 + $0xf9] sm:$0xff]  ;;  %v4277_v22 = vld [vmem:[%s9486_s0 + $0x128] sm:$0xff] }
  0x6d   :  { %5338 = vrot.lane.b32.xlu0 %v5307_v58, %s6281_s18  ;;  %v4258_v15 = vld [vmem:[%s9486_s0 + $0xf1] sm:$0xff]  ;;  %v5372_v17 = vpack.i.bf16 %v4261_v14, %v4260_v13  ;;  %v4276_v21 = vld [vmem:[%s9486_s0 + $0x120] sm:$0xff]  ;;  %v4285_v31 = vld [vmem:[%s9486_s0 + $0x129] sm:$0xff] }
  0x6e   :  { %v5367_v18 = vpack.i.bf16 %v4259_v16, %v4258_v15  ;;  %v6744_v25 = vpack.i.bf16 %v4277_v22, %v4276_v21  ;;  %v4284_v30 = vld [vmem:[%s9486_s0 + $0x121] sm:$0xff]  ;;  %v4288_v35 = vld [vmem:[%s9486_s0 + $0xf2] sm:$0xff]  ;;  %v4293_v41 = vld [vmem:[%s9486_s0 + $0x12a] sm:$0xff] }
  0x6f   :  { %v5412_v34 = vpack.i.bf16 %v4285_v31, %v4284_v30  ;;  %v4289_v36 = vld [vmem:[%s9486_s0 + $0xfa] sm:$0xff]  ;;  %v4292_v40 = vld [vmem:[%s9486_s0 + $0x122] sm:$0xff]  ;;  %v4291_v44 = vld [vmem:[%s9486_s0 + $0x112] sm:$0xff] }
  0x70   :  { %5353 = vrot.lane.b32.xlu1 %v5352_v4, %s6281_s18  ;;  %v6777_v39 = vpack.i.bf16 %v4289_v36, %v4288_v35  ;;  %v6798_v46 = vpack.i.bf16 %v4293_v41, %v4292_v40  ;;  %v4308_v50 = vld [vmem:[%s9486_s0 + $0x139] sm:$0xff]  ;;  %v4309_v51 = vld [vmem:[%s9486_s0 + $0x141] sm:$0xff]  ;;  %v4325_v10 = vld [vmem:[%s9486_s0 + $0x170] sm:$0xff] }
  0x71   :  { %5348 = vrot.lane.b32.xlu0 %v5347_v7, %s6281_s18  ;;  %v6818_v58 = vpack.i.bf16 %v4309_v51, %v4308_v50  ;;  %v4316_v60 = vld [vmem:[%s9486_s0 + $0x13a] sm:$0xff]  ;;  %v4322_v35 = vld [vmem:[%s9486_s0 + $0x150] sm:$0xff] }
  0x72   :  { %v4320_v62 = vld [vmem:[%s9486_s0 + $0x138] sm:$0xff]  ;;  %v16_v11 = vld [vmem:[%s9486_s0] sm:$0xff] }
  0x73   :  { %v4323_v36 = vld [vmem:[%s9486_s0 + $0x158] sm:$0xff] }
  0x74   :  { %5363 = vrot.lane.b32.xlu1 %v5362_v12, %s6282_s9 }
  0x75   :  { %5358 = vrot.lane.b32.xlu0 %v5272_v43, %s6282_s9  ;;  %v4290_v43 = vld [vmem:[%s9486_s0 + $0x10a] sm:$0xff] }
  0x76   :  { %v6727_v19 = vpop.permute.xlu1 %5088  ;;  %v5427_v47 = vpack.i.bf16 %v4291_v44, %v4290_v43 }
  0x77   :  { %v6729_v20 = vpop.permute.xlu0 %5078 }
  0x78   :  { %5373 = vrot.lane.b32.xlu1 %v5372_v17, %s6282_s9  ;;  %v5081_v63 = vunpack.i.h.bf16 %v6729_v20  ;;  %v5080_v2 = vunpack.i.l.bf16 %v6729_v20 }
  0x79   :  { %5368 = vrot.lane.b32.xlu0 %v5367_v18, %s6282_s9 }
  0x7a   :  { %v6739_v23 = vpop.permute.xlu1 %5093  ;;  %v146_v22 = vsel %vm145_vm0, %v16_v11, %v5080_v2 }
  0x7b   :  { %v6741_v24 = vpop.permute.xlu0 %5083 }
  0x7c   :  { %5383 = vrot.lane.b32.xlu1 %v5347_v7, %s6280_s28  ;;  %v4324_v7 = vld [vmem:[%s9486_s0 + $0x168] sm:$0xff] }
  0x7d   :  { %5378 = vrot.lane.b32.xlu0 %v5312_v57, %s6280_s28  ;;  %v6862_v21 = vpack.i.bf16 %v4325_v10, %v4324_v7 }
  0x7e   :  { %v6747_v28 = vpop.permute.xlu1 %5103 }
  0x7f   :  { %v6749_v29 = vpop.permute.xlu0 %5098 }
  0x80   :  { %5393 = vrot.lane.b32.xlu1 %v6744_v25, %s6280_s28  ;;  %v5101_v13 = vunpack.i.h.bf16 %v6749_v29  ;;  %v5100_v14 = vunpack.i.l.bf16 %v6749_v29 }
  0x81   :  { %5388 = vrot.lane.b32.xlu0 %v5352_v4, %s6280_s28  ;;  %v4321_v4 = vld [vmem:[%s9486_s0 + $0x140] sm:$0xff] }
  0x82   :  { %v6760_v32 = vpop.permute.xlu1 %5113  ;;  %v6860_v20 = vpack.i.bf16 %v4321_v4, %v4320_v62  ;;  %v155_v41 = vsel %vm154_vm1, %v146_v22, %v5100_v14  ;;  %v6886_v62 = vpack.i.bf16 %v4323_v36, %v4322_v35  ;;  %v5085_v22 = vunpack.i.l.bf16 %v6741_v24 }
  0x83   :  { %v6762_v33 = vpop.permute.xlu0 %5108 }
  0x84   :  { %5403 = vrot.lane.b32.xlu1 %v5367_v18, %s6281_s18 }
  0x85   :  { %5398 = vrot.lane.b32.xlu0 %v5362_v12, %s6281_s18  ;;  %v17_v12 = vld [vmem:[%s9486_s0 + $0x8] sm:$0xff] }
  0x86   :  { %v6772_v37 = vpop.permute.xlu1 %5123  ;;  %v147_v29 = vsel %vm145_vm0, %v17_v12, %v5081_v63 }
  0x87   :  { %v6774_v38 = vpop.permute.xlu0 %5118  ;;  %v156_v43 = vsel %vm154_vm1, %v147_v29, %v5101_v13  ;;  %v5106_v29 = vunpack.i.h.bf16 %v6747_v28  ;;  %v5126_v36 = vunpack.i.h.bf16 %v6772_v37 }
  0x88   :  { %5413 = vrot.lane.b32.xlu1 %v5412_v34, %s6281_s18  ;;  %v5121_v16 = vunpack.i.h.bf16 %v6774_v38 }
  0x89   :  { %5408 = vrot.lane.b32.xlu0 %v5372_v17, %s6281_s18 }
  0x8a   :  { %v6786_v42 = vpop.permute.xlu1 %5133 }
  0x8b   :  { %v6794_v45 = vpop.permute.xlu0 %5128 }
  0x8c   :  { %5423 = vrot.lane.b32.xlu1 %v6777_v39, %s6282_s9 }
  0x8d   :  { %5418 = vrot.lane.b32.xlu0 %v6685_v61, %s6282_s9  ;;  %v4317_v61 = vld [vmem:[%s9486_s0 + $0x142] sm:$0xff] }
  0x8e   :  { %v5144_v48 = vpop.permute.xlu1 %5143  ;;  %v6854_v15 = vpack.i.bf16 %v4317_v61, %v4316_v60  ;;  %v5086_v60 = vunpack.i.h.bf16 %v6741_v24 }
  0x8f   :  { %v6802_v49 = vpop.permute.xlu0 %5138  ;;  %v5146_v30 = vunpack.i.h.bf16 %v5144_v48  ;;  %v5145_v31 = vunpack.i.l.bf16 %v5144_v48 }
  0x90   :  { %5433 = vrot.lane.b32.xlu1 %v6798_v46, %s6282_s9  ;;  %v5140_v40 = vunpack.i.l.bf16 %v6802_v49 }
  0x91   :  { %5428 = vrot.lane.b32.xlu0 %v5427_v47, %s6282_s9  ;;  %v312_v63 = vsel %vm145_vm0, %v6314_v1, %v5146_v30  ;;  %v5105_v30 = vunpack.i.l.bf16 %v6747_v28 }
  0x92   :  { %v6813_v52 = vpop.permute.xlu1 %5153  ;;  %v309_v10 = vsel %vm145_vm0, %v6339_v8, %v5140_v40 }
  0x93   :  { %v6815_v57 = vpop.permute.xlu0 %5148 }
  0x94   :  { %5443 = vrot.lane.b32.xlu1 %v5372_v17, %s6280_s28  ;;  %v5120_v17 = vunpack.i.l.bf16 %v6774_v38  ;;  %v5141_v38 = vunpack.i.h.bf16 %v6802_v49  ;;  %v5150_v40 = vunpack.i.l.bf16 %v6815_v57 }
  0x95   :  { %5438 = vrot.lane.b32.xlu0 %v5367_v18, %s6280_s28 }
  0x96   :  { %v6821_v59 = vpop.permute.xlu1 %5163  ;;  %v164_v49 = vsel %vm163_vm2, %v155_v41, %v5120_v17  ;;  %v310_v11 = vsel %vm145_vm0, %v6344_v9, %v5141_v38  ;;  %v5151_v38 = vunpack.i.h.bf16 %v6815_v57  ;;  %v4340_v57 = vld [vmem:[%s9486_s0 + $0x16a] sm:$0xff] }
  0x97   :  { %v5159_v3 = vpop.permute.xlu0 %5158  ;;  %v5166_v44 = vunpack.i.h.bf16 %v6821_v59  ;;  %v5165_v48 = vunpack.i.l.bf16 %v6821_v59  ;;  %v311_v59 = vsel %vm145_vm0, %v6309_v0, %v5145_v31 }
  0x98   :  { %5453 = vrot.lane.b32.xlu1 %v6818_v58, %s6280_s28  ;;  %v5161_v50 = vunpack.i.h.bf16 %v5159_v3  ;;  %v5160_v51 = vunpack.i.l.bf16 %v5159_v3 }
  0x99   :  { %5448 = vrot.lane.b32.xlu0 %v5412_v34, %s6280_s28  ;;  %v319_v12 = vsel %vm154_vm1, %v311_v59, %v5165_v48  ;;  %v320_v13 = vsel %vm154_vm1, %v312_v63, %v5166_v44 }
  0x9a   :  { %v6858_v18 = vpop.permute.xlu1 %5173  ;;  %v317_v1 = vsel %vm154_vm1, %v309_v10, %v5160_v51  ;;  %v318_v0 = vsel %vm154_vm1, %v310_v11, %v5161_v50  ;;  %v5091_v11 = vunpack.i.h.bf16 %v6727_v19 }
  0x9b   :  { %v6866_v34 = vpop.permute.xlu0 %5168 }
  0x9c   :  { %5463 = vrot.lane.b32.xlu1 %v5427_v47, %s6281_s18  ;;  %v165_v47 = vsel %vm163_vm2, %v156_v43, %v5121_v16  ;;  %v5125_v43 = vunpack.i.l.bf16 %v6772_v37  ;;  %v5171_v24 = vunpack.i.h.bf16 %v6866_v34  ;;  %v5170_v44 = vunpack.i.l.bf16 %v6866_v34 }
  0x9d   :  { %5458 = vrot.lane.b32.xlu0 %v6777_v39, %s6281_s18  ;;  %v172_v41 = vpack.c.bf16 %v165_v47, %v164_v49  ;;  %v148_v37 = vsel %vm145_vm0, %v6393_v26, %v5085_v22  ;;  %v149_v34 = vsel %vm145_vm0, %v6398_v27, %v5086_v60  ;;  %v4338_v49 = vld [vmem:[%s9486_s0 + $0x152] sm:$0xff]  ;;  %v4339_v47 = vld [vmem:[%s9486_s0 + $0x15a] sm:$0xff]  ;;  %v314_v26 = vsel %vm145_vm0, %v6334_v6, %v5151_v38 }
  0x9e   :  { %v5184_v61 = vpop.permute.xlu1 %5183  ;;  %v313_v27 = vsel %vm145_vm0, %v6329_v5, %v5150_v40  ;;  %v157_v60 = vsel %vm154_vm1, %v148_v37, %v5105_v30  ;;  %v158_v63 = vsel %vm154_vm1, %v149_v34, %v5106_v29  ;;  %v322_v6 = vsel %vm154_vm1, %v314_v26, %v5171_v24 }
  0x9f   :  { %v5186_v2 = vunpack.i.h.bf16 %v5184_v61  ;;  %v5185_v3 = vunpack.i.l.bf16 %v5184_v61  ;;  %v5179_v4 = vpop.permute.xlu0 %5178  ;;  %v166_v59 = vsel %vm163_vm2, %v157_v60, %v5125_v43  ;;  %v6963_v10 = vpack.i.bf16 %v4339_v47, %v4338_v49 }
  0xa0   :  { %v5181_v7 = vunpack.i.h.bf16 %v5179_v4  ;;  %v5180_v39 = vunpack.i.l.bf16 %v5179_v4  ;;  %5473 = vrot.lane.b32.xlu1 %v6854_v15, %s6281_s18  ;;  %v5130_v22 = vunpack.i.l.bf16 %v6794_v45  ;;  %v5175_v29 = vunpack.i.l.bf16 %v6858_v18 }
  0xa1   :  { %5468 = vrot.lane.b32.xlu0 %v6798_v46, %s6281_s18  ;;  %v327_v17 = vsel %vm163_vm2, %v319_v12, %v5185_v3  ;;  %v328_v9 = vsel %vm163_vm2, %v320_v13, %v5186_v2  ;;  %v167_v2 = vsel %vm163_vm2, %v158_v63, %v5126_v36  ;;  %v321_v3 = vsel %vm154_vm1, %v313_v27, %v5170_v44  ;;  %v4349_v44 = vld [vmem:[%s9486_s0 + $0x188] sm:$0xff] }
  0xa2   :  { %v6904_v14 = vpop.permute.xlu1 %5193  ;;  %v325_v16 = vsel %vm163_vm2, %v317_v1, %v5180_v39  ;;  %v326_v8 = vsel %vm163_vm2, %v318_v0, %v5181_v7  ;;  %v334_v28 = vpack.c.bf16 %v328_v9, %v327_v17  ;;  %v5090_v1 = vunpack.i.l.bf16 %v6727_v19 }
  0xa3   :  { %v5189_v31 = vpop.permute.xlu0 %5188  ;;  %v333_v35 = vpack.c.bf16 %v326_v8, %v325_v16  ;;  %v5111_v0 = vunpack.i.h.bf16 %v6762_v33  ;;  %v5110_v12 = vunpack.i.l.bf16 %v6762_v33  ;;  %v5131_v16 = vunpack.i.h.bf16 %v6794_v45 }
  0xa4   :  { %5483 = vrot.lane.b32.xlu1 %v6860_v20, %s6282_s9  ;;  %v5191_v48 = vunpack.i.h.bf16 %v5189_v31  ;;  %v5190_v50 = vunpack.i.l.bf16 %v5189_v31  ;;  %v5156_v8 = vunpack.i.h.bf16 %v6813_v52  ;;  %v5155_v17 = vunpack.i.l.bf16 %v6813_v52 }
  0xa5   :  { %5478 = vrot.lane.b32.xlu0 %v6744_v25, %s6282_s9  ;;  %3609 = vmatprep.mubr.bf16.mxu0 %v333_v35  ;;  %v4341_v25 = vld [vmem:[%s9486_s0 + $0x172] sm:$0xff]  ;;  %v173_v9 = vpack.c.bf16 %v167_v2, %v166_v59  ;;  %v5176_v19 = vunpack.i.h.bf16 %v6858_v18  ;;  %v5196_v30 = vunpack.i.h.bf16 %v6904_v14  ;;  %v5195_v31 = vunpack.i.l.bf16 %v6904_v14  ;;  %v6231_v2 = vld [vmem:[%s9486_s0 + $0x48] sm:$0xff] }
  0xa6   :  { %3610 = vmatmul.mubr.bf16.vlgmr.msra.gmra.mrb[0].mxu0 %v172_v41  ;;  %v6923_v51 = vpop.permute.xlu1 %5203  ;;  %v329_v5 = vsel %vm163_vm2, %v321_v3, %v5190_v50  ;;  %v330_v7 = vsel %vm163_vm2, %v322_v6, %v5191_v48  ;;  %v6961_v39 = vpack.i.bf16 %v4341_v25, %v4340_v57  ;;  %v6230_v18 = vld [vmem:[%s9486_s0 + $0x38] sm:$0xff]  ;;  %v316_v14 = vsel %vm145_vm0, %v6494_v56, %v5156_v8 }
  0xa7   :  { %v6932_v61 = vpop.permute.xlu0 %5198  ;;  %3617 = vmatprep.mubr.bf16.mxu0 %v334_v28  ;;  %v335_v33 = vpack.c.bf16 %v330_v7, %v329_v5  ;;  %v315_v36 = vsel %vm145_vm0, %v6486_v54, %v5155_v17  ;;  %v324_v56 = vsel %vm154_vm1, %v316_v14, %v5176_v19  ;;  %v4348_v54 = vld [vmem:[%s9486_s0 + $0x180] sm:$0xff]  ;;  %v5096_v57 = vunpack.i.h.bf16 %v6739_v23  ;;  %v4354_v17 = vld [vmem:[%s9486_s0 + $0x169] sm:$0xff] }
  0xa8   :  { %5493 = vrot.lane.b32.xlu1 %v6862_v21, %s6282_s9  ;;  %v323_v24 = vsel %vm154_vm1, %v315_v36, %v5175_v29  ;;  %v332_v50 = vsel %vm163_vm2, %v324_v56, %v5196_v30  ;;  %v5095_v37 = vunpack.i.l.bf16 %v6739_v23  ;;  %v5116_v25 = vunpack.i.h.bf16 %v6760_v32  ;;  %v4352_v23 = vld [vmem:[%s9486_s0 + $0x151] sm:$0xff]  ;;  %v4380_v36 = vld [vmem:[%s9486_s0 + $0x199] sm:$0xff] }
  0xa9   :  { %5488 = vrot.lane.b32.xlu0 %v6886_v62, %s6282_s9  ;;  %v331_v48 = vsel %vm163_vm2, %v323_v24, %v5195_v31  ;;  %v5115_v49 = vunpack.i.l.bf16 %v6760_v32  ;;  %v5532_v26 = vpack.i.bf16 %v4349_v44, %v4348_v54  ;;  %v5136_v27 = vunpack.i.h.bf16 %v6786_v42  ;;  %v4353_v32 = vld [vmem:[%s9486_s0 + $0x159] sm:$0xff] }
  0xaa   :  { %v6957_v4 = vpop.permute.xlu1 %5213  ;;  %v5135_v60 = vunpack.i.l.bf16 %v6786_v42  ;;  %v336_v63 = vpack.c.bf16 %v332_v50, %v331_v48  ;;  %v152_v42 = vsel %vm145_vm0, %v6231_v2, %v5095_v37  ;;  %v7050_v5 = vpack.i.bf16 %v4353_v32, %v4352_v23  ;;  %v6234_v37 = vld [vmem:[%s9486_s0 + $0x32] sm:$0xff] }
  0xab   :  { %v6969_v13 = vpop.permute.xlu0 %5208  ;;  %v161_v7 = vsel %vm154_vm1, %v152_v42, %v5115_v49  ;;  %v4201_v23 = vld [vmem:[%s9486_s0 + $0x98] sm:$0xff] }
  0xac   :  { %5503 = vrot.lane.b32.xlu1 %v6854_v15, %s6280_s28  ;;  %v6229_v15 = vld [vmem:[%s9486_s0 + $0x30] sm:$0xff] }
  0xad   :  { %5498 = vrot.lane.b32.xlu0 %v6798_v46, %s6280_s28  ;;  %v150_v45 = vsel %vm145_vm0, %v6229_v15, %v5090_v1  ;;  %v151_v46 = vsel %vm145_vm0, %v6230_v18, %v5091_v11  ;;  %v170_v1 = vsel %vm163_vm2, %v161_v7, %v5135_v60  ;;  %v4372_v15 = vld [vmem:[%s9486_s0 + $0x198] sm:$0xff]  ;;  %v7145_v60 = vld [vmem:[%s9486_s0 + $0x18a] sm:$0xff] }
  0xae   :  { %3618 = vmatmul.mubr.bf16.gmra.mrb[4].mxu0 %v173_v9  ;;  %v6983_v52 = vpop.permute.xlu1 %5223  ;;  %v159_v38 = vsel %vm154_vm1, %v150_v45, %v5110_v12  ;;  %v160_v40 = vsel %vm154_vm1, %v151_v46, %v5111_v0  ;;  %v4356_v12 = vld [vmem:[%s9486_s0 + $0x181] sm:$0xff]  ;;  %v4355_v9 = vld [vmem:[%s9486_s0 + $0x171] sm:$0xff] }
  0xaf   :  { %v6993_v35 = vpop.permute.xlu0 %5218  ;;  %3625 = vmatprep.mubr.bf16.mxu0 %v335_v33  ;;  %v168_v41 = vsel %vm163_vm2, %v159_v38, %v5130_v22  ;;  %v169_v43 = vsel %vm163_vm2, %v160_v40, %v5131_v16  ;;  %v4357_v16 = vld [vmem:[%s9486_s0 + $0x189] sm:$0xff]  ;;  %v5547_v33 = vpack.i.bf16 %v4355_v9, %v4354_v17  ;;  %v4373_v45 = vld [vmem:[%s9486_s0 + $0x1a0] sm:$0xff]  ;;  %v5201_v38 = vunpack.i.h.bf16 %v6932_v61 }
  0xb0   :  { %5513 = vrot.lane.b32.xlu1 %v6961_v39, %s6280_s28  ;;  %v174_v47 = vpack.c.bf16 %v169_v43, %v168_v41  ;;  %v7076_v29 = vpack.i.bf16 %v4357_v16, %v4356_v12  ;;  %v5572_v46 = vpack.i.bf16 %v4373_v45, %v4372_v15  ;;  %v5200_v40 = vunpack.i.l.bf16 %v6932_v61  ;;  %v4381_v43 = vld [vmem:[%s9486_s0 + $0x1a1] sm:$0xff] }
  0xb1   :  { %5508 = vrot.lane.b32.xlu0 %v6963_v10, %s6280_s28  ;;  %v5221_v24 = vunpack.i.h.bf16 %v6993_v35  ;;  %v5220_v56 = vunpack.i.l.bf16 %v6993_v35  ;;  %v5592_v48 = vpack.i.bf16 %v4381_v43, %v4380_v36  ;;  %v5206_v12 = vunpack.i.h.bf16 %v6923_v51 }
  0xb2   :  { %v7015_v28 = vpop.permute.xlu1 %5233 }
  0xb3   :  { %v7021_v34 = vpop.permute.xlu0 %5228 }
  0xb4   :  { %5523 = vrot.lane.b32.xlu1 %v6886_v62, %s6281_s18 }
  0xb5   :  { %5518 = vrot.lane.b32.xlu0 %v6860_v20, %s6281_s18  ;;  %v6232_v20 = vld [vmem:[%s9486_s0 + $0x50] sm:$0xff] }
  0xb6   :  { %3626 = vmatmul.mubr.bf16.gmra.mrb[8].mxu0 %v174_v47  ;;  %v7037_v59 = vpop.permute.xlu1 %5243  ;;  %v153_v3 = vsel %vm145_vm0, %v6232_v20, %v5096_v57  ;;  %v6233_v57 = vld [vmem:[%s9486_s0 + $0x3a] sm:$0xff] }
  0xb7   :  { %v7047_v6 = vpop.permute.xlu0 %5238  ;;  %3633 = vmatprep.mubr.bf16.mxu0 %v336_v63  ;;  %v162_v11 = vsel %vm154_vm1, %v153_v3, %v5116_v25  ;;  %v471_v35 = vsel %vm145_vm0, %v6233_v57, %v5201_v38  ;;  %v470_v25 = vsel %vm145_vm0, %v6234_v37, %v5200_v40  ;;  %v4200_v63 = vld [vmem:[%s9486_s0 + $0x90] sm:$0xff]  ;;  %v5226_v57 = vunpack.i.h.bf16 %v6983_v52 }
  0xb8   :  { %5533 = vrot.lane.b32.xlu1 %v5532_v26, %s6281_s18  ;;  %v171_v0 = vsel %vm163_vm2, %v162_v11, %v5136_v27  ;;  %v5241_v61 = vunpack.i.h.bf16 %v7047_v6  ;;  %v5240_v54 = vunpack.i.l.bf16 %v7047_v6  ;;  %v7140_v27 = vld [vmem:[%s9486_s0 + $0x182] sm:$0xff]  ;;  %v478_v42 = vsel %vm154_vm1, %v470_v25, %v5220_v56 }
  0xb9   :  { %5528 = vrot.lane.b32.xlu0 %v6862_v21, %s6281_s18  ;;  %v175_v19 = vpack.c.bf16 %v171_v0, %v170_v1  ;;  %v479_v20 = vsel %vm154_vm1, %v471_v35, %v5221_v24  ;;  %v4198_v1 = vld [vmem:[%s9486_s0 + $0x78] sm:$0xff]  ;;  %v4199_v0 = vld [vmem:[%s9486_s0 + $0x80] sm:$0xff]  ;;  %v5225_v35 = vunpack.i.l.bf16 %v6983_v52 }
  0xba   :  { %v7064_v8 = vpop.permute.xlu1 %5253  ;;  %v486_v17 = vsel %vm163_vm2, %v478_v42, %v5240_v54  ;;  %v487_v9 = vsel %vm163_vm2, %v479_v20, %v5241_v61  ;;  %v4401_v52 = vld [vmem:[%s9486_s0 + $0x1d1] sm:$0xff]  ;;  %v5245_v42 = vunpack.i.l.bf16 %v7037_v59 }
  0xbb   :  { %v7072_v22 = vpop.permute.xlu0 %5248 }
  0xbc   :  { %5543 = vrot.lane.b32.xlu1 %v7050_v5, %s6282_s9 }
  0xbd   :  { %5538 = vrot.lane.b32.xlu0 %v6818_v58, %s6282_s9 }
  0xbe   :  { %3634 = vmatmul.mubr.bf16.gmra.mrb[12].mxu0 %v175_v19  ;;  %v5264_v30 = vpop.permute.xlu1 %5263  ;;  %v5607_v19 = vpack.i.bf16 %v7145_v60, %v7140_v27  ;;  %v5211_v60 = vunpack.i.h.bf16 %v6969_v13 }
  0xbf   :  { %v7080_v31 = vpop.permute.xlu0 %5258  ;;  %v5266_v49 = vunpack.i.h.bf16 %v5264_v30  ;;  %v5265_v47 = vunpack.i.l.bf16 %v5264_v30 }
  0xc0   :  { %5553 = vrot.lane.b32.xlu1 %v7076_v29, %s6282_s9  ;;  %v5261_v32 = vunpack.i.h.bf16 %v7080_v31  ;;  %v5260_v2 = vunpack.i.l.bf16 %v7080_v31 }
  0xc1   :  { %5548 = vrot.lane.b32.xlu0 %v5547_v33, %s6282_s9 }
  0xc2   :  { %v7091_v18 = vpop.permute.xlu1 %5273  ;;  %v633_v36 = vsel %vm145_vm0, %v4199_v0, %v5261_v32  ;;  %v4398_v32 = vld [vmem:[%s9486_s0 + $0x1b1] sm:$0xff] }
  0xc3   :  { %v7093_v58 = vpop.permute.xlu0 %5268  ;;  %v6235_v0 = vld [vmem:[%s9486_s0 + $0x52] sm:$0xff] }
  0xc4   :  { %5563 = vrot.lane.b32.xlu1 %v6862_v21, %s6280_s28  ;;  %v7110_v21 = vld [vmem:[%s9486_s0 + $0x19a] sm:$0xff] }
  0xc5   :  { %5558 = vrot.lane.b32.xlu0 %v6886_v62, %s6280_s28  ;;  %v7115_v62 = vld [vmem:[%s9486_s0 + $0x1a2] sm:$0xff] }
  0xc6   :  { %v5284_v14 = vpop.permute.xlu1 %5283  ;;  %v5612_v50 = vpack.i.bf16 %v7115_v62, %v7110_v21 }
  0xc7   :  { %v5279_v41 = vpop.permute.xlu0 %5278  ;;  %v5286_v3 = vunpack.i.h.bf16 %v5284_v14  ;;  %v5285_v6 = vunpack.i.l.bf16 %v5284_v14  ;;  %v632_v14 = vsel %vm145_vm0, %v4198_v1, %v5260_v2  ;;  %v4399_v2 = vld [vmem:[%s9486_s0 + $0x1b9] sm:$0xff] }
  0xc8   :  { %5573 = vrot.lane.b32.xlu1 %v5572_v46, %s6280_s28  ;;  %v5281_v7 = vunpack.i.h.bf16 %v5279_v41  ;;  %v5280_v11 = vunpack.i.l.bf16 %v5279_v41  ;;  %v7224_v1 = vld [vmem:[%s9486_s0 + $0x1f9] sm:$0xff] }
  0xc9   :  { %5568 = vrot.lane.b32.xlu0 %v5532_v26, %s6280_s28 }
  0xca   :  { %v7123_v44 = vpop.permute.xlu1 %5293  ;;  %v640_v38 = vsel %vm154_vm1, %v632_v14, %v5280_v11  ;;  %v641_v40 = vsel %vm154_vm1, %v633_v36, %v5281_v7 }
  0xcb   :  { %v7135_v26 = vpop.permute.xlu0 %5288 }
  0xcc   :  { %5583 = vrot.lane.b32.xlu1 %v5547_v33, %s6281_s18  ;;  %v634_v33 = vsel %vm145_vm0, %v4200_v63, %v5265_v47  ;;  %v5246_v47 = vunpack.i.h.bf16 %v7037_v59  ;;  %v5271_v63 = vunpack.i.h.bf16 %v7093_v58  ;;  %v5291_v20 = vunpack.i.h.bf16 %v7135_v26 }
  0xcd   :  { %5578 = vrot.lane.b32.xlu0 %v7050_v5, %s6281_s18  ;;  %v635_v5 = vsel %vm145_vm0, %v4201_v23, %v5266_v49  ;;  %v642_v41 = vsel %vm154_vm1, %v634_v33, %v5285_v6  ;;  %v4400_v49 = vld [vmem:[%s9486_s0 + $0x1c9] sm:$0xff]  ;;  %v5270_v23 = vunpack.i.l.bf16 %v7093_v58  ;;  %v7239_v33 = vld [vmem:[%s9486_s0 + $0x201] sm:$0xff] }
  0xce   :  { %v5304_v16 = vpop.permute.xlu1 %5303  ;;  %v643_v43 = vsel %vm154_vm1, %v635_v5, %v5286_v3  ;;  %v4202_v58 = vld [vmem:[%s9486_s0 + $0xa8] sm:$0xff]  ;;  %v5290_v3 = vunpack.i.l.bf16 %v7135_v26  ;;  %v473_v26 = vsel %vm145_vm0, %v6235_v0, %v5206_v12  ;;  %v5617_v5 = vpack.i.bf16 %v4399_v2, %v4398_v32 }
  0xcf   :  { %v5306_v30 = vunpack.i.h.bf16 %v5304_v16  ;;  %v5305_v31 = vunpack.i.l.bf16 %v5304_v16  ;;  %v5299_v15 = vpop.permute.xlu0 %5298  ;;  %v7244_v12 = vld [vmem:[%s9486_s0 + $0x1e1] sm:$0xff] }
  0xd0   :  { %v5301_v45 = vunpack.i.h.bf16 %v5299_v15  ;;  %v5300_v46 = vunpack.i.l.bf16 %v5299_v15  ;;  %5593 = vrot.lane.b32.xlu1 %v5592_v48, %s6281_s18  ;;  %v636_v15 = vsel %vm145_vm0, %v4202_v58, %v5270_v23 }
  0xd1   :  { %5588 = vrot.lane.b32.xlu0 %v7076_v29, %s6281_s18  ;;  %v650_v54 = vsel %vm163_vm2, %v642_v41, %v5305_v31  ;;  %v651_v48 = vsel %vm163_vm2, %v643_v43, %v5306_v30  ;;  %v5205_v29 = vunpack.i.l.bf16 %v6923_v51  ;;  %v494_v51 = vpack.c.bf16 %v487_v9, %v486_v17  ;;  %v7249_v30 = vld [vmem:[%s9486_s0 + $0x1e9] sm:$0xff] }
  0xd2   :  { %v7182_v24 = vpop.permute.xlu1 %5313  ;;  %v648_v56 = vsel %vm163_vm2, %v640_v38, %v5300_v46  ;;  %v649_v61 = vsel %vm163_vm2, %v641_v40, %v5301_v45  ;;  %v657_v6 = vpack.c.bf16 %v651_v48, %v650_v54  ;;  %v5622_v9 = vpack.i.bf16 %v4401_v52, %v4400_v49  ;;  %v4408_v54 = vld [vmem:[%s9486_s0 + $0x1ca] sm:$0xff] }
  0xd3   :  { %v5309_v37 = vpop.permute.xlu0 %5308  ;;  %v656_v25 = vpack.c.bf16 %v649_v61, %v648_v56  ;;  %v481_v46 = vsel %vm154_vm1, %v473_v26, %v5226_v57  ;;  %v644_v38 = vsel %vm154_vm1, %v636_v15, %v5290_v3  ;;  %v5627_v27 = vpack.i.bf16 %v7249_v30, %v7244_v12  ;;  %v6237_v52 = vld [vmem:[%s9486_s0 + $0x6a] sm:$0xff] }
  0xd4   :  { %5603 = vrot.lane.b32.xlu1 %v6961_v39, %s6282_s9  ;;  %v4203_v39 = vld [vmem:[%s9486_s0 + $0xb0] sm:$0xff]  ;;  %v5311_v7 = vunpack.i.h.bf16 %v5309_v37  ;;  %v5310_v11 = vunpack.i.l.bf16 %v5309_v37  ;;  %v489_v36 = vsel %vm163_vm2, %v481_v46, %v5246_v47  ;;  %v5231_v43 = vunpack.i.h.bf16 %v7021_v34  ;;  %v4407_v37 = vld [vmem:[%s9486_s0 + $0x1ba] sm:$0xff] }
  0xd5   :  { %5598 = vrot.lane.b32.xlu0 %v6963_v10, %s6282_s9  ;;  %3706 = vmatprep.mubr.bf16.mxu1 %v656_v25  ;;  %v6236_v10 = vld [vmem:[%s9486_s0 + $0x4a] sm:$0xff]  ;;  %v637_v31 = vsel %vm145_vm0, %v4203_v39, %v5271_v63  ;;  %v5230_v56 = vunpack.i.l.bf16 %v7021_v34  ;;  %v5251_v48 = vunpack.i.h.bf16 %v7072_v22  ;;  %v5275_v57 = vunpack.i.l.bf16 %v7091_v18  ;;  %v4406_v34 = vld [vmem:[%s9486_s0 + $0x1b2] sm:$0xff] }
  0xd6   :  { %3707 = vmatmul.mubr.bf16.vlgmr.msra.gmra.mrb[0].mxu1 %v494_v51  ;;  %v7219_v59 = vpop.permute.xlu1 %5323  ;;  %v472_v16 = vsel %vm145_vm0, %v6236_v10, %v5205_v29  ;;  %v645_v40 = vsel %vm154_vm1, %v637_v31, %v5291_v20  ;;  %v652_v21 = vsel %vm163_vm2, %v644_v38, %v5310_v11  ;;  %v5276_v29 = vunpack.i.h.bf16 %v7091_v18 }
  0xd7   :  { %v7234_v17 = vpop.permute.xlu0 %5318  ;;  %3714 = vmatprep.mubr.bf16.mxu1 %v657_v6  ;;  %v480_v45 = vsel %vm154_vm1, %v472_v16, %v5225_v35  ;;  %v653_v62 = vsel %vm163_vm2, %v645_v40, %v5311_v7  ;;  %v5250_v25 = vunpack.i.l.bf16 %v7072_v22  ;;  %v5296_v49 = vunpack.i.h.bf16 %v7123_v44 }
  0xd8   :  { %5613 = vrot.lane.b32.xlu1 %v5612_v50, %s6282_s9  ;;  %v488_v14 = vsel %vm163_vm2, %v480_v45, %v5245_v42  ;;  %v5632_v50 = vpack.i.bf16 %v7239_v33, %v7224_v1  ;;  %v5295_v18 = vunpack.i.l.bf16 %v7123_v44  ;;  %v658_v47 = vpack.c.bf16 %v653_v62, %v652_v21  ;;  %v6238_v44 = vld [vmem:[%s9486_s0 + $0x62] sm:$0xff] }
  0xd9   :  { %5608 = vrot.lane.b32.xlu0 %v5607_v19, %s6282_s9  ;;  %v5210_v19 = vunpack.i.l.bf16 %v6969_v13  ;;  %v495_v35 = vpack.c.bf16 %v489_v36, %v488_v14  ;;  %v4409_v13 = vld [vmem:[%s9486_s0 + $0x1d2] sm:$0xff]  ;;  %v5316_v63 = vunpack.i.h.bf16 %v7182_v24  ;;  %v5315_v23 = vunpack.i.l.bf16 %v7182_v24 }
  0xda   :  { %v7267_v41 = vpop.permute.xlu1 %5333  ;;  %v475_v22 = vsel %vm145_vm0, %v6237_v52, %v5211_v60  ;;  %v7315_v42 = vpack.i.bf16 %v4409_v13, %v4408_v54  ;;  %v5637_v24 = vpack.i.bf16 %v4407_v37, %v4406_v34  ;;  %v639_v58 = vsel %vm145_vm0, %v6668_v55, %v5276_v29  ;;  %v4413_v55 = vld [vmem:[%s9486_s0 + $0x202] sm:$0xff]  ;;  %v4415_v60 = vld [vmem:[%s9486_s0 + $0x1d0] sm:$0xff] }
  0xdb   :  { %v7279_v61 = vpop.permute.xlu0 %5328  ;;  %v474_v32 = vsel %vm145_vm0, %v6238_v44, %v5210_v19  ;;  %v638_v39 = vsel %vm145_vm0, %v6663_v53, %v5275_v57  ;;  %v483_v3 = vsel %vm154_vm1, %v475_v22, %v5231_v43  ;;  %v647_v0 = vsel %vm154_vm1, %v639_v58, %v5296_v49  ;;  %v4412_v53 = vld [vmem:[%s9486_s0 + $0x1fa] sm:$0xff]  ;;  %v6239_v19 = vld [vmem:[%s9486_s0 + $0x82] sm:$0xff]  ;;  %v4495_v22 = vld [vmem:[%s9486_s0 + $0x231] sm:$0xff] }
  0xdc   :  { %5623 = vrot.lane.b32.xlu1 %v5622_v9, %s6280_s28  ;;  %v482_v20 = vsel %vm154_vm1, %v474_v32, %v5230_v56  ;;  %v491_v7 = vsel %vm163_vm2, %v483_v3, %v5251_v48  ;;  %v646_v11 = vsel %vm154_vm1, %v638_v39, %v5295_v18  ;;  %v655_v16 = vsel %vm163_vm2, %v647_v0, %v5316_v63  ;;  %v4410_v9 = vld [vmem:[%s9486_s0 + $0x1e2] sm:$0xff]  ;;  %v6240_v56 = vld [vmem:[%s9486_s0 + $0x7a] sm:$0xff]  ;;  %v4462_v39 = vld [vmem:[%s9486_s0 + $0x210] sm:$0xff] }
  0xdd   :  { %5618 = vrot.lane.b32.xlu0 %v5617_v5, %s6280_s28  ;;  %v490_v6 = vsel %vm163_vm2, %v482_v20, %v5250_v25  ;;  %v654_v10 = vsel %vm163_vm2, %v646_v11, %v5315_v23  ;;  %v4411_v5 = vld [vmem:[%s9486_s0 + $0x1ea] sm:$0xff]  ;;  %v5216_v31 = vunpack.i.h.bf16 %v6957_v4  ;;  %v5215_v15 = vunpack.i.l.bf16 %v6957_v4  ;;  %v7397_v49 = vld [vmem:[%s9486_s0 + $0x1f8] sm:$0xff] }
  0xde   :  { %3715 = vmatmul.mubr.bf16.gmra.mrb[4].mxu1 %v495_v35  ;;  %v7303_v51 = vpop.permute.xlu1 %5343  ;;  %v5236_v46 = vunpack.i.h.bf16 %v7015_v28  ;;  %v5235_v14 = vunpack.i.l.bf16 %v7015_v28  ;;  %v496_v36 = vpack.c.bf16 %v491_v7, %v490_v6  ;;  %v7353_v38 = vpack.i.bf16 %v4413_v55, %v4412_v53  ;;  %v4417_v28 = vld [vmem:[%s9486_s0 + $0x1e8] sm:$0xff]  ;;  %v4470_v7 = vld [vmem:[%s9486_s0 + $0x211] sm:$0xff]  ;;  %v7450_v11 = vld [vmem:[%s9486_s0 + $0x219] sm:$0xff] }
  0xdf   :  { %v7313_v2 = vpop.permute.xlu0 %5338  ;;  %3722 = vmatprep.mubr.bf16.mxu1 %v658_v47  ;;  %v5256_v40 = vunpack.i.h.bf16 %v7064_v8  ;;  %v5255_v21 = vunpack.i.l.bf16 %v7064_v8  ;;  %v659_v62 = vpack.c.bf16 %v655_v16, %v654_v10  ;;  %v7358_v4 = vpack.i.bf16 %v4411_v5, %v4410_v9  ;;  %v4414_v8 = vld [vmem:[%s9486_s0 + $0x1c8] sm:$0xff]  ;;  %v7457_v53 = vld [vmem:[%s9486_s0 + $0x240] sm:$0xff] }
  0xe0   :  { %5633 = vrot.lane.b32.xlu1 %v5632_v50, %s6280_s28  ;;  %v4416_v50 = vld [vmem:[%s9486_s0 + $0x1e0] sm:$0xff]  ;;  %v477_v43 = vsel %vm145_vm0, %v6239_v19, %v5216_v31  ;;  %v476_v54 = vsel %vm145_vm0, %v6240_v56, %v5215_v15  ;;  %v5657_v13 = vpack.i.bf16 %v4415_v60, %v4414_v8  ;;  %v5667_v63 = vpack.i.bf16 %v7244_v12, %v7397_v49  ;;  %v4494_v52 = vld [vmem:[%s9486_s0 + $0x229] sm:$0xff]  ;;  %v7477_v31 = vld [vmem:[%s9486_s0 + $0x212] sm:$0xff] }
  0xe1   :  { %5628 = vrot.lane.b32.xlu0 %v5627_v27, %s6280_s28  ;;  %v5662_v29 = vpack.i.bf16 %v4417_v28, %v4416_v50  ;;  %v484_v57 = vsel %vm154_vm1, %v476_v54, %v5235_v14  ;;  %v485_v35 = vsel %vm154_vm1, %v477_v43, %v5236_v46  ;;  %v7418_v32 = vpack.i.bf16 %v4495_v22, %v4494_v52  ;;  %v4502_v12 = vld [vmem:[%s9486_s0 + $0x22a] sm:$0xff]  ;;  %v7470_v9 = vld [vmem:[%s9486_s0 + $0x21a] sm:$0xff] }
  0xe2   :  { %v7335_v26 = vpop.permute.xlu1 %5353  ;;  %v492_v34 = vsel %vm163_vm2, %v484_v57, %v5255_v21  ;;  %v493_v37 = vsel %vm163_vm2, %v485_v35, %v5256_v40  ;;  %v5702_v10 = vpack.i.bf16 %v7450_v11, %v4470_v7  ;;  %v5697_v16 = vpack.i.bf16 %v7457_v53, %v7249_v30  ;;  %v7482_v15 = vld [vmem:[%s9486_s0 + $0x248] sm:$0xff]  ;;  %v7514_v28 = vld [vmem:[%s9486_s0 + $0x230] sm:$0xff]  ;;  %v7521_v60 = vld [vmem:[%s9486_s0 + $0x200] sm:$0xff] }
  0xe3   :  { %v7347_v45 = vpop.permute.xlu0 %5348  ;;  %v497_v47 = vpack.c.bf16 %v493_v37, %v492_v34  ;;  %v5712_v30 = vpack.i.bf16 %v7224_v1, %v7470_v9  ;;  %v5707_v14 = vpack.i.bf16 %v7477_v31, %v7482_v15  ;;  %v4497_v40 = vld [vmem:[%s9486_s0 + $0x249] sm:$0xff]  ;;  %v5727_v56 = vpack.i.bf16 %v7521_v60, %v7397_v49  ;;  %v7538_v54 = vld [vmem:[%s9486_s0 + $0x258] sm:$0xff]  ;;  %v7560_v37 = vld [vmem:[%s9486_s0 + $0x260] sm:$0xff] }
  0xe4   :  { %5643 = vrot.lane.b32.xlu1 %v7315_v42, %s6281_s18  ;;  %v7509_v50 = vld [vmem:[%s9486_s0 + $0x228] sm:$0xff] }
  0xe5   :  { %5638 = vrot.lane.b32.xlu0 %v5637_v24, %s6281_s18  ;;  %v7426_v24 = vld [vmem:[%s9486_s0 + $0x232] sm:$0xff]  ;;  %v7529_v43 = vpack.i.bf16 %v7514_v28, %v7509_v50  ;;  %v4504_v57 = vld [vmem:[%s9486_s0 + $0x242] sm:$0xff]  ;;  %v4505_v35 = vld [vmem:[%s9486_s0 + $0x24a] sm:$0xff] }
  0xe6   :  { %3723 = vmatmul.mubr.bf16.gmra.mrb[8].mxu1 %v496_v36  ;;  %v7366_v27 = vpop.permute.xlu1 %5363  ;;  %v5692_v3 = vpack.i.bf16 %v7426_v24, %v4502_v12  ;;  %v4496_v36 = vld [vmem:[%s9486_s0 + $0x241] sm:$0xff]  ;;  %v7555_v34 = vpack.i.bf16 %v4505_v35, %v4504_v57  ;;  %v5757_v22 = vpack.i.bf16 %v4470_v7, %v7426_v24 }
  0xe7   :  { %v7382_v48 = vpop.permute.xlu0 %5358  ;;  %3730 = vmatprep.mubr.bf16.mxu1 %v659_v62  ;;  %v7503_v1 = vpack.i.bf16 %v4497_v40, %v4496_v36  ;;  %v4506_v24 = vld [vmem:[%s9486_s0 + $0x25a] sm:$0xff]  ;;  %v4507_v7 = vld [vmem:[%s9486_s0 + $0x262] sm:$0xff]  ;;  %v5777_v40 = vpack.i.bf16 %v7482_v15, %v7457_v53 }
  0xe8   :  { %5653 = vrot.lane.b32.xlu1 %v7353_v38, %s6281_s18  ;;  %v6190_v36 = vld [vmem:[%s9487_s1 + $0x1c0] sm:$0xff]   ;;  %v6193_v53 = vld [vmem:[%s9487_s1 + $0x148] sm:$0xff]  }
  0xe9   :  { %5648 = vrot.lane.b32.xlu0 %v7358_v4, %s6281_s18  ;;  %v6192_v57 = vld [vmem:[%s9487_s1 + $0x180] sm:$0xff]   ;;  %4943 = vmatprep.subr.bf16.mxu1 %v6190_v36  ;;  %v6194_v15 = vld [vmem:[%s9487_s1 + $0x1c8] sm:$0xff]   ;;  %v6197_v36 = vld [vmem:[%s9487_s1 + $0x150] sm:$0xff]  }
  0xea   :  { %v7392_v25 = vpop.permute.xlu1 %5373  ;;  %4944 = vmatpush3.bf16.msra.mxu1 %v6192_v57  ;;  %v6199_v57 = vld [vmem:[%s9487_s1 + $0x110] sm:$0xff]  }
  0xeb   :  { %v7399_v18 = vpop.permute.xlu0 %5368  ;;  %4945 = vmatprep.subr.bf16.mxu1 %v6194_v15 }
  0xec   :  { %5663 = vrot.lane.b32.xlu1 %v5662_v29, %s6282_s9 }
  0xed   :  { %5658 = vrot.lane.b32.xlu0 %v5657_v13, %s6282_s9 }
  0xee   :  { %3731 = vmatmul.mubr.bf16.gmra.mrb[12].mxu1 %v497_v47  ;;  %v7405_v23 = vpop.permute.xlu1 %5383 }
  0xef   :  { %v7413_v44 = vpop.permute.xlu0 %5378 }
  0xf0   :  { %5673 = vrot.lane.b32.xlu1 %v7315_v42, %s6280_s28  ;;  %v4463_v42 = vld [vmem:[%s9486_s0 + $0x218] sm:$0xff] }
  0xf1   :  { %5668 = vrot.lane.b32.xlu0 %v5667_v63, %s6282_s9  ;;  %v7442_v6 = vpack.i.bf16 %v4463_v42, %v4462_v39  ;;  %v5752_v63 = vpack.i.bf16 %v4502_v12, %v7560_v37  ;;  %v4498_v12 = vld [vmem:[%s9486_s0 + $0x259] sm:$0xff]  ;;  %v4499_v42 = vld [vmem:[%s9486_s0 + $0x261] sm:$0xff] }
  0xf2   :  { %v7428_v58 = vpop.permute.xlu1 %5393 }
  0xf3   :  { %v7436_v20 = vpop.permute.xlu0 %5388 }
  0xf4   :  { %5683 = vrot.lane.b32.xlu1 %v5662_v29, %s6281_s18 }
  0xf5   :  { %5678 = vrot.lane.b32.xlu0 %v7418_v32, %s6280_s28 }
  0xf6   :  { %v7452_v0 = vpop.permute.xlu1 %5403 }
  0xf7   :  { %v7459_v55 = vpop.permute.xlu0 %5398 }
  0xf8   :  { %5693 = vrot.lane.b32.xlu1 %v5692_v3, %s6281_s18 }
  0xf9   :  { %5688 = vrot.lane.b32.xlu0 %v7442_v6, %s6280_s28 }
  0xfa   :  { %v7472_v5 = vpop.permute.xlu1 %5413 }
  0xfb   :  { %v7484_v46 = vpop.permute.xlu0 %5408 }
  0xfc   :  { %5703 = vrot.lane.b32.xlu1 %v5702_v10, %s6281_s18  ;;  %v7591_v10 = vpack.i.bf16 %v4499_v42, %v4498_v12  ;;  %v6195_v12 = vld [vmem:[%s9487_s1 + $0x108] sm:$0xff]  }
  0xfd   :  { %5698 = vrot.lane.b32.xlu0 %v5697_v16, %s6282_s9 }
  0xfe   :  { %v7498_v21 = vpop.permute.xlu1 %5423 }
  0xff   :  { %v7500_v62 = vpop.permute.xlu0 %5418 }
 0x100   :  { %5713 = vrot.lane.b32.xlu1 %v5712_v30, %s6282_s9 }
 0x101   :  { %5708 = vrot.lane.b32.xlu0 %v5707_v14, %s6282_s9  ;;  %v6189_v14 = vld [vmem:[%s9487_s1 + $0x140] sm:$0xff]  }
 0x102   :  { %v7516_v8 = vpop.permute.xlu1 %5433  ;;  %4879 = vmatprep.subr.bf16.mxu0 %v6189_v14 }
 0x103   :  { %v7523_v19 = vpop.permute.xlu0 %5428 }
 0x104   :  { %5723 = vrot.lane.b32.xlu1 %v7503_v1, %s6280_s28 }
 0x105   :  { %5718 = vrot.lane.b32.xlu0 %v7358_v4, %s6280_s28  ;;  %v5742_v4 = vpack.i.bf16 %v7538_v54, %v7239_v33 }
 0x106   :  { %v7540_v29 = vpop.permute.xlu1 %5443 }
 0x107   :  { %v7548_v13 = vpop.permute.xlu0 %5438 }
 0x108   :  { %5733 = vrot.lane.b32.xlu1 %v7529_v43, %s6280_s28 }
 0x109   :  { %5728 = vrot.lane.b32.xlu0 %v5727_v56, %s6281_s18  ;;  %v6191_v56 = vld [vmem:[%s9487_s1 + $0x100] sm:$0xff]  }
 0x10a   :  { %v7562_v49 = vpop.permute.xlu1 %5453  ;;  %4880 = vmatpush3.bf16.msra.mxu0 %v6191_v56 }
 0x10b   :  { %9539 = vst [vmem:[#allocation6_spill] sm:$0xff] %v7562_v49  ;;  %v7564_v47 = vpop.permute.xlu0 %5448  ;;  %4881 = vmatprep.subr.bf16.mxu0 %v6193_v53  ;;  %v6200_v53 = vld [vmem:[%s9487_s1 + $0x190] sm:$0xff]  }
 0x10c   :  { %9540 = vst [vmem:[#allocation7_spill] sm:$0xff] %v7564_v47  ;;  %5743 = vrot.lane.b32.xlu1 %v5742_v4, %s6282_s9  ;;  %v7628_v4 = vld [vmem:[%s9486_s0 + $0x270] sm:$0xff] }
 0x10d   :  { %5738 = vrot.lane.b32.xlu0 %v7555_v34, %s6281_s18 }
 0x10e   :  { %v7570_v33 = vpop.permute.xlu1 %5463  ;;  %4882 = vmatpush3.bf16.msra.mxu0 %v6195_v12  ;;  %v6201_v12 = vld [vmem:[%s9487_s1 + $0x158] sm:$0xff]  }
 0x10f   :  { %9541 = vst [vmem:[#allocation8_spill] sm:$0xff] %v7570_v33  ;;  %v7572_v52 = vpop.permute.xlu0 %5458  ;;  %4883 = vmatprep.subr.bf16.mxu0 %v6197_v36  ;;  %v5807_v36 = vpack.i.bf16 %v7470_v9, %v7477_v31  ;;  %v5822_v9 = vpack.i.bf16 %v7560_v37, %v7538_v54  ;;  %v6205_v31 = vld [vmem:[%s9487_s1 + $0x160] sm:$0xff]   ;;  %v4508_v37 = vld [vmem:[%s9486_s0 + $0x272] sm:$0xff]  ;;  %v5365_v33 = vunpack.i.l.bf16 %v7366_v27 }
 0x110   :  { %9542 = vst [vmem:[#allocation9_spill] sm:$0xff] %v7572_v52  ;;  %5753 = vrot.lane.b32.xlu1 %v5752_v63, %s6282_s9  ;;  %v5341_v52 = vunpack.i.h.bf16 %v7313_v2 }
 0x111   :  { %5748 = vrot.lane.b32.xlu0 %v7418_v32, %s6281_s18 }
 0x112   :  { %v7578_v39 = vpop.permute.xlu1 %5473  ;;  %4884 = vmatpush3.bf16.msra.mxu0 %v6199_v57 }
 0x113   :  { %9543 = vst [vmem:[#allocation10_spill] sm:$0xff] %v7578_v39  ;;  %v7586_v3 = vpop.permute.xlu0 %5468  ;;  %4885 = vmatprep.subr.bf16.mxu0 %v6201_v12  ;;  %v6208_v12 = vld [vmem:[%s9487_s1 + $0x1a0] sm:$0xff]   ;;  %v5336_v39 = vunpack.i.h.bf16 %v7267_v41 }
 0x114   :  { %9544 = vst [vmem:[#allocation11_spill] sm:$0xff] %v7586_v3  ;;  %5763 = vrot.lane.b32.xlu1 %v7353_v38, %s6280_s28  ;;  %v7605_v38 = vpack.i.bf16 %v4507_v7, %v4506_v24  ;;  %v7651_v24 = vld [vmem:[%s9486_s0 + $0x278] sm:$0xff]  ;;  %v6196_v7 = vld [vmem:[%s9487_s1 + $0x188] sm:$0xff]  }
 0x115   :  { %5758 = vrot.lane.b32.xlu0 %v5757_v22, %s6282_s9  ;;  %v5787_v22 = vpack.i.bf16 %v7628_v4, %v7450_v11  ;;  %v4500_v11 = vld [vmem:[%s9486_s0 + $0x271] sm:$0xff]  ;;  %4946 = vmatpush3.bf16.msra.mxu1 %v6196_v7  ;;  %v5797_v56 = vpack.i.bf16 %v7521_v60, %v7651_v24 }
 0x116   :  { %v7599_v16 = vpop.permute.xlu1 %5483  ;;  %v6202_v7 = vld [vmem:[%s9487_s1 + $0x1d8] sm:$0xff]  }
 0x117   :  { %9545 = vst [vmem:[#allocation12_spill] sm:$0xff] %v7599_v16  ;;  %v7601_v30 = vpop.permute.xlu0 %5478  ;;  %v5320_v16 = vunpack.i.l.bf16 %v7234_v17  ;;  %v4230_v3 = vld [vmem:[%s9486_s0 + $0x91] sm:$0xff] }
 0x118   :  { %9546 = vst [vmem:[#allocation13_spill] sm:$0xff] %v7601_v30  ;;  %5773 = vrot.lane.b32.xlu1 %v7442_v6, %s6281_s18 }
 0x119   :  { %5768 = vrot.lane.b32.xlu0 %v7591_v10, %s6280_s28 }
 0x11a   :  { %v7623_v35 = vpop.permute.xlu1 %5493 }
 0x11b   :  { %9547 = vst [vmem:[#allocation14_spill] sm:$0xff] %v7623_v35  ;;  %v7630_v63 = vpop.permute.xlu0 %5488 }
 0x11c   :  { %9548 = vst [vmem:[#allocation15_spill] sm:$0xff] %v7630_v63  ;;  %5783 = vrot.lane.b32.xlu1 %v7605_v38, %s6281_s18  ;;  %v4575_v63 = vld [vmem:[%s9486_s0 + $0x292] sm:$0xff] }
 0x11d   :  { %5778 = vrot.lane.b32.xlu0 %v5777_v40, %s6280_s28  ;;  %v6198_v40 = vld [vmem:[%s9487_s1 + $0x1d0] sm:$0xff]  }
 0x11e   :  { %v7646_v42 = vpop.permute.xlu1 %5503  ;;  %4947 = vmatprep.subr.bf16.mxu1 %v6198_v40  ;;  %v6203_v40 = vld [vmem:[%s9487_s1 + $0x118] sm:$0xff]  }
 0x11f   :  { %9549 = vst [vmem:[#allocation16_spill] sm:$0xff] %v7646_v42  ;;  %v7656_v14 = vpop.permute.xlu0 %5498  ;;  %4948 = vmatpush3.bf16.msra.mxu1 %v6200_v53  ;;  %4886 = vmatpush3.bf16.msra.mxu0 %v6203_v40  ;;  %v6207_v53 = vld [vmem:[%s9487_s1 + $0x120] sm:$0xff]   ;;  %v4516_v40 = vld [vmem:[%s9486_s0 + $0x288] sm:$0xff] }
 0x120   :  { %9550 = vst [vmem:[#allocation17_spill] sm:$0xff] %v7656_v14  ;;  %5793 = vrot.lane.b32.xlu1 %v7503_v1, %s6281_s18  ;;  %v4501_v1 = vld [vmem:[%s9486_s0 + $0x279] sm:$0xff]  ;;  %4949 = vmatprep.subr.bf16.mxu1 %v6202_v7  ;;  %v5335_v14 = vunpack.i.l.bf16 %v7267_v41 }
 0x121   :  { %5788 = vrot.lane.b32.xlu0 %v5787_v22, %s6282_s9  ;;  %v7687_v60 = vpack.i.bf16 %v4501_v1, %v4500_v11  ;;  %v6204_v11 = vld [vmem:[%s9487_s1 + $0x198] sm:$0xff]   ;;  %4887 = vmatprep.subr.bf16.mxu0 %v6205_v31  ;;  %v4632_v42 = vld [vmem:[%s9486_s0 + $0x300] sm:$0xff] }
 0x122   :  { %v7681_v15 = vpop.permute.xlu1 %5513  ;;  %v4509_v7 = vld [vmem:[%s9486_s0 + $0x27a] sm:$0xff] }
 0x123   :  { %9551 = vst [vmem:[#allocation18_spill] sm:$0xff] %v7681_v15  ;;  %v7683_v22 = vpop.permute.xlu0 %5508  ;;  %4950 = vmatpush3.bf16.msra.mxu1 %v6204_v11  ;;  %4888 = vmatpush3.bf16.msra.mxu0 %v6207_v53  ;;  %v6209_v11 = vld [vmem:[%s9487_s1 + $0x168] sm:$0xff]   ;;  %v7747_v31 = vpack.i.bf16 %v4509_v7, %v4508_v37  ;;  %v6213_v37 = vld [vmem:[%s9487_s1 + $0x170] sm:$0xff]   ;;  %v4236_v41 = vld [vmem:[%s9486_s0 + $0xd9] sm:$0xff] }
 0x124   :  { %9552 = vst [vmem:[#allocation19_spill] sm:$0xff] %v7683_v22  ;;  %5803 = vrot.lane.b32.xlu1 %v7555_v34, %s6282_s9  ;;  %v6212_v53 = vld [vmem:[%s9487_s1 + $0x1a8] sm:$0xff]   ;;  %4889 = vmatprep.subr.bf16.mxu0 %v6209_v11  ;;  %v6214_v7 = vld [vmem:[%s9487_s1 + $0x1f0] sm:$0xff]   ;;  %v4231_v22 = vld [vmem:[%s9486_s0 + $0x99] sm:$0xff] }
 0x125   :  { %5798 = vrot.lane.b32.xlu0 %v5797_v56, %s6282_s9  ;;  %v6206_v56 = vld [vmem:[%s9487_s1 + $0x1e0] sm:$0xff]  }
 0x126   :  { %v7704_v1 = vpop.permute.xlu1 %5523  ;;  %4951 = vmatprep.subr.bf16.mxu1 %v6206_v56  ;;  %v6211_v56 = vld [vmem:[%s9487_s1 + $0x128] sm:$0xff]  }
 0x127   :  { %9553 = vst [vmem:[#allocation20_spill] sm:$0xff] %v7704_v1  ;;  %v7706_v57 = vpop.permute.xlu0 %5518  ;;  %4952 = vmatpush3.bf16.msra.mxu1 %v6208_v12  ;;  %4890 = vmatpush3.bf16.msra.mxu0 %v6211_v56  ;;  %v6218_v56 = vld [vmem:[%s9487_s1 + $0x1f8] sm:$0xff]  }
 0x128   :  { %9554 = vst [vmem:[#allocation21_spill] sm:$0xff] %v7706_v57  ;;  %5813 = vrot.lane.b32.xlu1 %v7687_v60, %s6280_s28  ;;  %4891 = vmatprep.subr.bf16.mxu0 %v6213_v37  ;;  %v4623_v37 = vld [vmem:[%s9486_s0 + $0x2da] sm:$0xff] }
 0x129   :  { %5808 = vrot.lane.b32.xlu0 %v5807_v36, %s6280_s28 }
 0x12a   :  { %v7725_v54 = vpop.permute.xlu1 %5533 }
 0x12b   :  { %9555 = vst [vmem:[#allocation22_spill] sm:$0xff] %v7725_v54  ;;  %v7733_v36 = vpop.permute.xlu0 %5528  ;;  %v6210_v54 = vld [vmem:[%s9487_s1 + $0x1e8] sm:$0xff]  }
 0x12c   :  { %9556 = vst [vmem:[#allocation23_spill] sm:$0xff] %v7733_v36  ;;  %5823 = vrot.lane.b32.xlu1 %v5822_v9, %s6280_s28  ;;  %v4517_v9 = vld [vmem:[%s9486_s0 + $0x290] sm:$0xff]  ;;  %4953 = vmatprep.subr.bf16.mxu1 %v6210_v54  ;;  %v4561_v36 = vld [vmem:[%s9486_s0 + $0x2a8] sm:$0xff] }
 0x12d   :  { %5818 = vrot.lane.b32.xlu0 %v7529_v43, %s6281_s18  ;;  %v7764_v43 = vpack.i.bf16 %v4517_v9, %v4516_v40  ;;  %4954 = vmatpush3.bf16.msra.mxu1 %v6212_v53  ;;  %v6215_v54 = vld [vmem:[%s9487_s1 + $0x130] sm:$0xff]   ;;  %v6217_v9 = vld [vmem:[%s9487_s1 + $0x178] sm:$0xff]  }
 0x12e   :  { %v7758_v12 = vpop.permute.xlu1 %5543  ;;  %4955 = vmatprep.subr.bf16.mxu1 %v6214_v7  ;;  %4892 = vmatpush3.bf16.msra.mxu0 %v6215_v54  ;;  %v4622_v53 = vld [vmem:[%s9486_s0 + $0x2d2] sm:$0xff] }
 0x12f   :  { %9557 = vst [vmem:[#allocation24_spill] sm:$0xff] %v7758_v12  ;;  %v7760_v15 = vpop.permute.xlu0 %5538  ;;  %v6219_v7 = vld [vmem:[%s9487_s1 + $0x138] sm:$0xff]   ;;  %4893 = vmatprep.subr.bf16.mxu0 %v6217_v9  ;;  %v4566_v9 = vld [vmem:[%s9486_s0 + $0x289] sm:$0xff] }
 0x130   :  { %9558 = vst [vmem:[#allocation25_spill] sm:$0xff] %v7760_v15  ;;  %5833 = vrot.lane.b32.xlu1 %v7418_v32, %s6282_s9  ;;  %v6216_v32 = vld [vmem:[%s9487_s1 + $0x1b0] sm:$0xff]   ;;  %v4633_v15 = vld [vmem:[%s9486_s0 + $0x308] sm:$0xff] }
 0x131   :  { %5828 = vrot.lane.b32.xlu0 %v7747_v31, %s6281_s18  ;;  %4956 = vmatpush3.bf16.msra.mxu1 %v6216_v32 }
 0x132   :  { %v7777_v11 = vpop.permute.xlu1 %5553  ;;  %4957 = vmatprep.subr.bf16.mxu1 %v6218_v56  ;;  %4894 = vmatpush3.bf16.msra.mxu0 %v6219_v7  ;;  %v4567_v56 = vld [vmem:[%s9486_s0 + $0x291] sm:$0xff] }
 0x133   :  { %9559 = vst [vmem:[#allocation26_spill] sm:$0xff] %v7777_v11  ;;  %v7782_v40 = vpop.permute.xlu0 %5548  ;;  %v7812_v11 = vpack.i.bf16 %v4623_v37, %v4622_v53  ;;  %v7828_v53 = vpack.i.bf16 %v4567_v56, %v4566_v9  ;;  %v4631_v37 = vld [vmem:[%s9486_s0 + $0x2f0] sm:$0xff] }
 0x134   :  { %9560 = vst [vmem:[#allocation27_spill] sm:$0xff] %v7782_v40  ;;  %5843 = vrot.lane.b32.xlu1 %v7764_v43, %s6282_s9  ;;  %v4591_v9 = vld [vmem:[%s9486_s0 + $0x2a9] sm:$0xff] }
 0x135   :  { %5838 = vrot.lane.b32.xlu0 %v7591_v10, %s6281_s18  ;;  %v6220_v10 = vld [vmem:[%s9487_s1 + $0x1b8] sm:$0xff]  }
 0x136   :  { %v7803_v54 = vpop.permute.xlu1 %5563  ;;  %4958 = vmatpush3.bf16.msra.mxu1 %v6220_v10 }
 0x137   :  { %9561 = vst [vmem:[#allocation28_spill] sm:$0xff] %v7803_v54  ;;  %v7808_v32 = vpop.permute.xlu0 %5558 }
 0x138   :  { %9562 = vst [vmem:[#allocation29_spill] sm:$0xff] %v7808_v32  ;;  %5853 = vrot.lane.b32.xlu1 %v7605_v38, %s6282_s9 }
 0x139   :  { %5848 = vrot.lane.b32.xlu0 %v7442_v6, %s6282_s9  ;;  %v4630_v6 = vld [vmem:[%s9486_s0 + $0x2e8] sm:$0xff] }
 0x13a   :  { %v7822_v54 = vpop.permute.xlu1 %5573 }
 0x13b   :  { %9563 = vst [vmem:[#allocation30_spill] sm:$0xff] %v7822_v54  ;;  %v7824_v7 = vpop.permute.xlu0 %5568  ;;  %v7850_v54 = vpack.i.bf16 %v4631_v37, %v4630_v6  ;;  %v4639_v37 = vld [vmem:[%s9486_s0 + $0x2f1] sm:$0xff] }
 0x13c   :  { %9564 = vst [vmem:[#allocation31_spill] sm:$0xff] %v7824_v7  ;;  %5863 = vrot.lane.b32.xlu1 %v7812_v11, %s6280_s28  ;;  %v4590_v7 = vld [vmem:[%s9486_s0 + $0x2a1] sm:$0xff] }
 0x13d   :  { %5858 = vrot.lane.b32.xlu0 %v7764_v43, %s6280_s28  ;;  %v7854_v32 = vpack.i.bf16 %v4591_v9, %v4590_v7  ;;  %v4638_v7 = vld [vmem:[%s9486_s0 + $0x2e9] sm:$0xff] }
 0x13e   :  { %v7838_v10 = vpop.permute.xlu1 %5583 }
 0x13f   :  { %9565 = vst [vmem:[#allocation32_spill] sm:$0xff] %v7838_v10  ;;  %v7846_v56 = vpop.permute.xlu0 %5578  ;;  %9567 = vst [vmem:[#allocation34_spill] sm:$0xff] %v7854_v32  ;;  %v4574_v10 = vld [vmem:[%s9486_s0 + $0x28a] sm:$0xff] }
 0x140   :  { %9566 = vst [vmem:[#allocation33_spill] sm:$0xff] %v7846_v56  ;;  %5873 = vrot.lane.b32.xlu1 %v7828_v53, %s6281_s18  ;;  %v7868_v6 = vpack.i.bf16 %v4575_v63, %v4574_v10  ;;  %v4598_v63 = vld [vmem:[%s9486_s0 + $0x2a2] sm:$0xff]  ;;  %v4599_v10 = vld [vmem:[%s9486_s0 + $0x2aa] sm:$0xff] }
 0x141   :  { %5868 = vrot.lane.b32.xlu0 %v7555_v34, %s6280_s28  ;;  %v5887_v34 = vpack.i.bf16 %v7651_v24, %v7628_v4  ;;  %v7892_v4 = vpack.i.bf16 %v4639_v37, %v4638_v7  ;;  %v7895_v24 = vpack.i.bf16 %v4599_v10, %v4598_v63  ;;  %v5326_v37 = vunpack.i.h.bf16 %v7219_v59  ;;  %v4624_v10 = vld [vmem:[%s9486_s0 + $0x2ea] sm:$0xff] }
 0x142   :  { %v7862_v40 = vpop.permute.xlu1 %5593  ;;  %9570 = vst [vmem:[#allocation37_spill] sm:$0xff] %v7868_v6  ;;  %v5325_v63 = vunpack.i.l.bf16 %v7219_v59  ;;  %v4560_v59 = vld [vmem:[%s9486_s0 + $0x2a0] sm:$0xff] }
 0x143   :  { %9568 = vst [vmem:[#allocation35_spill] sm:$0xff] %v7862_v40  ;;  %v7864_v56 = vpop.permute.xlu0 %5588  ;;  %9573 = vst [vmem:[#allocation40_spill] sm:$0xff] %v7892_v4  ;;  %v7960_v57 = vpack.i.bf16 %v4561_v36, %v4560_v59  ;;  %v4235_v36 = vld [vmem:[%s9486_s0 + $0xc9] sm:$0xff] }
 0x144   :  { %9569 = vst [vmem:[#allocation36_spill] sm:$0xff] %v7864_v56  ;;  %5883 = vrot.lane.b32.xlu1 %v7850_v54, %s6281_s18  ;;  %v4607_v56 = vld [vmem:[%s9486_s0 + $0x2d8] sm:$0xff] }
 0x145   :  { %5878 = vrot.lane.b32.xlu0 %v7854_v32, %s6280_s28 }
 0x146   :  { %v7880_v9 = vpop.permute.xlu1 %5603 }
 0x147   :  { %9571 = vst [vmem:[#allocation38_spill] sm:$0xff] %v7880_v9  ;;  %v7888_v40 = vpop.permute.xlu0 %5598  ;;  %v4606_v9 = vld [vmem:[%s9486_s0 + $0x2d0] sm:$0xff] }
 0x148   :  { %9572 = vst [vmem:[#allocation39_spill] sm:$0xff] %v7888_v40  ;;  %5893 = vrot.lane.b32.xlu1 %v7868_v6, %s6282_s9  ;;  %v7909_v7 = vpack.i.bf16 %v4607_v56, %v4606_v9  ;;  %v4625_v56 = vld [vmem:[%s9486_s0 + $0x2f2] sm:$0xff] }
 0x149   :  { %5888 = vrot.lane.b32.xlu0 %v5887_v34, %s6281_s18  ;;  %v4232_v34 = vld [vmem:[%s9486_s0 + $0xa9] sm:$0xff]  ;;  %v4233_v9 = vld [vmem:[%s9486_s0 + $0xb1] sm:$0xff]  ;;  %v7947_v1 = vpack.i.bf16 %v4625_v56, %v4624_v10  ;;  %v4237_v56 = vld [vmem:[%s9486_s0 + $0xe1] sm:$0xff] }
 0x14a   :  { %v7903_v35 = vpop.permute.xlu1 %5613  ;;  %9576 = vst [vmem:[#allocation43_spill] sm:$0xff] %v7909_v7  ;;  %v795_v30 = vsel %vm145_vm0, %v4232_v34, %v5325_v63  ;;  %v5330_v63 = vunpack.i.l.bf16 %v7279_v61  ;;  %v800_v6 = vsel %vm145_vm0, %v4237_v56, %v5336_v39  ;;  %v4641_v56 = vld [vmem:[%s9486_s0 + $0x309] sm:$0xff] }
 0x14b   :  { %9574 = vst [vmem:[#allocation41_spill] sm:$0xff] %v7903_v35  ;;  %v7905_v40 = vpop.permute.xlu0 %5608  ;;  %v5321_v35 = vunpack.i.h.bf16 %v7234_v17  ;;  %9577 = vst [vmem:[#allocation44_spill] sm:$0xff] %v7947_v1  ;;  %v796_v17 = vsel %vm145_vm0, %v4233_v9, %v5326_v37  ;;  %v5345_v37 = vunpack.i.l.bf16 %v7303_v51  ;;  %v5346_v9 = vunpack.i.h.bf16 %v7303_v51 }
 0x14c   :  { %9575 = vst [vmem:[#allocation42_spill] sm:$0xff] %v7905_v40  ;;  %5903 = vrot.lane.b32.xlu1 %v7892_v4, %s6282_s9  ;;  %v5331_v4 = vunpack.i.h.bf16 %v7279_v61  ;;  %v5361_v61 = vunpack.i.h.bf16 %v7382_v48  ;;  %v5360_v51 = vunpack.i.l.bf16 %v7382_v48  ;;  %v4640_v48 = vld [vmem:[%s9486_s0 + $0x301] sm:$0xff] }
 0x14d   :  { %5898 = vrot.lane.b32.xlu0 %v7895_v24, %s6281_s18  ;;  %v794_v10 = vsel %vm145_vm0, %v4231_v22, %v5321_v35  ;;  %v4593_v35 = vld [vmem:[%s9486_s0 + $0x2c1] sm:$0xff]  ;;  %v793_v22 = vsel %vm145_vm0, %v4230_v3, %v5320_v16  ;;  %v5340_v3 = vunpack.i.l.bf16 %v7313_v2  ;;  %v5366_v16 = vunpack.i.h.bf16 %v7366_v27 }
 0x14e   :  { %v7928_v40 = vpop.permute.xlu1 %5623  ;;  %v799_v2 = vsel %vm145_vm0, %v4236_v41, %v5335_v14  ;;  %v4234_v27 = vld [vmem:[%s9486_s0 + $0xc1] sm:$0xff]  ;;  %v803_v14 = vsel %vm154_vm1, %v795_v30, %v5345_v37  ;;  %v804_v47 = vsel %vm154_vm1, %v796_v17, %v5346_v9 }
 0x14f   :  { %v7940_v12 = vpop.permute.xlu0 %5618  ;;  %v801_v30 = vsel %vm154_vm1, %v793_v22, %v5340_v3  ;;  %v8038_v37 = vsel %vm163_vm2, %v804_v47, %v5366_v16  ;;  %v4627_v47 = vld [vmem:[%s9486_s0 + $0x30a] sm:$0xff]  ;;  %v5375_v22 = vunpack.i.l.bf16 %v7392_v25  ;;  %v4562_v16 = vld [vmem:[%s9486_s0 + $0x2b8] sm:$0xff] }
 0x150   :  { %5913 = vrot.lane.b32.xlu1 %v7909_v7, %s6282_s9  ;;  %9581 = vst [vmem:[#allocation48_spill] sm:$0xff] %v8038_v37  ;;  %v797_v7 = vsel %vm145_vm0, %v4234_v27, %v5330_v63  ;;  %v8042_v49 = vsel %vm163_vm2, %v801_v30, %v5360_v51  ;;  %v5395_v51 = vunpack.i.l.bf16 %v7428_v58  ;;  %v5405_v37 = vunpack.i.l.bf16 %v7452_v0 }
 0x151   :  { %5908 = vrot.lane.b32.xlu0 %v7687_v60, %s6282_s9  ;;  %v4592_v60 = vld [vmem:[%s9486_s0 + $0x2b9] sm:$0xff]  ;;  %9582 = vst [vmem:[#allocation49_spill] sm:$0xff] %v8042_v49 }
 0x152   :  { %v7969_v34 = vpop.permute.xlu1 %5633 }
 0x153   :  { %9578 = vst [vmem:[#allocation45_spill] sm:$0xff] %v7969_v34  ;;  %v7986_v59 = vpop.permute.xlu0 %5628  ;;  %v7988_v34 = vpack.i.bf16 %v4633_v15, %v4632_v42  ;;  %v8001_v42 = vpack.i.bf16 %v4593_v35, %v4592_v60  ;;  %v798_v15 = vsel %vm145_vm0, %v4235_v36, %v5331_v4  ;;  %v5356_v60 = vunpack.i.h.bf16 %v7335_v26  ;;  %v4600_v36 = vld [vmem:[%s9486_s0 + $0x2ba] sm:$0xff] }
 0x154   :  { %9579 = vst [vmem:[#allocation46_spill] sm:$0xff] %v7986_v59  ;;  %5923 = vrot.lane.b32.xlu1 %v7947_v1, %s6280_s28  ;;  %v5355_v1 = vunpack.i.l.bf16 %v7335_v26  ;;  %v5351_v35 = vunpack.i.h.bf16 %v7347_v45  ;;  %v5350_v4 = vunpack.i.l.bf16 %v7347_v45  ;;  %v4601_v59 = vld [vmem:[%s9486_s0 + $0x2c2] sm:$0xff]  ;;  %v802_v26 = vsel %vm154_vm1, %v794_v10, %v5341_v52 }
 0x155   :  { %5918 = vrot.lane.b32.xlu0 %v7960_v57, %s6280_s28  ;;  %v8035_v45 = vsel %vm163_vm2, %v803_v14, %v5365_v33  ;;  %v8045_v17 = vsel %vm163_vm2, %v802_v26, %v5361_v61  ;;  %v8049_v52 = vpack.i.bf16 %v4641_v56, %v4640_v48  ;;  %v4626_v33 = vld [vmem:[%s9486_s0 + $0x302] sm:$0xff]  ;;  %v5376_v10 = vunpack.i.h.bf16 %v7392_v25 }
 0x156   :  { %v8009_v39 = vpop.permute.xlu1 %5643  ;;  %9580 = vst [vmem:[#allocation47_spill] sm:$0xff] %v8035_v45  ;;  %9583 = vst [vmem:[#allocation50_spill] sm:$0xff] %v8045_v17  ;;  %v8061_v9 = vpack.i.bf16 %v4601_v59, %v4600_v36  ;;  %v4563_v61 = vld [vmem:[%s9486_s0 + $0x2c0] sm:$0xff]  ;;  %v805_v25 = vsel %vm154_vm1, %v797_v7, %v5350_v4  ;;  %v806_v59 = vsel %vm154_vm1, %v798_v15, %v5351_v35  ;;  %v5370_v48 = vunpack.i.l.bf16 %v7399_v18  ;;  %v4263_v4 = vld [vmem:[%s9486_s0 + $0xca] sm:$0xff] }
 0x157   :  { %v8021_v41 = vpop.permute.xlu0 %5638  ;;  %v808_v27 = vsel %vm154_vm1, %v800_v6, %v5356_v60  ;;  %v8083_v56 = vpack.i.bf16 %v4627_v47, %v4626_v33  ;;  %v4264_v7 = vld [vmem:[%s9486_s0 + $0xda] sm:$0xff]  ;;  %v4265_v6 = vld [vmem:[%s9486_s0 + $0xe2] sm:$0xff]  ;;  %v5386_v15 = vunpack.i.h.bf16 %v7405_v23  ;;  %v5385_v14 = vunpack.i.l.bf16 %v7405_v23  ;;  %v4269_v36 = vld [vmem:[%s9486_s0 + $0x112] sm:$0xff] }
 0x158   :  { %5933 = vrot.lane.b32.xlu1 %v7854_v32, %s6281_s18  ;;  %v5381_v60 = vunpack.i.h.bf16 %v7413_v44  ;;  %v5380_v35 = vunpack.i.l.bf16 %v7413_v44  ;;  %v5396_v23 = vunpack.i.h.bf16 %v7428_v58  ;;  %v8109_v26 = vpack.i.bf16 %v4563_v61, %v4562_v16  ;;  %v4634_v44 = vld [vmem:[%s9486_s0 + $0x318] sm:$0xff]  ;;  %v4635_v61 = vld [vmem:[%s9486_s0 + $0x320] sm:$0xff] }
 0x159   :  { %5928 = vrot.lane.b32.xlu0 %v7605_v38, %s6280_s28  ;;  %v807_v38 = vsel %vm154_vm1, %v799_v2, %v5355_v1  ;;  %v5371_v2 = vunpack.i.h.bf16 %v7399_v18  ;;  %v4262_v18 = vld [vmem:[%s9486_s0 + $0xc2] sm:$0xff]  ;;  %v8118_v47 = vsel %vm163_vm2, %v808_v27, %v5376_v10  ;;  %v5391_v1 = vunpack.i.h.bf16 %v7436_v20  ;;  %v4595_v58 = vld [vmem:[%s9486_s0 + $0x2d9] sm:$0xff] }
 0x15a   :  { %v8059_v63 = vpop.permute.xlu1 %5653  ;;  %v8115_v33 = vsel %vm163_vm2, %v807_v38, %v5375_v22  ;;  %9587 = vst [vmem:[#allocation54_spill] sm:$0xff] %v8118_v47  ;;  %v5390_v45 = vunpack.i.l.bf16 %v7436_v20  ;;  %v4594_v22 = vld [vmem:[%s9486_s0 + $0x2d1] sm:$0xff]  ;;  %v4267_v38 = vld [vmem:[%s9486_s0 + $0xfa] sm:$0xff]  ;;  %v5406_v27 = vunpack.i.h.bf16 %v7452_v0  ;;  %v5400_v47 = vunpack.i.l.bf16 %v7459_v55 }
 0x15b   :  { %9584 = vst [vmem:[#allocation51_spill] sm:$0xff] %v8059_v63  ;;  %v8064_v3 = vpop.permute.xlu0 %5648  ;;  %9586 = vst [vmem:[#allocation53_spill] sm:$0xff] %v8115_v33  ;;  %v4268_v20 = vld [vmem:[%s9486_s0 + $0x10a] sm:$0xff]  ;;  %v4266_v10 = vld [vmem:[%s9486_s0 + $0xf2] sm:$0xff]  ;;  %v8149_v33 = vsel %vm163_vm2, %v805_v25, %v5370_v48  ;;  %v8152_v49 = vsel %vm163_vm2, %v806_v59, %v5371_v2  ;;  %v957_v17 = vsel %vm145_vm0, %v4265_v6, %v5386_v15 }
 0x15c   :  { %9585 = vst [vmem:[#allocation52_spill] sm:$0xff] %v8064_v3  ;;  %5943 = vrot.lane.b32.xlu1 %v7988_v34, %s6281_s18  ;;  %9588 = vst [vmem:[#allocation55_spill] sm:$0xff] %v8152_v49  ;;  %v956_v63 = vsel %vm145_vm0, %v4264_v7, %v5385_v14  ;;  %v955_v3 = vsel %vm145_vm0, %v4263_v4, %v5381_v60  ;;  %v954_v32 = vsel %vm145_vm0, %v4262_v18, %v5380_v35  ;;  %v6221_v2 = vld [vmem:[%s9487_s1 + $0x200] sm:$0xff]  }
 0x15d   :  { %5938 = vrot.lane.b32.xlu0 %v8001_v42, %s6280_s28  ;;  %v961_v0 = vsel %vm145_vm0, %v4269_v36, %v5396_v23  ;;  %v8164_v48 = vpack.i.bf16 %v4635_v61, %v4634_v44  ;;  %v8166_v59 = vpack.i.bf16 %v4595_v58, %v4594_v22  ;;  %v960_v7 = vsel %vm145_vm0, %v4268_v20, %v5395_v51  ;;  %v4642_v60 = vld [vmem:[%s9486_s0 + $0x319] sm:$0xff]  ;;  %v4643_v51 = vld [vmem:[%s9486_s0 + $0x321] sm:$0xff] }
 0x15e   :  { %v8107_v30 = vpop.permute.xlu1 %5663  ;;  %v959_v6 = vsel %vm145_vm0, %v4267_v38, %v5391_v1  ;;  %v5416_v14 = vunpack.i.h.bf16 %v7472_v5  ;;  %v5415_v18 = vunpack.i.l.bf16 %v7472_v5  ;;  %v965_v1 = vsel %vm154_vm1, %v957_v17, %v5406_v27  ;;  %5023 = vmatprep.subr.bf16.mxu0 %v6221_v2  ;;  %5055 = vmatprep.subr.bf16.mxu1 %v6221_v2  ;;  %v4391_v17 = vld [vmem:[%s9486_s0 + $0x1b8] sm:$0xff] }
 0x15f   :  { %v8124_v16 = vpop.permute.xlu0 %5658  ;;  %v5425_v5 = vunpack.i.l.bf16 %v7498_v21  ;;  %v5620_v35 = vunpack.i.l.bf16 %v7940_v12  ;;  %v5410_v4 = vunpack.i.l.bf16 %v7484_v46  ;;  %v5640_v36 = vunpack.i.l.bf16 %v8021_v41 }
 0x160   :  { %5953 = vrot.lane.b32.xlu1 %v7895_v24, %s6282_s9  ;;  %v5401_v24 = vunpack.i.h.bf16 %v7459_v55  ;;  %v964_v55 = vsel %vm154_vm1, %v956_v63, %v5405_v37  ;;  %v5426_v37 = vunpack.i.h.bf16 %v7498_v21  ;;  %v5621_v63 = vunpack.i.h.bf16 %v7940_v12 }
 0x161   :  { %5948 = vrot.lane.b32.xlu0 %v7764_v43, %s6281_s18  ;;  %v958_v43 = vsel %vm145_vm0, %v4266_v10, %v5390_v45  ;;  %v962_v45 = vsel %vm154_vm1, %v954_v32, %v5400_v47  ;;  %v4390_v32 = vld [vmem:[%s9486_s0 + $0x1b0] sm:$0xff]  ;;  %v5641_v21 = vunpack.i.h.bf16 %v8021_v41  ;;  %v5411_v44 = vunpack.i.h.bf16 %v7484_v46 }
 0x162   :  { %v8162_v25 = vpop.permute.xlu1 %5673  ;;  %v963_v12 = vsel %vm154_vm1, %v955_v3, %v5401_v24  ;;  %v5661_v47 = vunpack.i.h.bf16 %v8124_v16  ;;  %v5660_v61 = vunpack.i.l.bf16 %v8124_v16  ;;  %v8208_v58 = vpack.i.bf16 %v4643_v51, %v4642_v60 }
 0x163   :  { %v8174_v15 = vpop.permute.xlu0 %5668  ;;  %v5421_v20 = vunpack.i.h.bf16 %v7500_v62  ;;  %v5420_v10 = vunpack.i.l.bf16 %v7500_v62  ;;  %v8215_v41 = vsel %vm154_vm1, %v960_v7, %v5415_v18  ;;  %v8218_v3 = vsel %vm154_vm1, %v961_v0, %v5416_v14 }
 0x164   :  { %5963 = vrot.lane.b32.xlu1 %v8049_v52, %s6282_s9  ;;  %v1601_v46 = vsel %vm145_vm0, %v4391_v17, %v5621_v63  ;;  %v1600_v16 = vsel %vm145_vm0, %v4390_v32, %v5620_v35  ;;  %v8225_v38 = vsel %vm163_vm2, %v964_v55, %v5425_v5  ;;  %v8228_v62 = vsel %vm163_vm2, %v965_v1, %v5426_v37 }
 0x165   :  { %5958 = vrot.lane.b32.xlu0 %v8061_v9, %s6281_s18  ;;  %v1608_v24 = vsel %vm154_vm1, %v1600_v16, %v5640_v36  ;;  %v1609_v0 = vsel %vm154_vm1, %v1601_v46, %v5641_v21  ;;  %v8234_v2 = vsel %vm154_vm1, %v958_v43, %v5410_v4  ;;  %v8242_v60 = vsel %vm154_vm1, %v959_v6, %v5411_v44 }
 0x166   :  { %v5684_v23 = vpop.permute.xlu1 %5683  ;;  %v1616_v14 = vsel %vm163_vm2, %v1608_v24, %v5660_v61  ;;  %v1617_v18 = vsel %vm163_vm2, %v1609_v0, %v5661_v47  ;;  %v5676_v51 = vunpack.i.h.bf16 %v8162_v25  ;;  %v8248_v43 = vsel %vm163_vm2, %v962_v45, %v5420_v10  ;;  %v4454_v24 = vld [vmem:[%s9486_s0 + $0x1e2] sm:$0xff] }
 0x167   :  { %v5679_v22 = vpop.permute.xlu0 %5678  ;;  %v5685_v7 = vunpack.i.l.bf16 %v5684_v23  ;;  %v8251_v1 = vsel %vm163_vm2, %v963_v12, %v5421_v20  ;;  %v5435_v5 = vunpack.i.l.bf16 %v7516_v8  ;;  %v5431_v63 = vunpack.i.h.bf16 %v7523_v19  ;;  %v4455_v20 = vld [vmem:[%s9486_s0 + $0x1ea] sm:$0xff] }
 0x168   :  { %5973 = vrot.lane.b32.xlu1 %v7850_v54, %s6282_s9  ;;  %v5675_v54 = vunpack.i.l.bf16 %v8162_v25  ;;  %v4423_v25 = vld [vmem:[%s9486_s0 + $0x1d1] sm:$0xff]  ;;  %v5686_v6 = vunpack.i.h.bf16 %v5684_v23  ;;  %v5681_v35 = vunpack.i.h.bf16 %v5679_v22  ;;  %v5430_v45 = vunpack.i.l.bf16 %v7523_v19 }
 0x169   :  { %5968 = vrot.lane.b32.xlu0 %v7828_v53, %s6282_s9  ;;  %v4422_v53 = vld [vmem:[%s9486_s0 + $0x1c9] sm:$0xff]  ;;  %v5680_v32 = vunpack.i.l.bf16 %v5679_v22  ;;  %v1624_v21 = vpack.c.bf16 %v1617_v18, %v1616_v14  ;;  %v5671_v36 = vunpack.i.h.bf16 %v8174_v15  ;;  %v1762_v23 = vsel %vm145_vm0, %v4423_v25, %v5676_v51 }
 0x16a   :  { %v5694_v27 = vpop.permute.xlu1 %5693  ;;  %v1761_v4 = vsel %vm145_vm0, %v4422_v53, %v5675_v54  ;;  %v1770_v22 = vsel %vm154_vm1, %v1762_v23, %v5686_v6  ;;  %v2085_v16 = vsel %vm145_vm0, %v7514_v28, %v5681_v35 }
 0x16b   :  { %v5689_v55 = vpop.permute.xlu0 %5688  ;;  %v1769_v12 = vsel %vm154_vm1, %v1761_v4, %v5685_v7  ;;  %v5695_v44 = vunpack.i.l.bf16 %v5694_v27  ;;  %v5696_v54 = vunpack.i.h.bf16 %v5694_v27  ;;  %v2084_v53 = vsel %vm145_vm0, %v7509_v50, %v5680_v32 }
 0x16c   :  { %5983 = vrot.lane.b32.xlu1 %v8083_v56, %s6280_s28  ;;  %v5691_v47 = vunpack.i.h.bf16 %v5689_v55  ;;  %v5690_v10 = vunpack.i.l.bf16 %v5689_v55  ;;  %v1777_v14 = vsel %vm163_vm2, %v1769_v12, %v5671_v36  ;;  %v5436_v32 = vunpack.i.h.bf16 %v7516_v8 }
 0x16d   :  { %5978 = vrot.lane.b32.xlu0 %v8109_v26, %s6280_s28  ;;  %v2092_v28 = vsel %vm154_vm1, %v2084_v53, %v5695_v44  ;;  %v4628_v44 = vld [vmem:[%s9486_s0 + $0x31a] sm:$0xff]  ;;  %v5446_v53 = vunpack.i.h.bf16 %v7540_v29  ;;  %v5445_v8 = vunpack.i.l.bf16 %v7540_v29 }
 0x16e   :  { %v5704_v17 = vpop.permute.xlu1 %5703  ;;  %v1923_v27 = vsel %vm145_vm0, %v4455_v20, %v5691_v47  ;;  %v4629_v47 = vld [vmem:[%s9486_s0 + $0x322] sm:$0xff] }
 0x16f   :  { %v5699_v61 = vpop.permute.xlu0 %5698  ;;  %v5706_v19 = vunpack.i.h.bf16 %v5704_v17  ;;  %v5705_v0 = vunpack.i.l.bf16 %v5704_v17  ;;  %v2093_v17 = vsel %vm154_vm1, %v2085_v16, %v5696_v54 }
 0x170   :  { %v5700_v46 = vunpack.i.l.bf16 %v5699_v61  ;;  %5993 = vrot.lane.b32.xlu1 %v8001_v42, %s6281_s18  ;;  %v5701_v7 = vunpack.i.h.bf16 %v5699_v61 }
 0x171   :  { %5988 = vrot.lane.b32.xlu0 %v7747_v31, %s6280_s28  ;;  %v1922_v31 = vsel %vm145_vm0, %v4454_v24, %v5690_v10  ;;  %v1931_v35 = vsel %vm154_vm1, %v1923_v27, %v5706_v19  ;;  %v8312_v19 = vsel %vm163_vm2, %v8234_v2, %v5430_v45  ;;  %v5625_v24 = vunpack.i.l.bf16 %v7928_v40  ;;  %v4458_v2 = vld [vmem:[%s9486_s0 + $0x212] sm:$0xff] }
 0x172   :  { %v8282_v55 = vpop.permute.xlu1 %5713  ;;  %v1778_v18 = vsel %vm163_vm2, %v1770_v22, %v5700_v46  ;;  %v1930_v36 = vsel %vm154_vm1, %v1922_v31, %v5705_v0  ;;  %v2100_v23 = vsel %vm163_vm2, %v2092_v28, %v5701_v7  ;;  %v5626_v46 = vunpack.i.h.bf16 %v7928_v40  ;;  %v6241_v28 = vld [vmem:[%s9486_s0 + $0x1d0] sm:$0xff]  ;;  %v6242_v31 = vld [vmem:[%s9486_s0 + $0x1c8] sm:$0xff] }
 0x173   :  { %v5715_v51 = vunpack.i.l.bf16 %v8282_v55  ;;  %v5709_v25 = vpop.permute.xlu0 %5708  ;;  %v1785_v6 = vpack.c.bf16 %v1778_v18, %v1777_v14  ;;  %v8322_v0 = vpack.i.bf16 %v4629_v47, %v4628_v44  ;;  %v8330_v45 = vsel %vm163_vm2, %v8215_v41, %v5435_v5  ;;  %v4424_v5 = vld [vmem:[%s9486_s0 + $0x1e1] sm:$0xff] }
 0x174   :  { %v5711_v50 = vunpack.i.h.bf16 %v5709_v25  ;;  %v5710_v4 = vunpack.i.l.bf16 %v5709_v25  ;;  %6003 = vrot.lane.b32.xlu1 %v8164_v48, %s6281_s18  ;;  %9589 = vst [vmem:[#allocation56_spill] sm:$0xff] %v8330_v45  ;;  %v5646_v7 = vunpack.i.h.bf16 %v8009_v39  ;;  %v5665_v41 = vunpack.i.l.bf16 %v8107_v30 }
 0x175   :  { %5998 = vrot.lane.b32.xlu0 %v8166_v59, %s6280_s28  ;;  %3641 = vmatprep.mubr.bf16.mxu0 %v1785_v6  ;;  %v1939_v12 = vsel %vm163_vm2, %v1931_v35, %v5715_v51  ;;  %v1602_v35 = vsel %vm145_vm0, %v6242_v31, %v5625_v24 }
 0x176   :  { %3642 = vmatmul.mubr.bf16.gmra.mrb[16].mxu0 %v1624_v21  ;;  %v8305_v61 = vpop.permute.xlu1 %5723  ;;  %v2101_v20 = vsel %vm163_vm2, %v2093_v17, %v5710_v4  ;;  %v1938_v10 = vsel %vm163_vm2, %v1930_v36, %v5711_v50  ;;  %v8317_v21 = vsel %vm163_vm2, %v8242_v60, %v5431_v63  ;;  %v5645_v60 = vunpack.i.l.bf16 %v8009_v39  ;;  %v4425_v4 = vld [vmem:[%s9486_s0 + $0x1e9] sm:$0xff] }
 0x177   :  { %v5719_v22 = vpop.permute.xlu0 %5718  ;;  %v2108_v16 = vpack.c.bf16 %v2101_v20, %v2100_v23  ;;  %v1946_v54 = vpack.c.bf16 %v1939_v12, %v1938_v10  ;;  %v1603_v39 = vsel %vm145_vm0, %v6241_v28, %v5626_v46  ;;  %v5666_v50 = vunpack.i.h.bf16 %v8107_v30  ;;  %v4488_v20 = vld [vmem:[%s9486_s0 + $0x240] sm:$0xff] }
 0x178   :  { %6013 = vrot.lane.b32.xlu1 %v8061_v9, %s6282_s9  ;;  %v5720_v63 = vunpack.i.l.bf16 %v5719_v22  ;;  %v8338_v9 = vsel %vm163_vm2, %v8218_v3, %v5436_v32  ;;  %v5441_v3 = vunpack.i.h.bf16 %v7548_v13  ;;  %v5721_v27 = vunpack.i.h.bf16 %v5719_v22 }
 0x179   :  { %6008 = vrot.lane.b32.xlu0 %v7960_v57, %s6281_s18  ;;  %v4767_v40 = vpop.f32.mrb[0].mxu0  ;;  %3738 = vmatprep.mubr.bf16.mxu1 %v2108_v16  ;;  %9590 = vst [vmem:[#allocation57_spill] sm:$0xff] %v8338_v9  ;;  %v5725_v12 = vunpack.i.l.bf16 %v8305_v61  ;;  %v1610_v30 = vsel %vm154_vm1, %v1602_v35, %v5645_v60  ;;  %v5440_v23 = vunpack.i.l.bf16 %v7548_v13  ;;  %v1611_v22 = vsel %vm154_vm1, %v1603_v39, %v5646_v7  ;;  %v9595_v13 = vld [vmem:[#allocation37_spill] sm:$0xff] }
 0x17a   :  { %v4768_v14 = vpop.f32.mrb[1].mxu0  ;;  %3739 = vmatmul.mubr.bf16.gmra.mrb[16].mxu1 %v1946_v54  ;;  %v8346_v18 = vpop.permute.xlu1 %5733  ;;  %v1763_v44 = vsel %vm145_vm0, %v4424_v5, %v5720_v63  ;;  %v1618_v16 = vsel %vm163_vm2, %v1610_v30, %v5665_v41  ;;  %v5716_v54 = vunpack.i.h.bf16 %v8282_v55  ;;  %v5726_v24 = vunpack.i.h.bf16 %v8305_v61  ;;  %v9591_v55 = vld [vmem:[#allocation34_spill] sm:$0xff] }
 0x17b   :  { %v8355_v51 = vadd.f32 %v4768_v14, %v4767_v40  ;;  %v5729_v25 = vpop.permute.xlu0 %5728  ;;  %v4770_v6 = vpop.f32.mrb[2].mxu0  ;;  %v1764_v63 = vsel %vm145_vm0, %v4425_v4, %v5721_v27  ;;  %v2086_v7 = vsel %vm145_vm0, %v4488_v20, %v5725_v12  ;;  %v5735_v35 = vunpack.i.l.bf16 %v8346_v18  ;;  %v4297_v12 = vld [vmem:[%s9486_s0 + $0x110] sm:$0xff]  ;;  %v4456_v20 = vld [vmem:[%s9486_s0 + $0x1fa] sm:$0xff] }
 0x17c   :  { %v5731_v32 = vunpack.i.h.bf16 %v5729_v25  ;;  %v5730_v17 = vunpack.i.l.bf16 %v5729_v25  ;;  %v4771_v36 = vpop.f32.mrb[3].mxu0  ;;  %6023 = vrot.lane.b32.xlu1 %v8208_v58, %s6282_s9  ;;  %v1619_v25 = vsel %vm163_vm2, %v1611_v22, %v5666_v50 }
 0x17d   :  { %v8369_v47 = vadd.f32 %v4771_v36, %v4770_v6  ;;  %6018 = vrot.lane.b32.xlu0 %v7812_v11, %s6281_s18  ;;  %v9592_v6 = vld [vmem:[#allocation6_spill] sm:$0xff]  ;;  %v4296_v36 = vld [vmem:[%s9486_s0 + $0x108] sm:$0xff] }
 0x17e   :  { %v1771_v10 = vsel %vm154_vm1, %v1763_v44, %v5730_v17  ;;  %v5744_v46 = vpop.permute.xlu1 %5743  ;;  %v1772_v5 = vsel %vm154_vm1, %v1764_v63, %v5731_v32  ;;  %v5456_v31 = vunpack.i.h.bf16 %v9592_v6  ;;  %v6243_v44 = vld [vmem:[%s9486_s0 + $0x248] sm:$0xff]  ;;  %v1625_v63 = vpack.c.bf16 %v1619_v25, %v1618_v16  ;;  %v4636_v16 = vld [vmem:[%s9486_s0 + $0x330] sm:$0xff]  ;;  %v4637_v25 = vld [vmem:[%s9486_s0 + $0x338] sm:$0xff] }
 0x17f   :  { %v5745_v60 = vunpack.i.l.bf16 %v5744_v46  ;;  %v5739_v40 = vpop.permute.xlu0 %5738  ;;  %v5746_v41 = vunpack.i.h.bf16 %v5744_v46  ;;  %v1779_v39 = vsel %vm163_vm2, %v1771_v10, %v5716_v54  ;;  %v2087_v30 = vsel %vm145_vm0, %v6243_v44, %v5726_v24  ;;  %v4301_v44 = vld [vmem:[%s9486_s0 + $0x140] sm:$0xff] }
 0x180   :  { %v5741_v14 = vunpack.i.h.bf16 %v5739_v40  ;;  %v5740_v28 = vunpack.i.l.bf16 %v5739_v40  ;;  %6033 = vrot.lane.b32.xlu1 %v7988_v34, %s6282_s9  ;;  %v5455_v40 = vunpack.i.l.bf16 %v9592_v6  ;;  %v1119_v6 = vsel %vm145_vm0, %v4297_v12, %v5446_v53 }
 0x181   :  { %6028 = vrot.lane.b32.xlu0 %v9591_v55, %s6282_s9  ;;  %v4773_v61 = vpop.f32.mrb[4].mxu0  ;;  %v1780_v27 = vsel %vm163_vm2, %v1772_v5, %v5745_v60  ;;  %v4295_v60 = vld [vmem:[%s9486_s0 + $0xf8] sm:$0xff]  ;;  %v5736_v5 = vunpack.i.h.bf16 %v8346_v18  ;;  %v4457_v18 = vld [vmem:[%s9486_s0 + $0x202] sm:$0xff]  ;;  %v1118_v53 = vsel %vm145_vm0, %v4296_v36, %v5445_v8 }
 0x182   :  { %v2094_v4 = vsel %vm154_vm1, %v2086_v7, %v5740_v28  ;;  %v4774_v32 = vpop.f32.mrb[5].mxu0  ;;  %v5754_v17 = vpop.permute.xlu1 %5753  ;;  %v1786_v50 = vpack.c.bf16 %v1780_v27, %v1779_v39  ;;  %v2095_v24 = vsel %vm154_vm1, %v2087_v30, %v5741_v14  ;;  %v8455_v12 = vsel %vm145_vm0, %v4295_v60, %v5441_v3  ;;  %v4298_v60 = vld [vmem:[%s9486_s0 + $0x120] sm:$0xff] }
 0x183   :  { %v8409_v10 = vadd.f32 %v4774_v32, %v4773_v61  ;;  %v5755_v46 = vunpack.i.l.bf16 %v5754_v17  ;;  %v5749_v22 = vpop.permute.xlu0 %5748  ;;  %v4776_v54 = vpop.f32.mrb[6].mxu0  ;;  %v9593_v61 = vld [vmem:[#allocation43_spill] sm:$0xff]  ;;  %v2102_v39 = vsel %vm163_vm2, %v2094_v4, %v5746_v41  ;;  %v4294_v32 = vld [vmem:[%s9486_s0 + $0xf0] sm:$0xff]  ;;  %v1924_v41 = vsel %vm145_vm0, %v4456_v20, %v5735_v35 }
 0x184   :  { %v5750_v28 = vunpack.i.l.bf16 %v5749_v22  ;;  %v4777_v7 = vpop.f32.mrb[7].mxu0  ;;  %6043 = vrot.lane.b32.xlu1 %v8322_v0, %s6280_s28  ;;  %3649 = vmatprep.mubr.bf16.mxu0 %v1786_v50  ;;  %v5751_v55 = vunpack.i.h.bf16 %v5749_v22  ;;  %v4300_v50 = vld [vmem:[%s9486_s0 + $0x138] sm:$0xff]  ;;  %v5756_v4 = vunpack.i.h.bf16 %v5754_v17  ;;  %v9594_v35 = vld [vmem:[#allocation7_spill] sm:$0xff]  ;;  %v1116_v8 = vsel %vm145_vm0, %v4294_v32, %v5440_v23 }
 0x185   :  { %v8428_v14 = vadd.f32 %v4777_v7, %v4776_v54  ;;  %6038 = vrot.lane.b32.xlu0 %v9593_v61, %s6280_s28  ;;  %3650 = vmatmul.mubr.bf16.gmra.mrb[20].mxu0 %v1625_v63  ;;  %v2103_v27 = vsel %vm163_vm2, %v2095_v24, %v5755_v46  ;;  %v8460_v63 = vpack.i.bf16 %v4637_v25, %v4636_v16  ;;  %v5451_v17 = vunpack.i.h.bf16 %v9594_v35  ;;  %v9597_v61 = vld [vmem:[#allocation9_spill] sm:$0xff] }
 0x186   :  { %v8447_v30 = vpop.permute.xlu1 %5763  ;;  %v2109_v46 = vpack.c.bf16 %v2103_v27, %v2102_v39  ;;  %v1932_v22 = vsel %vm154_vm1, %v1924_v41, %v5750_v28  ;;  %v5450_v20 = vunpack.i.l.bf16 %v9594_v35  ;;  %v1925_v24 = vsel %vm145_vm0, %v4457_v18, %v5736_v5  ;;  %v4299_v5 = vld [vmem:[%s9486_s0 + $0x128] sm:$0xff]  ;;  %v9596_v28 = vld [vmem:[#allocation8_spill] sm:$0xff]  ;;  %v9598_v27 = vld [vmem:[#allocation46_spill] sm:$0xff] }
 0x187   :  { %v8458_v54 = vpop.permute.xlu0 %5758  ;;  %v8472_v3 = vsel %vm145_vm0, %v4301_v44, %v5456_v31  ;;  %v8475_v36 = vsel %vm145_vm0, %v4300_v50, %v5455_v40  ;;  %v5466_v31 = vunpack.i.h.bf16 %v9596_v28  ;;  %v5465_v7 = vunpack.i.l.bf16 %v9596_v28  ;;  %v4426_v28 = vld [vmem:[%s9486_s0 + $0x1f9] sm:$0xff] }
 0x188   :  { %v5760_v29 = vunpack.i.l.bf16 %v8458_v54  ;;  %6053 = vrot.lane.b32.xlu1 %v8166_v59, %s6281_s18  ;;  %3746 = vmatprep.mubr.bf16.mxu1 %v2109_v46  ;;  %v1933_v59 = vsel %vm154_vm1, %v1925_v24, %v5751_v55  ;;  %v1940_v25 = vsel %vm163_vm2, %v1932_v22, %v5756_v4  ;;  %v5460_v39 = vunpack.i.l.bf16 %v9597_v61  ;;  %v9599_v22 = vld [vmem:[#allocation52_spill] sm:$0xff] }
 0x189   :  { %6048 = vrot.lane.b32.xlu0 %v9595_v13, %s6280_s28  ;;  %v4779_v23 = vpop.f32.mrb[8].mxu0  ;;  %v5630_v32 = vunpack.i.l.bf16 %v9598_v27  ;;  %v8497_v46 = vsel %vm145_vm0, %v4299_v5, %v5451_v17  ;;  %v8500_v35 = vsel %vm145_vm0, %v4298_v60, %v5450_v20  ;;  %v5631_v4 = vunpack.i.h.bf16 %v9598_v27  ;;  %v4645_v17 = vld [vmem:[%s9486_s0 + $0x339] sm:$0xff] }
 0x18a   :  { %v4780_v40 = vpop.f32.mrb[9].mxu0  ;;  %v5774_v16 = vpop.permute.xlu1 %5773  ;;  %v1941_v18 = vsel %vm163_vm2, %v1933_v59, %v5760_v29  ;;  %v5650_v24 = vunpack.i.l.bf16 %v9599_v22  ;;  %v4644_v59 = vld [vmem:[%s9486_s0 + $0x331] sm:$0xff]  ;;  %v5651_v20 = vunpack.i.h.bf16 %v9599_v22  ;;  %v5765_v60 = vunpack.i.l.bf16 %v8447_v30 }
 0x18b   :  { %v8492_v50 = vadd.f32 %v4780_v40, %v4779_v23  ;;  %v8494_v55 = vpop.permute.xlu0 %5768  ;;  %v4782_v44 = vpop.f32.mrb[10].mxu0  ;;  %v1947_v41 = vpack.c.bf16 %v1941_v18, %v1940_v25  ;;  %v9600_v23 = vld [vmem:[#allocation40_spill] sm:$0xff]  ;;  %v5766_v40 = vunpack.i.h.bf16 %v8447_v30  ;;  %v5775_v25 = vunpack.i.l.bf16 %v5774_v16  ;;  %v4427_v30 = vld [vmem:[%s9486_s0 + $0x201] sm:$0xff] }
 0x18c   :  { %v4783_v29 = vpop.f32.mrb[11].mxu0  ;;  %6063 = vrot.lane.b32.xlu1 %v8460_v63, %s6281_s18  ;;  %v8526_v27 = vsel %vm154_vm1, %v1118_v53, %v5465_v7  ;;  %v8529_v22 = vsel %vm154_vm1, %v1119_v6, %v5466_v31  ;;  %v8541_v53 = vpack.i.bf16 %v4645_v17, %v4644_v59  ;;  %v9601_v7 = vld [vmem:[#allocation17_spill] sm:$0xff]  ;;  %v1765_v59 = vsel %vm145_vm0, %v4426_v28, %v5765_v60  ;;  %v4491_v17 = vld [vmem:[%s9486_s0 + $0x260] sm:$0xff] }
 0x18d   :  { %v8515_v13 = vadd.f32 %v4783_v29, %v4782_v44  ;;  %6058 = vrot.lane.b32.xlu0 %v9600_v23, %s6280_s28  ;;  %3747 = vmatmul.mubr.bf16.gmra.mrb[20].mxu1 %v1947_v41  ;;  %v8532_v44 = vsel %vm154_vm1, %v1116_v8, %v5460_v39  ;;  %v6244_v29 = vld [vmem:[%s9486_s0 + $0x1e0] sm:$0xff]  ;;  %v5776_v41 = vunpack.i.h.bf16 %v5774_v16  ;;  %v6245_v8 = vld [vmem:[%s9486_s0 + $0x1e8] sm:$0xff]  ;;  %v5771_v39 = vunpack.i.h.bf16 %v8494_v55 }
 0x18e   :  { %v8523_v18 = vpop.permute.xlu1 %5783  ;;  %v1604_v23 = vsel %vm145_vm0, %v6244_v29, %v5630_v32  ;;  %v1605_v31 = vsel %vm145_vm0, %v6245_v8, %v5631_v4  ;;  %v5670_v16 = vunpack.i.l.bf16 %v8174_v15  ;;  %v5770_v29 = vunpack.i.l.bf16 %v8494_v55  ;;  %v4490_v15 = vld [vmem:[%s9486_s0 + $0x258] sm:$0xff] }
 0x18f   :  { %v5779_v57 = vpop.permute.xlu0 %5778  ;;  %v1612_v32 = vsel %vm154_vm1, %v1604_v23, %v5650_v24  ;;  %v1613_v8 = vsel %vm154_vm1, %v1605_v31, %v5651_v20  ;;  %v1773_v24 = vsel %vm154_vm1, %v1765_v59, %v5775_v25  ;;  %v5785_v60 = vunpack.i.l.bf16 %v8523_v18  ;;  %v4459_v20 = vld [vmem:[%s9486_s0 + $0x21a] sm:$0xff] }
 0x190   :  { %6073 = vrot.lane.b32.xlu1 %v7812_v11, %s6282_s9  ;;  %v1766_v11 = vsel %vm145_vm0, %v4427_v30, %v5766_v40  ;;  %v5781_v28 = vunpack.i.h.bf16 %v5779_v57  ;;  %v5761_v55 = vunpack.i.h.bf16 %v8458_v54  ;;  %v5780_v40 = vunpack.i.l.bf16 %v5779_v57 }
 0x191   :  { %6068 = vrot.lane.b32.xlu0 %v8109_v26, %s6281_s18  ;;  %v4785_v4 = vpop.f32.mrb[12].mxu0  ;;  %v1774_v26 = vsel %vm154_vm1, %v1766_v11, %v5776_v41  ;;  %v2089_v59 = vsel %vm145_vm0, %v4491_v17, %v5771_v39  ;;  %v2088_v41 = vsel %vm145_vm0, %v4490_v15, %v5770_v29  ;;  %v5786_v57 = vunpack.i.h.bf16 %v8523_v18  ;;  %v9604_v11 = vld [vmem:[#allocation44_spill] sm:$0xff] }
 0x192   :  { %v4786_v23 = vpop.f32.mrb[13].mxu0  ;;  %v5794_v37 = vpop.permute.xlu1 %5793  ;;  %v1781_v39 = vsel %vm163_vm2, %v1773_v24, %v5761_v55  ;;  %v2096_v17 = vsel %vm154_vm1, %v2088_v41, %v5785_v60  ;;  %v1926_v49 = vsel %vm145_vm0, %v4458_v2, %v5780_v40  ;;  %v5500_v60 = vunpack.i.l.bf16 %v9601_v7  ;;  %v9605_v40 = vld [vmem:[#allocation21_spill] sm:$0xff]  ;;  %v9607_v41 = vld [vmem:[#allocation10_spill] sm:$0xff] }
 0x193   :  { %v8572_v30 = vadd.f32 %v4786_v23, %v4785_v4  ;;  %v5789_v25 = vpop.permute.xlu0 %5788  ;;  %v4788_v31 = vpop.f32.mrb[14].mxu0  ;;  %v5796_v6 = vunpack.i.h.bf16 %v5794_v37  ;;  %v5795_v5 = vunpack.i.l.bf16 %v5794_v37  ;;  %v1927_v37 = vsel %vm145_vm0, %v4459_v20, %v5781_v28  ;;  %v4326_v20 = vld [vmem:[%s9486_s0 + $0x121] sm:$0xff] }
 0x194   :  { %v5790_v54 = vunpack.i.l.bf16 %v5789_v25  ;;  %v4789_v9 = vpop.f32.mrb[15].mxu0  ;;  %6083 = vrot.lane.b32.xlu1 %v8541_v53, %s6282_s9  ;;  %v5791_v23 = vunpack.i.h.bf16 %v5789_v25  ;;  %v2097_v28 = vsel %vm154_vm1, %v2089_v59, %v5786_v57 }
 0x195   :  { %9602 = vst [vmem:[#allocation34_spill] sm:$0xff] %v8572_v30  ;;  %v8582_v4 = vadd.f32 %v4789_v9, %v4788_v31  ;;  %6078 = vrot.lane.b32.xlu0 %v9604_v11, %s6281_s18  ;;  %v1934_v31 = vsel %vm154_vm1, %v1926_v49, %v5795_v5  ;;  %v1935_v11 = vsel %vm154_vm1, %v1927_v37, %v5796_v6 }
 0x196   :  { %v5804_v30 = vpop.permute.xlu1 %5803  ;;  %v1782_v45 = vsel %vm163_vm2, %v1774_v26, %v5790_v54  ;;  %v1620_v5 = vsel %vm163_vm2, %v1612_v32, %v5670_v16  ;;  %v2104_v55 = vsel %vm163_vm2, %v2096_v17, %v5791_v23  ;;  %v9606_v16 = vunpack.i.h.bf16 %v9597_v61  ;;  %v8628_v17 = vld [vmem:[%s9486_s0 + $0x348] sm:$0xff]  ;;  %v8633_v61 = vld [vmem:[%s9486_s0 + $0x350] sm:$0xff] }
 0x197   :  { %9603 = vst [vmem:[#allocation6_spill] sm:$0xff] %v8582_v4  ;;  %v5806_v29 = vunpack.i.h.bf16 %v5804_v30  ;;  %v5805_v15 = vunpack.i.l.bf16 %v5804_v30  ;;  %v5799_v18 = vpop.permute.xlu0 %5798  ;;  %v1787_v9 = vpack.c.bf16 %v1782_v45, %v1781_v39  ;;  %v5520_v30 = vunpack.i.l.bf16 %v9605_v40 }
 0x198   :  { %v5801_v4 = vunpack.i.h.bf16 %v5799_v18  ;;  %v5800_v24 = vunpack.i.l.bf16 %v5799_v18  ;;  %6093 = vrot.lane.b32.xlu1 %v8164_v48, %s6282_s9  ;;  %v5521_v39 = vunpack.i.h.bf16 %v9605_v40  ;;  %v6132_v40 = vpack.i.bf16 %v8633_v61, %v8628_v17  ;;  %v9613_v17 = vld [vmem:[#allocation51_spill] sm:$0xff] }
 0x199   :  { %6088 = vrot.lane.b32.xlu0 %v8001_v42, %s6282_s9  ;;  %3657 = vmatprep.mubr.bf16.mxu0 %v1787_v9  ;;  %v1942_v2 = vsel %vm163_vm2, %v1934_v31, %v5805_v15  ;;  %v1943_v45 = vsel %vm163_vm2, %v1935_v11, %v5806_v29  ;;  %v4327_v42 = vld [vmem:[%s9486_s0 + $0x129] sm:$0xff]  ;;  %v9609_v29 = vld [vmem:[#allocation25_spill] sm:$0xff] }
 0x19a   :  { %v8601_v49 = vpop.permute.xlu1 %5813  ;;  %v1621_v6 = vsel %vm163_vm2, %v1613_v8, %v5801_v4  ;;  %v2105_v26 = vsel %vm163_vm2, %v2097_v28, %v5800_v24  ;;  %v1948_v32 = vpack.c.bf16 %v1943_v45, %v1942_v2  ;;  %v8618_v8 = vsel %vm154_vm1, %v8455_v12, %v9606_v16  ;;  %v9608_v12 = vld [vmem:[#allocation13_spill] sm:$0xff]  ;;  %v8654_v31 = vld [vmem:[%s9486_s0 + $0x34a] sm:$0xff] }
 0x19b   :  { %v5809_v25 = vpop.permute.xlu0 %5808  ;;  %v1626_v59 = vpack.c.bf16 %v1621_v6, %v1620_v5  ;;  %v2110_v54 = vpack.c.bf16 %v2105_v26, %v2104_v55  ;;  %v5480_v23 = vunpack.i.l.bf16 %v9608_v12  ;;  %v5541_v15 = vunpack.i.h.bf16 %v9609_v29  ;;  %v8649_v9 = vld [vmem:[%s9486_s0 + $0x351] sm:$0xff]  ;;  %v4429_v16 = vld [vmem:[%s9486_s0 + $0x219] sm:$0xff] }
 0x19c   :  { %6103 = vrot.lane.b32.xlu1 %v8164_v48, %s6280_s28  ;;  %v5540_v18 = vunpack.i.l.bf16 %v9609_v29  ;;  %v8644_v48 = vld [vmem:[%s9486_s0 + $0x349] sm:$0xff]  ;;  %v1277_v2 = vsel %vm145_vm0, %v4326_v20, %v5500_v60  ;;  %v9612_v45 = vld [vmem:[#allocation45_spill] sm:$0xff]  ;;  %v5811_v60 = vunpack.i.h.bf16 %v5809_v25  ;;  %v5810_v20 = vunpack.i.l.bf16 %v5809_v25 }
 0x19d   :  { %6098 = vrot.lane.b32.xlu0 %v7988_v34, %s6280_s28  ;;  %3658 = vmatmul.mubr.bf16.gmra.mrb[24].mxu0 %v1626_v59  ;;  %v9610_v11 = vld [vmem:[#allocation16_spill] sm:$0xff]  ;;  %v9611_v34 = vunpack.i.h.bf16 %v9601_v7  ;;  %v5636_v5 = vunpack.i.h.bf16 %v9612_v45  ;;  %v8677_v7 = vld [vmem:[%s9486_s0 + $0x33a] sm:$0xff]  ;;  %v1285_v59 = vsel %vm154_vm1, %v1277_v2, %v5520_v30  ;;  %v6142_v25 = vpack.i.bf16 %v8649_v9, %v8644_v48 }
 0x19e   :  { %3754 = vmatprep.mubr.bf16.mxu1 %v2110_v54  ;;  %v8662_v6 = vpop.permute.xlu1 %5823  ;;  %v8667_v55 = vld [vmem:[%s9486_s0 + $0x352] sm:$0xff]  ;;  %v8700_v61 = vsel %vm163_vm2, %v1285_v59, %v5540_v18 }
 0x19f   :  { %v1278_v28 = vsel %vm145_vm0, %v4327_v42, %v9611_v34  ;;  %v8672_v26 = vld [vmem:[%s9486_s0 + $0x332] sm:$0xff]  ;;  %3755 = vmatmul.mubr.bf16.gmra.mrb[24].mxu1 %v1948_v32  ;;  %v5819_v42 = vpop.permute.xlu0 %5818  ;;  %v6152_v30 = vpack.i.bf16 %v8667_v55, %v8654_v31  ;;  %v9618_v31 = vunpack.i.l.bf16 %v9607_v41 }
 0x1a0   :  { %v4428_v54 = vld [vmem:[%s9486_s0 + $0x211] sm:$0xff]  ;;  %v5821_v29 = vunpack.i.h.bf16 %v5819_v42  ;;  %v5820_v34 = vunpack.i.l.bf16 %v5819_v42  ;;  %6113 = vrot.lane.b32.xlu1 %v8208_v58, %s6281_s18  ;;  %v1286_v32 = vsel %vm154_vm1, %v1278_v28, %v5521_v39  ;;  %v6246_v58 = vld [vmem:[%s9486_s0 + $0x200] sm:$0xff]  ;;  %v5816_v28 = vunpack.i.h.bf16 %v8601_v49 }
 0x1a1   :  { %6108 = vrot.lane.b32.xlu0 %v8049_v52, %s6281_s18  ;;  %v8703_v2 = vsel %vm163_vm2, %v1286_v32, %v5541_v15  ;;  %v1607_v39 = vsel %vm145_vm0, %v6246_v58, %v5636_v5  ;;  %v5635_v52 = vunpack.i.l.bf16 %v9612_v45  ;;  %v5815_v42 = vunpack.i.l.bf16 %v8601_v49  ;;  %v4493_v18 = vld [vmem:[%s9486_s0 + $0x278] sm:$0xff]  ;;  %v4492_v45 = vld [vmem:[%s9486_s0 + $0x270] sm:$0xff] }
 0x1a2   :  { %v5834_v24 = vpop.permute.xlu1 %5833  ;;  %v1768_v15 = vsel %vm145_vm0, %v4429_v16, %v5811_v60  ;;  %v1767_v59 = vsel %vm145_vm0, %v4428_v54, %v5810_v20  ;;  %v5656_v60 = vunpack.i.h.bf16 %v9613_v17  ;;  %v5655_v20 = vunpack.i.l.bf16 %v9613_v17  ;;  %v6247_v16 = vld [vmem:[%s9486_s0 + $0x1f8] sm:$0xff] }
 0x1a3   :  { %v5836_v32 = vunpack.i.h.bf16 %v5834_v24  ;;  %v5835_v37 = vunpack.i.l.bf16 %v5834_v24  ;;  %v5829_v57 = vpop.permute.xlu0 %5828  ;;  %v1775_v5 = vsel %vm154_vm1, %v1767_v59, %v5820_v34  ;;  %v1776_v49 = vsel %vm154_vm1, %v1768_v15, %v5821_v29  ;;  %v4461_v17 = vld [vmem:[%s9486_s0 + $0x232] sm:$0xff] }
 0x1a4   :  { %v5831_v58 = vunpack.i.h.bf16 %v5829_v57  ;;  %v5830_v4 = vunpack.i.l.bf16 %v5829_v57  ;;  %6123 = vrot.lane.b32.xlu1 %v8322_v0, %s6282_s9  ;;  %v1606_v57 = vsel %vm145_vm0, %v6247_v16, %v5635_v52  ;;  %v2091_v29 = vsel %vm145_vm0, %v4493_v18, %v5816_v28  ;;  %v4460_v18 = vld [vmem:[%s9486_s0 + $0x22a] sm:$0xff] }
 0x1a5   :  { %6118 = vrot.lane.b32.xlu0 %v8083_v56, %s6282_s9  ;;  %v1783_v24 = vsel %vm163_vm2, %v1775_v5, %v5835_v37  ;;  %v1784_v54 = vsel %vm163_vm2, %v1776_v49, %v5836_v32  ;;  %v5826_v0 = vunpack.i.h.bf16 %v8662_v6  ;;  %v8739_v56 = vld [vmem:[%s9488_s2] ss:$0 sm:$0xff]  ;;  %v2090_v37 = vsel %vm145_vm0, %v4492_v45, %v5815_v42 }
 0x1a6   :  { %v5844_v34 = vpop.permute.xlu1 %5843  ;;  %v1788_v15 = vpack.c.bf16 %v1784_v54, %v1783_v24  ;;  %v5825_v59 = vunpack.i.l.bf16 %v8662_v6  ;;  %v2099_v5 = vsel %vm154_vm1, %v2091_v29, %v5831_v58  ;;  %v2098_v49 = vsel %vm154_vm1, %v2090_v37, %v5830_v4 }
 0x1a7   :  { %v5846_v52 = vunpack.i.h.bf16 %v5844_v34  ;;  %v5845_v32 = vunpack.i.l.bf16 %v5844_v34  ;;  %v5839_v28 = vpop.permute.xlu0 %5838  ;;  %v1614_v16 = vsel %vm154_vm1, %v1606_v57, %v5655_v20  ;;  %v1615_v34 = vsel %vm154_vm1, %v1607_v39, %v5656_v60 }
 0x1a8   :  { %v5841_v24 = vunpack.i.h.bf16 %v5839_v28  ;;  %v5840_v54 = vunpack.i.l.bf16 %v5839_v28  ;;  %6133 = vrot.lane.b32.xlu1 %v6132_v40, %s6280_s28  ;;  %3665 = vmatprep.mubr.bf16.mxu0 %v1788_v15  ;;  %v3612_v4 = vadd.f32 %v8355_v51, %v8739_v56  ;;  %v3615_v58 = vadd.f32 %v8369_v47, %v8739_v56 }
 0x1a9   :  { %6128 = vrot.lane.b32.xlu0 %v8460_v63, %s6280_s28  ;;  %v4831_v6 = vpop.f32.mrb[0].mxu1  ;;  %v2106_v42 = vsel %vm163_vm2, %v2098_v49, %v5845_v32  ;;  %v2107_v45 = vsel %vm163_vm2, %v2099_v5, %v5846_v52  ;;  %v1929_v40 = vsel %vm145_vm0, %v4461_v17, %v5826_v0  ;;  %v1928_v37 = vsel %vm145_vm0, %v4460_v18, %v5825_v59 }
 0x1aa   :  { %v4832_v29 = vpop.f32.mrb[1].mxu1  ;;  %v5854_v15 = vpop.permute.xlu1 %5853  ;;  %v2111_v63 = vpack.c.bf16 %v2107_v45, %v2106_v42  ;;  %v1937_v39 = vsel %vm154_vm1, %v1929_v40, %v5841_v24  ;;  %v1936_v60 = vsel %vm154_vm1, %v1928_v37, %v5840_v54  ;;  %v5505_v18 = vunpack.i.l.bf16 %v9610_v11 }
 0x1ab   :  { %v4833_v32 = vadd.f32 %v4832_v29, %v4831_v6  ;;  %v5856_v28 = vunpack.i.h.bf16 %v5854_v15  ;;  %v5855_v52 = vunpack.i.l.bf16 %v5854_v15  ;;  %v5849_v5 = vpop.permute.xlu0 %5848  ;;  %v4834_v20 = vpop.f32.mrb[2].mxu1  ;;  %v9614_v6 = vld [vmem:[#allocation20_spill] sm:$0xff]  ;;  %v9615_v29 = vld [vmem:[#allocation11_spill] sm:$0xff]  ;;  %v8815_v55 = vsel %vm154_vm1, %v8475_v36, %v9618_v31 }
 0x1ac   :  { %v5851_v51 = vunpack.i.h.bf16 %v5849_v5  ;;  %v5850_v57 = vunpack.i.l.bf16 %v5849_v5  ;;  %v4835_v49 = vpop.f32.mrb[3].mxu1  ;;  %6143 = vrot.lane.b32.xlu1 %v6142_v25, %s6281_s18  ;;  %3762 = vmatprep.mubr.bf16.mxu1 %v2111_v63  ;;  %v4328_v25 = vld [vmem:[%s9486_s0 + $0x139] sm:$0xff]  ;;  %v5526_v42 = vunpack.i.h.bf16 %v9614_v6  ;;  %v5525_v45 = vunpack.i.l.bf16 %v9614_v6  ;;  %v9616_v15 = vld [vmem:[#allocation24_spill] sm:$0xff]  ;;  %v9625_v6 = vld [vmem:[#allocation23_spill] sm:$0xff] }
 0x1ad   :  { %v8770_v47 = vadd.f32 %v4833_v32, %v3612_v4  ;;  %v4836_v0 = vadd.f32 %v4835_v49, %v4834_v20  ;;  %6138 = vrot.lane.b32.xlu0 %v8541_v53, %s6281_s18  ;;  %v1944_v17 = vsel %vm163_vm2, %v1936_v60, %v5855_v52  ;;  %v1945_v59 = vsel %vm163_vm2, %v1937_v39, %v5856_v28  ;;  %v4329_v53 = vld [vmem:[%s9486_s0 + $0x141] sm:$0xff] }
 0x1ae   :  { %v8777_v24 = vpop.permute.xlu1 %5863  ;;  %v1622_v54 = vsel %vm163_vm2, %v1614_v16, %v5850_v57  ;;  %v1623_v48 = vsel %vm163_vm2, %v1615_v34, %v5851_v51  ;;  %v1949_v9 = vpack.c.bf16 %v1945_v59, %v1944_v17  ;;  %v5470_v34 = vunpack.i.l.bf16 %v9615_v29 }
 0x1af   :  { %v8789_v4 = vadd.f32 %v4836_v0, %v3615_v58  ;;  %v8791_v40 = vpop.permute.xlu0 %5858  ;;  %v1627_v16 = vpack.c.bf16 %v1623_v48, %v1622_v54  ;;  %v5546_v63 = vunpack.i.h.bf16 %v9616_v15  ;;  %v5545_v37 = vunpack.i.l.bf16 %v9616_v15 }
 0x1b0   :  { %6153 = vrot.lane.b32.xlu1 %v6152_v30, %s6282_s9  ;;  %3763 = vmatmul.mubr.bf16.gmra.mrb[28].mxu1 %v1949_v9  ;;  %v1301_v32 = vpack.c.bf16 %v8703_v2, %v8700_v61  ;;  %v5471_v58 = vunpack.i.h.bf16 %v9615_v29  ;;  %v1132_v28 = vsel %vm163_vm2, %v8532_v44, %v5480_v23  ;;  %v9617_v52 = vpack.i.bf16 %v8677_v7, %v8672_v26  ;;  %v9620_v44 = vld [vmem:[#allocation12_spill] sm:$0xff] }
 0x1b1   :  { %3666 = vmatmul.mubr.bf16.gmra.mrb[28].mxu0 %v1627_v16  ;;  %v4837_v5 = vpop.f32.mrb[4].mxu1  ;;  %v9619_v30 = vunpack.i.h.bf16 %v9607_v41  ;;  %v5485_v23 = vunpack.i.l.bf16 %v9620_v44  ;;  %v9621_v2 = vunpack.i.h.bf16 %v9608_v12  ;;  %v9622_v7 = vunpack.i.h.bf16 %v9610_v11 }
 0x1b2   :  { %6148 = vrot.lane.b32.xlu0 %v9617_v52, %s6282_s9  ;;  %v1279_v36 = vsel %vm145_vm0, %v4328_v25, %v5505_v18  ;;  %v4838_v39 = vpop.f32.mrb[5].mxu1  ;;  %v9623_v41 = vpack.c.bf16 %v8251_v1, %v8248_v43  ;;  %3900 = vmatprep.mubr.bf16.mxu1 %v1301_v32  ;;  %v3620_v12 = vadd.f32 %v8409_v10, %v8739_v56  ;;  %v5486_v49 = vunpack.i.h.bf16 %v9620_v44  ;;  %v9624_v10 = vld [vmem:[#allocation19_spill] sm:$0xff]  ;;  %v4330_v25 = vld [vmem:[%s9486_s0 + $0x151] sm:$0xff] }
 0x1b3   :  { %v8821_v61 = vsel %vm154_vm1, %v8472_v3, %v9619_v30  ;;  %v1133_v26 = vsel %vm163_vm2, %v8618_v8, %v9621_v2  ;;  %v1280_v20 = vsel %vm145_vm0, %v4329_v53, %v9622_v7  ;;  %v8835_v3 = vpop.permute.xlu1 %5873  ;;  %v4839_v60 = vadd.f32 %v4838_v39, %v4837_v5  ;;  %v8839_v51 = vpop.permute.xlu0 %5868  ;;  %v9628_v30 = vld [vmem:[#allocation15_spill] sm:$0xff]  ;;  %v9630_v7 = vld [vmem:[#allocation49_spill] sm:$0xff] }
 0x1b4   :  { %3803 = vmatprep.mubr.bf16.mxu0 %v9623_v41  ;;  %v4840_v8 = vpop.f32.mrb[6].mxu1  ;;  %v1287_v11 = vsel %vm154_vm1, %v1279_v36, %v5525_v45  ;;  %v1288_v57 = vsel %vm154_vm1, %v1280_v20, %v5526_v42  ;;  %v8848_v17 = vsel %vm154_vm1, %v8500_v35, %v5470_v34  ;;  %v5510_v59 = vunpack.i.l.bf16 %v9624_v10  ;;  %v9632_v36 = vld [vmem:[#allocation18_spill] sm:$0xff] }
 0x1b5   :  { %v4841_v0 = vpop.f32.mrb[7].mxu1  ;;  %v1295_v43 = vsel %vm163_vm2, %v1287_v11, %v5545_v37  ;;  %v1296_v1 = vsel %vm163_vm2, %v1288_v57, %v5546_v63  ;;  %v3623_v18 = vadd.f32 %v8428_v14, %v8739_v56  ;;  %v8853_v54 = vadd.f32 %v4839_v60, %v3620_v12  ;;  %v4331_v14 = vld [vmem:[%s9486_s0 + $0x159] sm:$0xff]  ;;  %v6222_v37 = vld [vmem:[%s9487_s1 + $0x208] sm:$0xff]  }
 0x1b6   :  { %v4842_v48 = vadd.f32 %v4841_v0, %v4840_v8  ;;  %v1140_v9 = vpack.c.bf16 %v1133_v26, %v1132_v28  ;;  %v5511_v53 = vunpack.i.h.bf16 %v9624_v10  ;;  %v5530_v42 = vunpack.i.l.bf16 %v9625_v6  ;;  %v9629_v26 = vld [vmem:[#allocation50_spill] sm:$0xff] }
 0x1b7   :  { %v8860_v45 = vpop.permute.xlu1 %5883  ;;  %v8864_v35 = vsel %vm154_vm1, %v8497_v46, %v5471_v58  ;;  %v5531_v16 = vunpack.i.h.bf16 %v9625_v6  ;;  %v8872_v34 = vpop.permute.xlu0 %5878  ;;  %v1302_v15 = vpack.c.bf16 %v1296_v1, %v1295_v43  ;;  %v1134_v63 = vsel %vm163_vm2, %v8526_v27, %v5485_v23  ;;  %v9626_v46 = vld [vmem:[#allocation14_spill] sm:$0xff]  ;;  %v9627_v58 = vld [vmem:[#allocation27_spill] sm:$0xff] }
 0x1b8   :  { %v8870_v29 = vadd.f32 %v4842_v48, %v3623_v18  ;;  %v5496_v32 = vunpack.i.h.bf16 %v9626_v46  ;;  %v5551_v28 = vunpack.i.h.bf16 %v9627_v58  ;;  %v5550_v52 = vunpack.i.l.bf16 %v9627_v58  ;;  %3901 = vmatmul.mubr.bf16.vlgmr.msra.gmra.mrb[32].mxu1 %v1140_v9  ;;  %v6248_v57 = vld [vmem:[%s9487_s1 + $0x200] sm:$0xff]  }
 0x1b9   :  { %v1135_v5 = vsel %vm163_vm2, %v8529_v22, %v5486_v49  ;;  %v5495_v31 = vunpack.i.l.bf16 %v9626_v46  ;;  %v5491_v44 = vunpack.i.h.bf16 %v9628_v30  ;;  %v5490_v27 = vunpack.i.l.bf16 %v9628_v30  ;;  %v4843_v2 = vpop.f32.mrb[8].mxu1  ;;  %3908 = vmatprep.mubr.bf16.mxu1 %v1302_v15  ;;  %v9634_v49 = vld [vmem:[#allocation22_spill] sm:$0xff]  ;;  %5063 = vmatpush3.bf16.msra.mxu1 %v6248_v57  ;;  %v6249_v15 = vld [vmem:[%s9486_s0 + $0x171] sm:$0xff] }
 0x1ba   :  { %v1281_v23 = vsel %vm145_vm0, %v4330_v25, %v5510_v59  ;;  %v9631_v20 = vpack.c.bf16 %v9629_v26, %v9630_v7  ;;  %v5516_v39 = vunpack.i.h.bf16 %v9632_v36  ;;  %v5515_v41 = vunpack.i.l.bf16 %v9632_v36  ;;  %v4844_v12 = vpop.f32.mrb[9].mxu1  ;;  %v9635_v48 = vld [vmem:[#allocation26_spill] sm:$0xff]  ;;  %5056 = vmatprep.subr.bf16.mxu1 %v6222_v37  ;;  %v9637_v36 = vld [vmem:[#allocation47_spill] sm:$0xff] }
 0x1bb   :  { %v1282_v22 = vsel %vm145_vm0, %v4331_v14, %v5511_v53  ;;  %v9633_v60 = vpack.c.bf16 %v8228_v62, %v8225_v38  ;;  %v8897_v8 = vpop.permute.xlu1 %5893  ;;  %v1289_v11 = vsel %vm154_vm1, %v1281_v23, %v5530_v42  ;;  %v5536_v0 = vunpack.i.h.bf16 %v9634_v49  ;;  %v8906_v10 = vpop.permute.xlu0 %5888  ;;  %v6223_v62 = vld [vmem:[%s9487_s1 + $0x210] sm:$0xff]  }
 0x1bc   :  { %3804 = vmatmul.mubr.bf16.vlgmr.msra.gmra.mrb[32].mxu0 %v9631_v20  ;;  %v3628_v43 = vadd.f32 %v8492_v50, %v8739_v56  ;;  %v4845_v1 = vadd.f32 %v4844_v12, %v4843_v2  ;;  %v4846_v59 = vpop.f32.mrb[10].mxu1  ;;  %v1290_v38 = vsel %vm154_vm1, %v1282_v22, %v5531_v16  ;;  %v5535_v18 = vunpack.i.l.bf16 %v9634_v49  ;;  %v9641_v49 = vld [vmem:[#allocation56_spill] sm:$0xff] }
 0x1bd   :  { %3811 = vmatprep.mubr.bf16.mxu0 %v9633_v60  ;;  %5024 = vmatpush3.bf16.msra.mxu0 %v6248_v57  ;;  %v5556_v9 = vunpack.i.h.bf16 %v9635_v48  ;;  %v4847_v25 = vpop.f32.mrb[11].mxu1  ;;  %v1297_v53 = vsel %vm163_vm2, %v1289_v11, %v5550_v52  ;;  %v1298_v50 = vsel %vm163_vm2, %v1290_v38, %v5551_v28  ;;  %v5555_v6 = vunpack.i.l.bf16 %v9635_v48  ;;  %v9640_v11 = vld [vmem:[#allocation55_spill] sm:$0xff] }
 0x1be   :  { %5025 = vmatprep.subr.bf16.mxu0 %v6222_v37  ;;  %v3631_v42 = vadd.f32 %v8515_v13, %v8739_v56  ;;  %v8919_v14 = vadd.f32 %v4845_v1, %v3628_v43  ;;  %v4848_v16 = vadd.f32 %v4847_v25, %v4846_v59  ;;  %v1284_v46 = vsel %vm145_vm0, %v6249_v15, %v5516_v39  ;;  %v6250_v13 = vld [vmem:[%s9486_s0 + $0x169] sm:$0xff]  ;;  %v9645_v59 = vld [vmem:[#allocation34_spill] sm:$0xff] }
 0x1bf   :  { %v8925_v58 = vpop.permute.xlu1 %5903  ;;  %v1141_v52 = vpack.c.bf16 %v1135_v5, %v1134_v63  ;;  %v8929_v28 = vsel %vm163_vm2, %v8815_v55, %v5495_v31  ;;  %v8933_v30 = vsel %vm163_vm2, %v8821_v61, %v5496_v32  ;;  %v1283_v23 = vsel %vm145_vm0, %v6250_v13, %v5515_v41  ;;  %v8941_v26 = vpop.permute.xlu0 %5898  ;;  %5064 = vmatpush3.bf16.msra.mxu1 %v6222_v37  ;;  %v6224_v55 = vld [vmem:[%s9487_s1 + $0x218] sm:$0xff]   ;;  %v6225_v25 = vld [vmem:[%s9487_s1 + $0x220] sm:$0xff]  }
 0x1c0   :  { %v8939_v2 = vadd.f32 %v4848_v16, %v3631_v42  ;;  %v1303_v63 = vpack.c.bf16 %v1298_v50, %v1297_v53  ;;  %v5866_v61 = vunpack.i.h.bf16 %v8777_v24  ;;  %v1136_v32 = vsel %vm163_vm2, %v8848_v17, %v5490_v27  ;;  %5057 = vmatprep.subr.bf16.mxu1 %v6223_v62  ;;  %v9646_v53 = vld [vmem:[#allocation6_spill] sm:$0xff]  ;;  %v4550_v42 = vld [vmem:[%s9486_s0 + $0x272] sm:$0xff] }
 0x1c1   :  { %5026 = vmatpush3.bf16.msra.mxu0 %v6222_v37  ;;  %3909 = vmatmul.mubr.bf16.gmra.mrb[36].mxu1 %v1141_v52  ;;  %v1291_v5 = vsel %vm154_vm1, %v1283_v23, %v5535_v18  ;;  %v1292_v31 = vsel %vm154_vm1, %v1284_v46, %v5536_v0  ;;  %v5865_v7 = vunpack.i.l.bf16 %v8777_v24  ;;  %v4849_v20 = vpop.f32.mrb[12].mxu1  ;;  %v9636_v37 = vld [vmem:[#allocation48_spill] sm:$0xff]  ;;  %v1137_v41 = vsel %vm163_vm2, %v8864_v35, %v5491_v44  ;;  %v9642_v0 = vld [vmem:[#allocation57_spill] sm:$0xff]  ;;  %v9644_v44 = vld [vmem:[#allocation54_spill] sm:$0xff] }
 0x1c2   :  { %5027 = vmatprep.subr.bf16.mxu0 %v6223_v62  ;;  %v9638_v39 = vpack.c.bf16 %v9636_v37, %v9637_v36  ;;  %3916 = vmatprep.mubr.bf16.mxu1 %v1303_v63  ;;  %v1299_v22 = vsel %vm163_vm2, %v1291_v5, %v5555_v6  ;;  %v1300_v17 = vsel %vm163_vm2, %v1292_v31, %v5556_v9  ;;  %v5861_v27 = vunpack.i.h.bf16 %v8791_v40  ;;  %v4850_v12 = vpop.f32.mrb[13].mxu1  ;;  %v9643_v35 = vld [vmem:[#allocation53_spill] sm:$0xff] }
 0x1c3   :  { %v9639_v60 = vpack.c.bf16 %v8317_v21, %v8312_v19  ;;  %v8963_v24 = vpop.permute.xlu1 %5913  ;;  %v819_v57 = vpack.c.bf16 %v9640_v11, %v8149_v33  ;;  %v981_v43 = vpack.c.bf16 %v9642_v0, %v9641_v49  ;;  %v820_v1 = vpack.c.bf16 %v9644_v44, %v9643_v35  ;;  %v4551_v19 = vld [vmem:[%s9486_s0 + $0x27a] sm:$0xff]  ;;  %v8977_v48 = vpop.permute.xlu0 %5908  ;;  %5065 = vmatpush3.bf16.msra.mxu1 %v6223_v62  ;;  %v6252_v46 = vld [vmem:[%s9486_s0 + $0x2d1] sm:$0xff]  ;;  %v4616_v35 = vld [vmem:[%s9486_s0 + $0x2e9] sm:$0xff] }
 0x1c4   :  { %3812 = vmatmul.mubr.bf16.gmra.mrb[36].mxu0 %v9638_v39  ;;  %v3636_v38 = vadd.f32 %v9645_v59, %v8739_v56  ;;  %v5860_v21 = vunpack.i.l.bf16 %v8791_v40  ;;  %v4851_v18 = vadd.f32 %v4850_v12, %v4849_v20  ;;  %v4852_v33 = vpop.f32.mrb[14].mxu1  ;;  %v1143_v9 = vpack.c.bf16 %v8933_v30, %v8929_v28  ;;  %v6251_v40 = vld [vmem:[%s9486_s0 + $0x2d9] sm:$0xff]  ;;  %5058 = vmatprep.subr.bf16.mxu1 %v6224_v55 }
 0x1c5   :  { %3819 = vmatprep.mubr.bf16.mxu0 %v9639_v60  ;;  %5028 = vmatpush3.bf16.msra.mxu0 %v6223_v62  ;;  %v3639_v50 = vadd.f32 %v9646_v53, %v8739_v56  ;;  %v2730_v6 = vsel %vm145_vm0, %v6251_v40, %v5866_v61  ;;  %v4853_v16 = vpop.f32.mrb[15].mxu1  ;;  %v1142_v62 = vpack.c.bf16 %v1137_v41, %v1136_v32  ;;  %v5875_v52 = vunpack.i.l.bf16 %v8835_v3 }
 0x1c6   :  { %5029 = vmatprep.subr.bf16.mxu0 %v6224_v55  ;;  %v1304_v15 = vpack.c.bf16 %v1300_v17, %v1299_v22  ;;  %v2729_v56 = vsel %vm145_vm0, %v6252_v46, %v5865_v7  ;;  %v8998_v13 = vadd.f32 %v4851_v18, %v3636_v38  ;;  %v4854_v23 = vadd.f32 %v4853_v16, %v4852_v33 }
 0x1c7   :  { %v2407_v63 = vsel %vm145_vm0, %v4551_v19, %v5861_v27  ;;  %v5876_v61 = vunpack.i.h.bf16 %v8835_v3  ;;  %v5886_v5 = vunpack.i.h.bf16 %v8860_v45  ;;  %v5885_v32 = vunpack.i.l.bf16 %v8860_v45  ;;  %v9004_v31 = vpop.permute.xlu1 %5923  ;;  %v9011_v39 = vpop.permute.xlu0 %5918  ;;  %5066 = vmatpush3.bf16.msra.mxu1 %v6224_v55  ;;  %v6226_v3 = vld [vmem:[%s9487_s1 + $0x228] sm:$0xff]   ;;  %v4582_v27 = vld [vmem:[%s9486_s0 + $0x2a0] sm:$0xff] }
 0x1c8   :  { %v2406_v20 = vsel %vm145_vm0, %v4550_v42, %v5860_v21  ;;  %v5906_v7 = vunpack.i.h.bf16 %v8925_v58  ;;  %v5905_v37 = vunpack.i.l.bf16 %v8925_v58  ;;  %v9009_v36 = vadd.f32 %v4854_v23, %v3639_v50  ;;  %5059 = vmatprep.subr.bf16.mxu1 %v6225_v25  ;;  %v4518_v50 = vld [vmem:[%s9486_s0 + $0x241] sm:$0xff] }
 0x1c9   :  { %5030 = vmatpush3.bf16.msra.mxu0 %v6224_v55  ;;  %v5871_v45 = vunpack.i.h.bf16 %v8839_v51  ;;  %v5870_v41 = vunpack.i.l.bf16 %v8839_v51  ;;  %v5881_v22 = vunpack.i.h.bf16 %v8872_v34  ;;  %v5880_v17 = vunpack.i.l.bf16 %v8872_v34  ;;  %3917 = vmatmul.mubr.bf16.gmra.mrb[40].mxu1 %v1142_v62  ;;  %v4519_v55 = vld [vmem:[%s9486_s0 + $0x249] sm:$0xff] }
 0x1ca   :  { %5031 = vmatprep.subr.bf16.mxu0 %v6225_v25  ;;  %v2414_v58 = vsel %vm154_vm1, %v2406_v20, %v5875_v52  ;;  %v4583_v51 = vld [vmem:[%s9486_s0 + $0x2a8] sm:$0xff]  ;;  %v5896_v12 = vunpack.i.h.bf16 %v8897_v8  ;;  %v5895_v34 = vunpack.i.l.bf16 %v8897_v8  ;;  %v5900_v60 = vunpack.i.l.bf16 %v8941_v26  ;;  %3924 = vmatprep.mubr.bf16.mxu1 %v1304_v15  ;;  %v4553_v20 = vld [vmem:[%s9486_s0 + $0x292] sm:$0xff] }
 0x1cb   :  { %v2415_v11 = vsel %vm154_vm1, %v2407_v63, %v5876_v61  ;;  %v2737_v49 = vsel %vm154_vm1, %v2729_v56, %v5885_v32  ;;  %v2738_v0 = vsel %vm154_vm1, %v2730_v6, %v5886_v5  ;;  %v5901_v59 = vunpack.i.h.bf16 %v8941_v26  ;;  %v9037_v38 = vpop.permute.xlu1 %5933  ;;  %v9041_v21 = vpop.permute.xlu0 %5928  ;;  %5067 = vmatpush3.bf16.msra.mxu1 %v6225_v25  ;;  %v6227_v26 = vld [vmem:[%s9487_s1 + $0x230] sm:$0xff]  }
 0x1cc   :  { %3820 = vmatmul.mubr.bf16.gmra.mrb[40].mxu0 %v819_v57  ;;  %v5916_v19 = vunpack.i.h.bf16 %v8963_v24  ;;  %v5915_v8 = vunpack.i.l.bf16 %v8963_v24  ;;  %v2745_v57 = vsel %vm163_vm2, %v2737_v49, %v5905_v37  ;;  %v2746_v18 = vsel %vm163_vm2, %v2738_v0, %v5906_v7  ;;  %5060 = vmatprep.subr.bf16.mxu1 %v6226_v3  ;;  %v4552_v32 = vld [vmem:[%s9486_s0 + $0x28a] sm:$0xff] }
 0x1cd   :  { %3827 = vmatprep.mubr.bf16.mxu0 %v981_v43  ;;  %5032 = vmatpush3.bf16.msra.mxu0 %v6225_v25  ;;  %v2246_v43 = vsel %vm145_vm0, %v4519_v55, %v5871_v45  ;;  %v2569_v33 = vsel %vm145_vm0, %v4583_v51, %v5881_v22  ;;  %v2568_v53 = vsel %vm145_vm0, %v4582_v27, %v5880_v17  ;;  %v5891_v24 = vunpack.i.h.bf16 %v8906_v10  ;;  %v4617_v22 = vld [vmem:[%s9486_s0 + $0x2f1] sm:$0xff] }
 0x1ce   :  { %5033 = vmatprep.subr.bf16.mxu0 %v6226_v3  ;;  %v5890_v25 = vunpack.i.l.bf16 %v8906_v10  ;;  %v2576_v40 = vsel %vm154_vm1, %v2568_v53, %v5900_v60  ;;  %v2422_v6 = vsel %vm163_vm2, %v2414_v58, %v5895_v34  ;;  %v2423_v42 = vsel %vm163_vm2, %v2415_v11, %v5896_v12 }
 0x1cf   :  { %v2577_v16 = vsel %vm154_vm1, %v2569_v33, %v5901_v59  ;;  %v5911_v62 = vunpack.i.h.bf16 %v8977_v48  ;;  %v5910_v15 = vunpack.i.l.bf16 %v8977_v48  ;;  %v9062_v46 = vpop.permute.xlu1 %5943  ;;  %v2753_v56 = vpack.c.bf16 %v2746_v18, %v2745_v57  ;;  %v9066_v23 = vpop.permute.xlu0 %5938  ;;  %5068 = vmatpush3.bf16.msra.mxu1 %v6226_v3  ;;  %v6228_v48 = vld [vmem:[%s9487_s1 + $0x238] sm:$0xff]  }
 0x1d0   :  { %v5921_v52 = vunpack.i.h.bf16 %v9011_v39  ;;  %v5920_v10 = vunpack.i.l.bf16 %v9011_v39  ;;  %v9069_v63 = vsel %vm163_vm2, %v2576_v40, %v5915_v8  ;;  %v2585_v61 = vsel %vm163_vm2, %v2577_v16, %v5916_v19  ;;  %5061 = vmatprep.subr.bf16.mxu1 %v6227_v26 }
 0x1d1   :  { %5034 = vmatpush3.bf16.msra.mxu0 %v6226_v3  ;;  %v2245_v5 = vsel %vm145_vm0, %v4518_v50, %v5870_v41  ;;  %v5936_v7 = vunpack.i.h.bf16 %v9037_v38  ;;  %v5935_v37 = vunpack.i.l.bf16 %v9037_v38  ;;  %3925 = vmatmul.mubr.bf16.gmra.mrb[44].mxu1 %v1143_v9  ;;  %v2430_v39 = vpack.c.bf16 %v2423_v42, %v2422_v6  ;;  %v4584_v6 = vld [vmem:[%s9486_s0 + $0x2b8] sm:$0xff]  ;;  %v4585_v42 = vld [vmem:[%s9486_s0 + $0x2c0] sm:$0xff] }
 0x1d2   :  { %5035 = vmatprep.subr.bf16.mxu0 %v6227_v26  ;;  %v2253_v3 = vsel %vm154_vm1, %v2245_v5, %v5890_v25  ;;  %v2254_v45 = vsel %vm154_vm1, %v2246_v43, %v5891_v24  ;;  %v5926_v41 = vunpack.i.h.bf16 %v9004_v31  ;;  %3932 = vmatprep.mubr.bf16.mxu1 %v2753_v56  ;;  %v5925_v28 = vunpack.i.l.bf16 %v9004_v31  ;;  %v4521_v43 = vld [vmem:[%s9486_s0 + $0x261] sm:$0xff] }
 0x1d3   :  { %v5954_v30 = vpop.permute.xlu1 %5953  ;;  %v2261_v9 = vsel %vm163_vm2, %v2253_v3, %v5910_v15  ;;  %v2262_v17 = vsel %vm163_vm2, %v2254_v45, %v5911_v62  ;;  %v2592_v58 = vpack.c.bf16 %v2585_v61, %v9069_v63  ;;  %v2409_v44 = vsel %vm145_vm0, %v4553_v20, %v5921_v52  ;;  %v5949_v31 = vpop.permute.xlu0 %5948  ;;  %5069 = vmatpush3.bf16.msra.mxu1 %v6227_v26 }
 0x1d4   :  { %3828 = vmatmul.mubr.bf16.gmra.mrb[44].mxu0 %v820_v1  ;;  %v2408_v1 = vsel %vm145_vm0, %v4552_v32, %v5920_v10  ;;  %v5956_v55 = vunpack.i.h.bf16 %v5954_v30  ;;  %v5955_v27 = vunpack.i.l.bf16 %v5954_v30  ;;  %v2417_v12 = vsel %vm154_vm1, %v2409_v44, %v5936_v7  ;;  %5062 = vmatprep.subr.bf16.mxu1 %v6228_v48 }
 0x1d5   :  { %3835 = vmatprep.mubr.bf16.mxu0 %v2430_v39  ;;  %5036 = vmatpush3.bf16.msra.mxu0 %v6227_v26  ;;  %v2416_v51 = vsel %vm154_vm1, %v2408_v1, %v5935_v37  ;;  %v5946_v34 = vunpack.i.h.bf16 %v9062_v46  ;;  %v5945_v60 = vunpack.i.l.bf16 %v9062_v46  ;;  %v2732_v11 = vsel %vm145_vm0, %v4617_v22, %v5926_v41  ;;  %v4520_v26 = vld [vmem:[%s9486_s0 + $0x259] sm:$0xff] }
 0x1d6   :  { %5037 = vmatprep.subr.bf16.mxu0 %v6228_v48  ;;  %v2269_v49 = vpack.c.bf16 %v2262_v17, %v2261_v9  ;;  %v2424_v0 = vsel %vm163_vm2, %v2416_v51, %v5955_v27  ;;  %v2425_v59 = vsel %vm163_vm2, %v2417_v12, %v5956_v55  ;;  %v2731_v38 = vsel %vm145_vm0, %v4616_v35, %v5925_v28 }
 0x1d7   :  { %v5931_v19 = vunpack.i.h.bf16 %v9041_v21  ;;  %v5930_v8 = vunpack.i.l.bf16 %v9041_v21  ;;  %v5964_v57 = vpop.permute.xlu1 %5963  ;;  %v2431_v18 = vpack.c.bf16 %v2425_v59, %v2424_v0  ;;  %v5941_v33 = vunpack.i.h.bf16 %v9066_v23  ;;  %v5959_v25 = vpop.permute.xlu0 %5958  ;;  %5070 = vmatpush3.bf16.msra.mxu1 %v6228_v48 }
 0x1d8   :  { %v5940_v53 = vunpack.i.l.bf16 %v9066_v23  ;;  %v5966_v24 = vunpack.i.h.bf16 %v5964_v57  ;;  %v5965_v50 = vunpack.i.l.bf16 %v5964_v57  ;;  %v2739_v21 = vsel %vm154_vm1, %v2731_v38, %v5945_v60  ;;  %v4554_v60 = vld [vmem:[%s9486_s0 + $0x2a2] sm:$0xff] }
 0x1d9   :  { %5038 = vmatpush3.bf16.msra.mxu0 %v6228_v48  ;;  %v2740_v40 = vsel %vm154_vm1, %v2732_v11, %v5946_v34  ;;  %v5961_v16 = vunpack.i.h.bf16 %v5959_v25  ;;  %v5960_v62 = vunpack.i.l.bf16 %v5959_v25  ;;  %3933 = vmatmul.mubr.bf16.gmra.mrb[48].mxu1 %v2592_v58  ;;  %v5951_v15 = vunpack.i.h.bf16 %v5949_v31  ;;  %v4555_v11 = vld [vmem:[%s9486_s0 + $0x2aa] sm:$0xff]  ;;  %v4618_v57 = vld [vmem:[%s9486_s0 + $0x301] sm:$0xff] }
 0x1da   :  { %v5950_v46 = vunpack.i.l.bf16 %v5949_v31  ;;  %v2747_v56 = vsel %vm163_vm2, %v2739_v21, %v5965_v50  ;;  %v2748_v52 = vsel %vm163_vm2, %v2740_v40, %v5966_v24  ;;  %v2248_v10 = vsel %vm145_vm0, %v4521_v43, %v5931_v19  ;;  %v4619_v38 = vld [vmem:[%s9486_s0 + $0x309] sm:$0xff] }
 0x1db   :  { %v2247_v23 = vsel %vm145_vm0, %v4520_v26, %v5930_v8  ;;  %v5974_v63 = vpop.permute.xlu1 %5973  ;;  %v2754_v61 = vpack.c.bf16 %v2748_v52, %v2747_v56  ;;  %v2571_v48 = vsel %vm145_vm0, %v4585_v42, %v5941_v33  ;;  %v2570_v5 = vsel %vm145_vm0, %v4584_v6, %v5940_v53  ;;  %v5969_v7 = vpop.permute.xlu0 %5968  ;;  %v4522_v52 = vld [vmem:[%s9486_s0 + $0x271] sm:$0xff] }
 0x1dc   :  { %3836 = vmatmul.mubr.bf16.gmra.mrb[48].mxu0 %v2269_v49  ;;  %v5976_v32 = vunpack.i.h.bf16 %v5974_v63  ;;  %v5975_v20 = vunpack.i.l.bf16 %v5974_v63  ;;  %v2578_v37 = vsel %vm154_vm1, %v2570_v5, %v5960_v62  ;;  %v2579_v39 = vsel %vm154_vm1, %v2571_v48, %v5961_v16 }
 0x1dd   :  { %3843 = vmatprep.mubr.bf16.mxu0 %v2431_v18  ;;  %v5971_v3 = vunpack.i.h.bf16 %v5969_v7  ;;  %v5970_v45 = vunpack.i.l.bf16 %v5969_v7  ;;  %3940 = vmatprep.mubr.bf16.mxu1 %v2754_v61  ;;  %v2255_v41 = vsel %vm154_vm1, %v2247_v23, %v5950_v46  ;;  %v2256_v22 = vsel %vm154_vm1, %v2248_v10, %v5951_v15  ;;  %v4523_v10 = vld [vmem:[%s9486_s0 + $0x279] sm:$0xff]  ;;  %v4586_v7 = vld [vmem:[%s9486_s0 + $0x2d0] sm:$0xff] }
 0x1de   :  { %v2586_v28 = vsel %vm163_vm2, %v2578_v37, %v5975_v20  ;;  %v2587_v30 = vsel %vm163_vm2, %v2579_v39, %v5976_v32  ;;  %v4587_v37 = vld [vmem:[%s9486_s0 + $0x2d8] sm:$0xff] }
 0x1df   :  { %v5984_v9 = vpop.permute.xlu1 %5983  ;;  %v2263_v17 = vsel %vm163_vm2, %v2255_v41, %v5970_v45  ;;  %v2264_v58 = vsel %vm163_vm2, %v2256_v22, %v5971_v3  ;;  %v2593_v35 = vpack.c.bf16 %v2587_v30, %v2586_v28  ;;  %v5979_v44 = vpop.permute.xlu0 %5978 }
 0x1e0   :  { %v2270_v1 = vpack.c.bf16 %v2264_v58, %v2263_v17  ;;  %v5981_v51 = vunpack.i.h.bf16 %v5979_v44  ;;  %v5980_v12 = vunpack.i.l.bf16 %v5979_v44  ;;  %v5986_v59 = vunpack.i.h.bf16 %v5984_v9 }
 0x1e1   :  { %3941 = vmatmul.mubr.bf16.gmra.mrb[52].mxu1 %v2593_v35  ;;  %v5985_v19 = vunpack.i.l.bf16 %v5984_v9 }
 0x1e2   :  { %v2411_v18 = vsel %vm145_vm0, %v4555_v11, %v5981_v51  ;;  %v2410_v26 = vsel %vm145_vm0, %v4554_v60, %v5980_v12  ;;  %v2734_v40 = vsel %vm145_vm0, %v4619_v38, %v5986_v59 }
 0x1e3   :  { %v5994_v55 = vpop.permute.xlu1 %5993  ;;  %v5989_v27 = vpop.permute.xlu0 %5988  ;;  %v2733_v16 = vsel %vm145_vm0, %v4618_v57, %v5985_v19 }
 0x1e4   :  { %3844 = vmatmul.mubr.bf16.gmra.mrb[52].mxu0 %v2270_v1  ;;  %v5996_v49 = vunpack.i.h.bf16 %v5994_v55  ;;  %v5995_v0 = vunpack.i.l.bf16 %v5994_v55  ;;  %v5991_v62 = vunpack.i.h.bf16 %v5989_v27  ;;  %v5990_v15 = vunpack.i.l.bf16 %v5989_v27 }
 0x1e6   :  { %v2418_v24 = vsel %vm154_vm1, %v2410_v26, %v5995_v0  ;;  %v2419_v50 = vsel %vm154_vm1, %v2411_v18, %v5996_v49  ;;  %v2250_v30 = vsel %vm145_vm0, %v4523_v10, %v5991_v62  ;;  %v2249_v9 = vsel %vm145_vm0, %v4522_v52, %v5990_v15  ;;  %v9647_v26 = vld [vmem:[#allocation28_spill] sm:$0xff]  ;;  %v9649_v62 = vld [vmem:[#allocation33_spill] sm:$0xff] }
 0x1e7   :  { %v6004_v31 = vpop.permute.xlu1 %6003  ;;  %v5999_v34 = vpop.permute.xlu0 %5998  ;;  %v5580_v15 = vunpack.i.l.bf16 %v9649_v62  ;;  %v5581_v52 = vunpack.i.h.bf16 %v9649_v62 }
 0x1e8   :  { %v6006_v25 = vunpack.i.h.bf16 %v6004_v31  ;;  %v6005_v21 = vunpack.i.l.bf16 %v6004_v31  ;;  %v6001_v23 = vunpack.i.h.bf16 %v5999_v34  ;;  %v6000_v63 = vunpack.i.l.bf16 %v5999_v34 }
 0x1ea   :  { %v2741_v32 = vsel %vm154_vm1, %v2733_v16, %v6005_v21  ;;  %v2742_v20 = vsel %vm154_vm1, %v2734_v40, %v6006_v25  ;;  %v2573_v35 = vsel %vm145_vm0, %v4587_v37, %v6001_v23  ;;  %v2572_v44 = vsel %vm145_vm0, %v4586_v7, %v6000_v63  ;;  %v9650_v63 = vld [vmem:[#allocation30_spill] sm:$0xff]  ;;  %v9652_v7 = vld [vmem:[#allocation32_spill] sm:$0xff] }
 0x1eb   :  { %v6014_v8 = vpop.permute.xlu1 %6013  ;;  %v6009_v53 = vpop.permute.xlu0 %6008  ;;  %v5586_v37 = vunpack.i.h.bf16 %v9652_v7 }
 0x1ec   :  { %v6016_v43 = vunpack.i.h.bf16 %v6014_v8  ;;  %v6015_v33 = vunpack.i.l.bf16 %v6014_v8  ;;  %v6011_v45 = vunpack.i.h.bf16 %v6009_v53  ;;  %v6010_v41 = vunpack.i.l.bf16 %v6009_v53  ;;  %v4360_v53 = vld [vmem:[%s9486_s0 + $0x152] sm:$0xff] }
 0x1ee   :  { %v2426_v6 = vsel %vm163_vm2, %v2418_v24, %v6015_v33  ;;  %v2427_v42 = vsel %vm163_vm2, %v2419_v50, %v6016_v43  ;;  %v2257_v60 = vsel %vm154_vm1, %v2249_v9, %v6010_v41  ;;  %v2258_v11 = vsel %vm154_vm1, %v2250_v30, %v6011_v45  ;;  %v4361_v24 = vld [vmem:[%s9486_s0 + $0x15a] sm:$0xff] }
 0x1ef   :  { %v6024_v46 = vpop.permute.xlu1 %6023  ;;  %v2432_v56 = vpack.c.bf16 %v2427_v42, %v2426_v6  ;;  %v6019_v5 = vpop.permute.xlu0 %6018  ;;  %v5566_v43 = vunpack.i.h.bf16 %v9647_v26  ;;  %v5565_v33 = vunpack.i.l.bf16 %v9647_v26  ;;  %v9648_v50 = vld [vmem:[#allocation29_spill] sm:$0xff]  ;;  %v4359_v42 = vld [vmem:[%s9486_s0 + $0x142] sm:$0xff]  ;;  %v5585_v41 = vunpack.i.l.bf16 %v9652_v7 }
 0x1f0   :  { %v6026_v61 = vunpack.i.h.bf16 %v6024_v46  ;;  %v6025_v48 = vunpack.i.l.bf16 %v6024_v46  ;;  %v6021_v39 = vunpack.i.h.bf16 %v6019_v5  ;;  %v6020_v3 = vunpack.i.l.bf16 %v6019_v5  ;;  %v4358_v6 = vld [vmem:[%s9486_s0 + $0x13a] sm:$0xff] }
 0x1f1   :  { %3851 = vmatprep.mubr.bf16.mxu0 %v2432_v56  ;;  %v5561_v25 = vunpack.i.h.bf16 %v9648_v50  ;;  %v5560_v21 = vunpack.i.l.bf16 %v9648_v50  ;;  %v9215_v46 = vsel %vm145_vm0, %v4361_v24, %v5566_v43  ;;  %v9218_v56 = vsel %vm145_vm0, %v4360_v53, %v5565_v33 }
 0x1f2   :  { %v2749_v22 = vsel %vm163_vm2, %v2741_v32, %v6025_v48  ;;  %v2750_v28 = vsel %vm163_vm2, %v2742_v20, %v6026_v61  ;;  %v2580_v31 = vsel %vm154_vm1, %v2572_v44, %v6020_v3  ;;  %v2581_v51 = vsel %vm154_vm1, %v2573_v35, %v6021_v39  ;;  %v9651_v48 = vld [vmem:[#allocation31_spill] sm:$0xff] }
 0x1f3   :  { %v6034_v17 = vpop.permute.xlu1 %6033  ;;  %v2755_v58 = vpack.c.bf16 %v2750_v28, %v2749_v22  ;;  %v6029_v27 = vpop.permute.xlu0 %6028  ;;  %v1439_v10 = vsel %vm145_vm0, %v4359_v42, %v5561_v25  ;;  %v1438_v23 = vsel %vm145_vm0, %v4358_v6, %v5560_v21  ;;  %v5576_v61 = vunpack.i.h.bf16 %v9650_v63  ;;  %v4556_v22 = vld [vmem:[%s9486_s0 + $0x2ba] sm:$0xff]  ;;  %v4557_v28 = vld [vmem:[%s9486_s0 + $0x2c2] sm:$0xff] }
 0x1f4   :  { %v6036_v1 = vunpack.i.h.bf16 %v6034_v17  ;;  %v6035_v55 = vunpack.i.l.bf16 %v6034_v17  ;;  %v6031_v12 = vunpack.i.h.bf16 %v6029_v27  ;;  %v6030_v34 = vunpack.i.l.bf16 %v6029_v27  ;;  %v9654_v44 = vld [vmem:[#allocation39_spill] sm:$0xff] }
 0x1f5   :  { %3948 = vmatprep.mubr.bf16.mxu1 %v2755_v58  ;;  %v5571_v5 = vunpack.i.h.bf16 %v9651_v48  ;;  %v5570_v20 = vunpack.i.l.bf16 %v9651_v48  ;;  %v1446_v17 = vsel %vm154_vm1, %v1438_v23, %v5580_v15  ;;  %v9653_v58 = vld [vmem:[#allocation36_spill] sm:$0xff]  ;;  %v1447_v27 = vsel %vm154_vm1, %v1439_v10, %v5581_v52 }
 0x1f6   :  { %v2588_v49 = vsel %vm163_vm2, %v2580_v31, %v6035_v55  ;;  %v2589_v0 = vsel %vm163_vm2, %v2581_v51, %v6036_v1  ;;  %v2265_v38 = vsel %vm163_vm2, %v2257_v60, %v6030_v34  ;;  %v2266_v19 = vsel %vm163_vm2, %v2258_v11, %v6031_v12  ;;  %v9655_v51 = vld [vmem:[#allocation38_spill] sm:$0xff]  ;;  %v4524_v15 = vld [vmem:[%s9486_s0 + $0x289] sm:$0xff]  ;;  %v4525_v52 = vld [vmem:[%s9486_s0 + $0x291] sm:$0xff] }
 0x1f7   :  { %v9191_v59 = vpop.permute.xlu1 %6043  ;;  %v2594_v8 = vpack.c.bf16 %v2589_v0, %v2588_v49  ;;  %v6039_v57 = vpop.permute.xlu0 %6038  ;;  %v2271_v18 = vpack.c.bf16 %v2266_v19, %v2265_v38  ;;  %v5591_v35 = vunpack.i.h.bf16 %v9653_v58  ;;  %v5600_v1 = vunpack.i.l.bf16 %v9654_v44  ;;  %v4621_v60 = vld [vmem:[%s9486_s0 + $0x321] sm:$0xff]  ;;  %v4620_v0 = vld [vmem:[%s9486_s0 + $0x319] sm:$0xff] }
 0x1f8   :  { %v6041_v39 = vunpack.i.h.bf16 %v6039_v57  ;;  %v6040_v3 = vunpack.i.l.bf16 %v6039_v57  ;;  %v6046_v55 = vunpack.i.h.bf16 %v9191_v59  ;;  %v5590_v31 = vunpack.i.l.bf16 %v9653_v58 }
 0x1f9   :  { %3949 = vmatmul.mubr.bf16.gmra.mrb[56].mxu1 %v2594_v8  ;;  %3852 = vmatmul.mubr.bf16.gmra.mrb[56].mxu0 %v2271_v18  ;;  %v5606_v12 = vunpack.i.h.bf16 %v9655_v51  ;;  %v5601_v34 = vunpack.i.h.bf16 %v9654_v44  ;;  %v6045_v11 = vunpack.i.l.bf16 %v9191_v59  ;;  %v9257_v25 = vsel %vm163_vm2, %v1446_v17, %v5600_v1 }
 0x1fa   :  { %v2413_v38 = vsel %vm145_vm0, %v4557_v28, %v6041_v39  ;;  %v2412_v19 = vsel %vm145_vm0, %v4556_v22, %v6040_v3  ;;  %v2736_v59 = vsel %vm145_vm0, %v4621_v60, %v6046_v55 }
 0x1fb   :  { %v6054_v40 = vpop.permute.xlu1 %6053  ;;  %v9211_v16 = vpop.permute.xlu0 %6048  ;;  %v2735_v21 = vsel %vm145_vm0, %v4620_v0, %v6045_v11 }
 0x1fc   :  { %v6056_v30 = vunpack.i.h.bf16 %v6054_v40  ;;  %v6055_v9 = vunpack.i.l.bf16 %v6054_v40  ;;  %v6051_v40 = vunpack.i.h.bf16 %v9211_v16  ;;  %v6050_v6 = vunpack.i.l.bf16 %v9211_v16  ;;  %v4588_v16 = vld [vmem:[%s9486_s0 + $0x2e8] sm:$0xff] }
 0x1fe   :  { %v2420_v26 = vsel %vm154_vm1, %v2412_v19, %v6055_v9  ;;  %v2421_v43 = vsel %vm154_vm1, %v2413_v38, %v6056_v30  ;;  %v4589_v30 = vld [vmem:[%s9486_s0 + $0x2f0] sm:$0xff]  ;;  %v2252_v60 = vsel %vm145_vm0, %v4525_v52, %v6051_v40  ;;  %v2251_v11 = vsel %vm145_vm0, %v4524_v15, %v6050_v6 }
 0x1ff   :  { %v6064_v32 = vpop.permute.xlu1 %6063  ;;  %v6059_v45 = vpop.permute.xlu0 %6058  ;;  %v1455_v38 = vsel %vm163_vm2, %v1447_v27, %v5601_v34  ;;  %v4363_v27 = vld [vmem:[%s9486_s0 + $0x172] sm:$0xff]  ;;  %v5605_v6 = vunpack.i.l.bf16 %v9655_v51 }
 0x200   :  { %v6066_v33 = vunpack.i.h.bf16 %v6064_v32  ;;  %v6065_v53 = vunpack.i.l.bf16 %v6064_v32  ;;  %v6061_v10 = vunpack.i.h.bf16 %v6059_v45  ;;  %v6060_v23 = vunpack.i.l.bf16 %v6059_v45 }
 0x202   :  { %v2743_v22 = vsel %vm154_vm1, %v2735_v21, %v6065_v53  ;;  %v2744_v28 = vsel %vm154_vm1, %v2736_v59, %v6066_v33  ;;  %v2575_v19 = vsel %vm145_vm0, %v4589_v30, %v6061_v10  ;;  %v5575_v10 = vunpack.i.l.bf16 %v9650_v63 }
 0x203   :  { %v6074_v49 = vpop.permute.xlu1 %6073  ;;  %v6069_v18 = vpop.permute.xlu0 %6068  ;;  %v1443_v30 = vsel %vm145_vm0, %v4363_v27, %v5571_v5  ;;  %v1449_v63 = vsel %vm154_vm1, %v9215_v46, %v5586_v37  ;;  %v4648_v46 = vld [vmem:[%s9486_s0 + $0x302] sm:$0xff]  ;;  %v4649_v37 = vld [vmem:[%s9486_s0 + $0x30a] sm:$0xff] }
 0x204   :  { %v6076_v8 = vunpack.i.h.bf16 %v6074_v49  ;;  %v6075_v57 = vunpack.i.l.bf16 %v6074_v49  ;;  %v6071_v44 = vunpack.i.h.bf16 %v6069_v18  ;;  %v6070_v45 = vunpack.i.l.bf16 %v6069_v18 }
 0x205   :  { %v1451_v48 = vsel %vm154_vm1, %v1443_v30, %v5591_v35 }
 0x206   :  { %v2428_v24 = vsel %vm163_vm2, %v2420_v26, %v6075_v57  ;;  %v2429_v50 = vsel %vm163_vm2, %v2421_v43, %v6076_v8  ;;  %v2574_v8 = vsel %vm145_vm0, %v4588_v16, %v6060_v23  ;;  %v2259_v34 = vsel %vm154_vm1, %v2251_v11, %v6070_v45  ;;  %v9656_v23 = vld [vmem:[#allocation42_spill] sm:$0xff] }
 0x207   :  { %v6084_v42 = vpop.permute.xlu1 %6083  ;;  %v2433_v62 = vpack.c.bf16 %v2429_v50, %v2428_v24  ;;  %v6079_v3 = vpop.permute.xlu0 %6078  ;;  %v4362_v24 = vld [vmem:[%s9486_s0 + $0x16a] sm:$0xff]  ;;  %v2260_v50 = vsel %vm154_vm1, %v2252_v60, %v6071_v44  ;;  %v1448_v44 = vsel %vm154_vm1, %v9218_v56, %v5585_v41  ;;  %v1457_v56 = vsel %vm163_vm2, %v1449_v63, %v5606_v12  ;;  %v4647_v60 = vld [vmem:[%s9486_s0 + $0x2f2] sm:$0xff] }
 0x208   :  { %v6086_v32 = vunpack.i.h.bf16 %v6084_v42  ;;  %v6085_v39 = vunpack.i.l.bf16 %v6084_v42  ;;  %v6081_v9 = vunpack.i.h.bf16 %v6079_v3  ;;  %v6080_v17 = vunpack.i.l.bf16 %v6079_v3  ;;  %v9657_v12 = vld [vmem:[#allocation35_spill] sm:$0xff] }
 0x209   :  { %3859 = vmatprep.mubr.bf16.mxu0 %v2433_v62  ;;  %v1456_v5 = vsel %vm163_vm2, %v1448_v44, %v5605_v6  ;;  %v5596_v45 = vunpack.i.h.bf16 %v9657_v12 }
 0x20a   :  { %v2751_v1 = vsel %vm163_vm2, %v2743_v22, %v6085_v39  ;;  %v2752_v55 = vsel %vm163_vm2, %v2744_v28, %v6086_v32  ;;  %v2582_v18 = vsel %vm154_vm1, %v2574_v8, %v6080_v17  ;;  %v2583_v33 = vsel %vm154_vm1, %v2575_v19, %v6081_v9  ;;  %v6253_v28 = vld [vmem:[%s9486_s0 + $0x18a] sm:$0xff] }
 0x20b   :  { %v6094_v49 = vpop.permute.xlu1 %6093  ;;  %v2756_v0 = vpack.c.bf16 %v2752_v55, %v2751_v1  ;;  %v6089_v43 = vpop.permute.xlu0 %6088  ;;  %v5611_v32 = vunpack.i.h.bf16 %v9656_v23  ;;  %v5610_v39 = vunpack.i.l.bf16 %v9656_v23  ;;  %v9307_v16 = vsel %vm145_vm0, %v6253_v28, %v5576_v61  ;;  %v4646_v55 = vld [vmem:[%s9486_s0 + $0x2ea] sm:$0xff] }
 0x20c   :  { %v6096_v57 = vunpack.i.h.bf16 %v6094_v49  ;;  %v6095_v26 = vunpack.i.l.bf16 %v6094_v49  ;;  %v6091_v53 = vunpack.i.h.bf16 %v6089_v43  ;;  %v6090_v59 = vunpack.i.l.bf16 %v6089_v43 }
 0x20d   :  { %3956 = vmatprep.mubr.bf16.mxu1 %v2756_v0  ;;  %v1442_v9 = vsel %vm145_vm0, %v4362_v24, %v5570_v20  ;;  %v1462_v17 = vpack.c.bf16 %v1455_v38, %v9257_v25  ;;  %v1459_v51 = vsel %vm163_vm2, %v1451_v48, %v5611_v32  ;;  %v5595_v1 = vunpack.i.l.bf16 %v9657_v12  ;;  %v9658_v38 = vld [vmem:[#allocation41_spill] sm:$0xff]  ;;  %v6254_v32 = vld [vmem:[%s9486_s0 + $0x182] sm:$0xff] }
 0x20e   :  { %v2590_v21 = vsel %vm163_vm2, %v2582_v18, %v6095_v26  ;;  %v2591_v40 = vsel %vm163_vm2, %v2583_v33, %v6096_v57  ;;  %v2267_v62 = vsel %vm163_vm2, %v2259_v34, %v6090_v59  ;;  %v2268_v15 = vsel %vm163_vm2, %v2260_v50, %v6091_v53 }
 0x20f   :  { %v6104_v42 = vpop.permute.xlu1 %6103  ;;  %v2595_v52 = vpack.c.bf16 %v2591_v40, %v2590_v21  ;;  %v6099_v3 = vpop.permute.xlu0 %6098  ;;  %v2272_v22 = vpack.c.bf16 %v2268_v15, %v2267_v62  ;;  %v1450_v61 = vsel %vm154_vm1, %v1442_v9, %v5590_v31  ;;  %v1463_v0 = vpack.c.bf16 %v1457_v56, %v1456_v5 }
 0x210   :  { %v6106_v20 = vunpack.i.h.bf16 %v6104_v42  ;;  %v6105_v7 = vunpack.i.l.bf16 %v6104_v42  ;;  %v6101_v58 = vunpack.i.h.bf16 %v6099_v3  ;;  %v6100_v35 = vunpack.i.l.bf16 %v6099_v3 }
 0x211   :  { %3957 = vmatmul.mubr.bf16.gmra.mrb[60].mxu1 %v2595_v52  ;;  %3860 = vmatmul.mubr.bf16.gmra.mrb[60].mxu0 %v2272_v22  ;;  %v1458_v25 = vsel %vm163_vm2, %v1450_v61, %v5610_v39  ;;  %v5616_v19 = vunpack.i.h.bf16 %v9658_v38  ;;  %v5615_v26 = vunpack.i.l.bf16 %v9658_v38  ;;  %v1444_v39 = vsel %vm145_vm0, %v6254_v32, %v5575_v10 }
 0x212   :  { %5039 = vmatprep.mubr.bf16.mxu0 %v1462_v17  ;;  %v2893_v43 = vsel %vm145_vm0, %v4649_v37, %v6106_v20  ;;  %v2892_v18 = vsel %vm145_vm0, %v4648_v46, %v6105_v7  ;;  %v1464_v53 = vpack.c.bf16 %v1459_v51, %v1458_v25  ;;  %v2891_v59 = vsel %vm145_vm0, %v4647_v60, %v6101_v58  ;;  %v4652_v20 = vld [vmem:[%s9486_s0 + $0x332] sm:$0xff]  ;;  %v4653_v7 = vld [vmem:[%s9486_s0 + $0x33a] sm:$0xff] }
 0x213   :  { %v6114_v41 = vpop.permute.xlu1 %6113  ;;  %v6109_v31 = vpop.permute.xlu0 %6108  ;;  %v2890_v24 = vsel %vm145_vm0, %v4646_v55, %v6100_v35  ;;  %v1452_v44 = vsel %vm154_vm1, %v1444_v39, %v5595_v1  ;;  %v1453_v63 = vsel %vm154_vm1, %v9307_v16, %v5596_v45  ;;  %v4650_v58 = vld [vmem:[%s9486_s0 + $0x31a] sm:$0xff]  ;;  %v4651_v35 = vld [vmem:[%s9486_s0 + $0x322] sm:$0xff] }
 0x214   :  { %v6116_v11 = vunpack.i.h.bf16 %v6114_v41  ;;  %v6115_v49 = vunpack.i.l.bf16 %v6114_v41  ;;  %v6111_v8 = vunpack.i.h.bf16 %v6109_v31  ;;  %v6110_v57 = vunpack.i.l.bf16 %v6109_v31 }
 0x215   :  { %v1460_v61 = vsel %vm163_vm2, %v1452_v44, %v5615_v26  ;;  %v1461_v48 = vsel %vm163_vm2, %v1453_v63, %v5616_v19 }
 0x216   :  { %v2900_v21 = vsel %vm154_vm1, %v2892_v18, %v6115_v49  ;;  %v2901_v40 = vsel %vm154_vm1, %v2893_v43, %v6116_v11  ;;  %v2898_v62 = vsel %vm154_vm1, %v2890_v24, %v6110_v57  ;;  %v2899_v15 = vsel %vm154_vm1, %v2891_v59, %v6111_v8 }
 0x217   :  { %v6124_v33 = vpop.permute.xlu1 %6123  ;;  %v6119_v50 = vpop.permute.xlu0 %6118  ;;  %v1465_v37 = vpack.c.bf16 %v1461_v48, %v1460_v61 }
 0x218   :  { %v6126_v27 = vunpack.i.h.bf16 %v6124_v33  ;;  %v6125_v34 = vunpack.i.l.bf16 %v6124_v33  ;;  %v6121_v6 = vunpack.i.h.bf16 %v6119_v50  ;;  %v6120_v42 = vunpack.i.l.bf16 %v6119_v50 }
 0x219   :  { %5040 = vmatmul.mubr.bf16.vlgmr.msra.gmra.mrb[64].mxu0 %v1463_v0 }
 0x21a   :  { %v2908_v52 = vsel %vm163_vm2, %v2900_v21, %v6125_v34  ;;  %v2909_v23 = vsel %vm163_vm2, %v2901_v40, %v6126_v27  ;;  %5043 = vmatprep.mubr.bf16.mxu0 %v1464_v53  ;;  %v2906_v28 = vsel %vm163_vm2, %v2898_v62, %v6120_v42  ;;  %v2907_v30 = vsel %vm163_vm2, %v2899_v15, %v6121_v6 }
 0x21b   :  { %v2915_v3 = vpack.c.bf16 %v2909_v23, %v2908_v52  ;;  %v6134_v22 = vpop.permute.xlu1 %6133  ;;  %v6129_v9 = vpop.permute.xlu0 %6128  ;;  %v2914_v17 = vpack.c.bf16 %v2907_v30, %v2906_v28  ;;  %v6255_v23 = vld [vmem:[%s9488_s2] ss:$0 sm:$0xff]  ;;  %s6283_s2 = smov [#allocation3]  }
 0x21c   :  { %v6136_v10 = vunpack.i.h.bf16 %v6134_v22  ;;  %v6135_v5 = vunpack.i.l.bf16 %v6134_v22  ;;  %v6131_v41 = vunpack.i.h.bf16 %v6129_v9  ;;  %v6130_v46 = vunpack.i.l.bf16 %v6129_v9  ;;  %s4115_s8 = sshll.u32 %s6283_s2, 4  ;;  %s4116_s8 = int_to_ptr.vmem [resolvable:$true] %s4115_s8 }
 0x21d   :  { %5047 = vmatprep.mubr.bf16.mxu1 %v2914_v17  ;;  %s6256_s10 = scalar_lea.vmem %s4116_s8, 2048  ;;  %p6261_p1 = scmp.lt.s32.totalorder %s4116_s8, %s4116_s8 }
 0x21e   :  { %5048 = vmatmul.mubr.bf16.vlgmr.msra.gmra.mrb[64].mxu1 %v2915_v3  ;;  %v2897_v45 = vsel %vm145_vm0, %v4653_v7, %v6136_v10  ;;  %v2896_v1 = vsel %vm145_vm0, %v4652_v20, %v6135_v5  ;;  %v2895_v60 = vsel %vm145_vm0, %v4651_v35, %v6131_v41  ;;  %v2894_v11 = vsel %vm145_vm0, %v4650_v58, %v6130_v46  ;;  %p6257_p0 = scmp.ne.s32.totalorder %s4116_s8, %s6256_s10  ;;  %p6262_p2 = scmp.lt.s32.totalorder %s6256_s10, %s6256_s10 }
 0x21f   :  { %v6144_v56 = vpop.permute.xlu1 %6143  ;;  %v6139_v16 = vpop.permute.xlu0 %6138 }
 0x220   :  { %v6146_v31 = vunpack.i.h.bf16 %v6144_v56  ;;  %v6145_v25 = vunpack.i.l.bf16 %v6144_v56  ;;  %v6141_v51 = vunpack.i.h.bf16 %v6139_v16  ;;  %v6140_v12 = vunpack.i.l.bf16 %v6139_v16  ;;  %p6263_p3 = por %p6262_p2, %p6261_p1 }
 0x221   :  { %5044 = vmatmul.mubr.bf16.gmra.mrb[68].mxu0 %v1465_v37 }
 0x222   :  { %v2904_v19 = vsel %vm154_vm1, %v2896_v1, %v6145_v25  ;;  %v2905_v8 = vsel %vm154_vm1, %v2897_v45, %v6146_v31  ;;  %v2902_v43 = vsel %vm154_vm1, %v2894_v11, %v6140_v12  ;;  %v2903_v18 = vsel %vm154_vm1, %v2895_v60, %v6141_v51  ;;  %p6264_p4 = pnand %p6263_p3, %p6257_p0 }
 0x223   :  { %v6154_v55 = vpop.permute.xlu1 %6153 }
 0x224   :  { %v6156_v49 = vunpack.i.h.bf16 %v6154_v55  ;;  %v6155_v0 = vunpack.i.l.bf16 %v6154_v55  ;;  %v6149_v38 = vpop.permute.xlu0 %6148 }
 0x225   :  { %v6151_v57 = vunpack.i.h.bf16 %v6149_v38  ;;  %v6150_v26 = vunpack.i.l.bf16 %v6149_v38 }
 0x226   :  { %v2912_v33 = vsel %vm163_vm2, %v2904_v19, %v6155_v0  ;;  %v2913_v53 = vsel %vm163_vm2, %v2905_v8, %v6156_v49 }
 0x227   :  { %v2910_v59 = vsel %vm163_vm2, %v2902_v43, %v6150_v26  ;;  %v2911_v24 = vsel %vm163_vm2, %v2903_v18, %v6151_v57  ;;  %v2917_v27 = vpack.c.bf16 %v2913_v53, %v2912_v33 }
 0x228   :  { %v2916_v34 = vpack.c.bf16 %v2911_v24, %v2910_v59 }
 0x22a   :  { %5051 = vmatprep.mubr.bf16.mxu1 %v2916_v34 }
 0x22b   :  { %5052 = vmatmul.mubr.bf16.gmra.mrb[68].mxu1 %v2917_v27 }
 0x249   :  { %v4791_v50 = vpop.f32.mrb[16].mxu0 }
 0x24a   :  { %v4792_v21 = vpop.f32.mrb[17].mxu0 }
 0x24b   :  { %v4793_v40 = vadd.f32 %v4792_v21, %v4791_v50  ;;  %v4794_v6 = vpop.f32.mrb[18].mxu0 }
 0x24c   :  { %v4795_v42 = vpop.f32.mrb[19].mxu0 }
 0x24d   :  { %v4796_v62 = vadd.f32 %v4795_v42, %v4794_v6  ;;  %v4855_v15 = vpop.f32.mrb[16].mxu1  ;;  %v3644_v32 = vadd.f32 %v6255_v23, %v4793_v40 }
 0x24e   :  { %v4856_v52 = vpop.f32.mrb[17].mxu1 }
 0x24f   :  { %v4857_v39 = vadd.f32 %v4856_v52, %v4855_v15  ;;  %v4858_v3 = vpop.f32.mrb[18].mxu1  ;;  %v3647_v28 = vadd.f32 %v6255_v23, %v4796_v62 }
 0x250   :  { %v4859_v22 = vpop.f32.mrb[19].mxu1 }
 0x251   :  { %v9400_v30 = vadd.f32 %v4857_v39, %v3644_v32  ;;  %v4860_v9 = vadd.f32 %v4859_v22, %v4858_v3 }
 0x253   :  { %v9402_v17 = vadd.f32 %v4860_v9, %v3647_v28 }
 0x258   :  { %v4797_v44 = vpop.f32.mrb[20].mxu0 }
 0x259   :  { %v4798_v63 = vpop.f32.mrb[21].mxu0 }
 0x25a   :  { %v4799_v61 = vadd.f32 %v4798_v63, %v4797_v44  ;;  %v4800_v48 = vpop.f32.mrb[22].mxu0 }
 0x25b   :  { %v4801_v10 = vpop.f32.mrb[23].mxu0 }
 0x25c   :  { %v4802_v5 = vadd.f32 %v4801_v10, %v4800_v48  ;;  %v3652_v7 = vadd.f32 %v6255_v23, %v4799_v61 }
 0x25e   :  { %v3655_v37 = vadd.f32 %v6255_v23, %v4802_v5 }
 0x260   :  { %v4861_v56 = vpop.f32.mrb[20].mxu1 }
 0x261   :  { %v4862_v20 = vpop.f32.mrb[21].mxu1 }
 0x262   :  { %v4863_v41 = vadd.f32 %v4862_v20, %v4861_v56  ;;  %v4864_v46 = vpop.f32.mrb[22].mxu1 }
 0x263   :  { %v4865_v16 = vpop.f32.mrb[23].mxu1 }
 0x264   :  { %v9404_v58 = vadd.f32 %v4863_v41, %v3652_v7  ;;  %v4866_v35 = vadd.f32 %v4865_v16, %v4864_v46 }
 0x266   :  { %v9406_v31 = vadd.f32 %v4866_v35, %v3655_v37 }
 0x270   :  { %v4803_v25 = vpop.f32.mrb[24].mxu0 }
 0x271   :  { %v4804_v51 = vpop.f32.mrb[25].mxu0 }
 0x272   :  { %v4805_v12 = vadd.f32 %v4804_v51, %v4803_v25  ;;  %v4867_v45 = vpop.f32.mrb[24].mxu1  ;;  %v4806_v1 = vpop.f32.mrb[26].mxu0 }
 0x273   :  { %v4868_v55 = vpop.f32.mrb[25].mxu1  ;;  %v4807_v60 = vpop.f32.mrb[27].mxu0 }
 0x274   :  { %v3660_v11 = vadd.f32 %v6255_v23, %v4805_v12  ;;  %v4869_v49 = vadd.f32 %v4868_v55, %v4867_v45  ;;  %v4808_v0 = vadd.f32 %v4807_v60, %v4806_v1  ;;  %v4870_v38 = vpop.f32.mrb[26].mxu1 }
 0x275   :  { %v4871_v19 = vpop.f32.mrb[27].mxu1 }
 0x276   :  { %v9408_v8 = vadd.f32 %v4869_v49, %v3660_v11  ;;  %v3663_v57 = vadd.f32 %v6255_v23, %v4808_v0  ;;  %v4872_v26 = vadd.f32 %v4871_v19, %v4870_v38 }
 0x278   :  { %v9410_v43 = vadd.f32 %v4872_v26, %v3663_v57 }
 0x283   :  { %v4873_v18 = vpop.f32.mrb[28].mxu1 }
 0x284   :  { %v4809_v33 = vpop.f32.mrb[28].mxu0  ;;  %v4874_v53 = vpop.f32.mrb[29].mxu1 }
 0x285   :  { %v4810_v59 = vpop.f32.mrb[29].mxu0  ;;  %v4875_v24 = vadd.f32 %v4874_v53, %v4873_v18  ;;  %v4876_v27 = vpop.f32.mrb[30].mxu1 }
 0x286   :  { %v4811_v34 = vadd.f32 %v4810_v59, %v4809_v33  ;;  %v4812_v50 = vpop.f32.mrb[30].mxu0  ;;  %v4877_v21 = vpop.f32.mrb[31].mxu1 }
 0x287   :  { %v4813_v40 = vpop.f32.mrb[31].mxu0  ;;  %v4878_v6 = vadd.f32 %v4877_v21, %v4876_v27 }
 0x288   :  { %v3668_v42 = vadd.f32 %v6255_v23, %v4811_v34  ;;  %v4814_v62 = vadd.f32 %v4813_v40, %v4812_v50 }
 0x28a   :  { %v9412_v15 = vadd.f32 %v4875_v24, %v3668_v42  ;;  %v3671_v52 = vadd.f32 %v6255_v23, %v4814_v62 }
 0x28b   :  { %v4959_v32 = vpop.f32.mrb[32].mxu1 }
 0x28c   :  { %v9414_v39 = vadd.f32 %v4878_v6, %v3671_v52  ;;  %v4960_v22 = vpop.f32.mrb[33].mxu1 }
 0x28d   :  { %v4961_v9 = vadd.f32 %v4960_v22, %v4959_v32  ;;  %v4962_v44 = vpop.f32.mrb[34].mxu1 }
 0x28e   :  { %v4963_v48 = vpop.f32.mrb[35].mxu1 }
 0x28f   :  { %v4895_v3 = vpop.f32.mrb[32].mxu0  ;;  %v4964_v5 = vadd.f32 %v4963_v48, %v4962_v44 }
 0x290   :  { %v4896_v28 = vpop.f32.mrb[33].mxu0 }
 0x291   :  { %v4897_v63 = vadd.f32 %v4896_v28, %v4895_v3  ;;  %v4898_v61 = vpop.f32.mrb[34].mxu0 }
 0x292   :  { %v4899_v10 = vpop.f32.mrb[35].mxu0 }
 0x293   :  { %v3806_v56 = vadd.f32 %v4897_v63, %v8770_v47  ;;  %v4900_v20 = vadd.f32 %v4899_v10, %v4898_v61 }
 0x294   :  { %v4965_v23 = vpop.f32.mrb[36].mxu1 }
 0x295   :  { %v3809_v7 = vadd.f32 %v4900_v20, %v8789_v4  ;;  %v9418_v41 = vadd.f32 %v4961_v9, %v3806_v56  ;;  %v4966_v16 = vpop.f32.mrb[37].mxu1 }
 0x296   :  { %v4967_v25 = vadd.f32 %v4966_v16, %v4965_v23  ;;  %v4968_v51 = vpop.f32.mrb[38].mxu1 }
 0x297   :  { %v4901_v46 = vpop.f32.mrb[36].mxu0  ;;  %v9420_v37 = vadd.f32 %v4964_v5, %v3809_v7  ;;  %v4969_v1 = vpop.f32.mrb[39].mxu1 }
 0x298   :  { %v4902_v35 = vpop.f32.mrb[37].mxu0  ;;  %v4970_v60 = vadd.f32 %v4969_v1, %v4968_v51 }
 0x299   :  { %v4903_v12 = vadd.f32 %v4902_v35, %v4901_v46  ;;  %v4904_v45 = vpop.f32.mrb[38].mxu0 }
 0x29a   :  { %v4905_v55 = vpop.f32.mrb[39].mxu0 }
 0x29b   :  { %v3814_v47 = vadd.f32 %v4903_v12, %v8853_v54  ;;  %v4906_v11 = vadd.f32 %v4905_v55, %v4904_v45 }
 0x29c   :  { %v4971_v0 = vpop.f32.mrb[40].mxu1 }
 0x29d   :  { %v3817_v4 = vadd.f32 %v4906_v11, %v8870_v29  ;;  %v9424_v49 = vadd.f32 %v4967_v25, %v3814_v47  ;;  %v4972_v19 = vpop.f32.mrb[41].mxu1 }
 0x29e   :  { %v4973_v18 = vadd.f32 %v4972_v19, %v4971_v0  ;;  %v4974_v33 = vpop.f32.mrb[42].mxu1 }
 0x29f   :  { %v4907_v38 = vpop.f32.mrb[40].mxu0  ;;  %v9426_v57 = vadd.f32 %v4970_v60, %v3817_v4  ;;  %v4975_v24 = vpop.f32.mrb[43].mxu1 }
 0x2a0   :  { %v4908_v26 = vpop.f32.mrb[41].mxu0  ;;  %v4976_v34 = vadd.f32 %v4975_v24, %v4974_v33 }
 0x2a1   :  { %v4909_v53 = vadd.f32 %v4908_v26, %v4907_v38  ;;  %v4910_v59 = vpop.f32.mrb[42].mxu0 }
 0x2a2   :  { %v4911_v27 = vpop.f32.mrb[43].mxu0 }
 0x2a3   :  { %v3822_v54 = vadd.f32 %v4909_v53, %v8919_v14  ;;  %v4912_v50 = vadd.f32 %v4911_v27, %v4910_v59 }
 0x2a4   :  { %v4977_v40 = vpop.f32.mrb[44].mxu1 }
 0x2a5   :  { %v3825_v29 = vadd.f32 %v4912_v50, %v8939_v2  ;;  %v9430_v21 = vadd.f32 %v4973_v18, %v3822_v54  ;;  %v4978_v42 = vpop.f32.mrb[45].mxu1 }
 0x2a6   :  { %v4979_v32 = vadd.f32 %v4978_v42, %v4977_v40  ;;  %v4980_v3 = vpop.f32.mrb[46].mxu1 }
 0x2a7   :  { %v4913_v6 = vpop.f32.mrb[44].mxu0  ;;  %v9432_v62 = vadd.f32 %v4976_v34, %v3825_v29  ;;  %v4981_v9 = vpop.f32.mrb[47].mxu1 }
 0x2a8   :  { %v4914_v52 = vpop.f32.mrb[45].mxu0  ;;  %v4982_v63 = vadd.f32 %v4981_v9, %v4980_v3 }
 0x2a9   :  { %v4915_v22 = vadd.f32 %v4914_v52, %v4913_v6  ;;  %v4916_v28 = vpop.f32.mrb[46].mxu0 }
 0x2aa   :  { %v4917_v44 = vpop.f32.mrb[47].mxu0 }
 0x2ab   :  { %v3830_v14 = vadd.f32 %v4915_v22, %v8998_v13  ;;  %v4918_v61 = vadd.f32 %v4917_v44, %v4916_v28 }
 0x2ac   :  { %v4983_v10 = vpop.f32.mrb[48].mxu1 }
 0x2ad   :  { %v3833_v2 = vadd.f32 %v4918_v61, %v9009_v36  ;;  %v9436_v48 = vadd.f32 %v4979_v32, %v3830_v14  ;;  %v4984_v56 = vpop.f32.mrb[49].mxu1 }
 0x2ae   :  { %v4985_v23 = vadd.f32 %v4984_v56, %v4983_v10  ;;  %v4986_v46 = vpop.f32.mrb[50].mxu1 }
 0x2af   :  { %v4919_v5 = vpop.f32.mrb[48].mxu0  ;;  %v9438_v20 = vadd.f32 %v4982_v63, %v3833_v2  ;;  %v4987_v25 = vpop.f32.mrb[51].mxu1 }
 0x2b0   :  { %v4920_v7 = vpop.f32.mrb[49].mxu0  ;;  %v4988_v12 = vadd.f32 %v4987_v25, %v4986_v46 }
 0x2b1   :  { %v4921_v16 = vadd.f32 %v4920_v7, %v4919_v5  ;;  %v4922_v35 = vpop.f32.mrb[50].mxu0 }
 0x2b2   :  { %v4923_v51 = vpop.f32.mrb[51].mxu0 }
 0x2b3   :  { %v3838_v13 = vadd.f32 %v4921_v16, %v9400_v30  ;;  %v4924_v45 = vadd.f32 %v4923_v51, %v4922_v35 }
 0x2b4   :  { %v4989_v55 = vpop.f32.mrb[52].mxu1 }
 0x2b5   :  { %v3841_v36 = vadd.f32 %v4924_v45, %v9402_v17  ;;  %v9442_v1 = vadd.f32 %v4985_v23, %v3838_v13  ;;  %v4990_v47 = vpop.f32.mrb[53].mxu1 }
 0x2b6   :  { %v4991_v0 = vadd.f32 %v4990_v47, %v4989_v55  ;;  %v4992_v38 = vpop.f32.mrb[54].mxu1 }
 0x2b7   :  { %v4925_v60 = vpop.f32.mrb[52].mxu0  ;;  %v9444_v11 = vadd.f32 %v4988_v12, %v3841_v36  ;;  %v4993_v18 = vpop.f32.mrb[55].mxu1 }
 0x2b8   :  { %v4926_v4 = vpop.f32.mrb[53].mxu0  ;;  %v4994_v53 = vadd.f32 %v4993_v18, %v4992_v38 }
 0x2b9   :  { %v4927_v19 = vadd.f32 %v4926_v4, %v4925_v60  ;;  %v4928_v26 = vpop.f32.mrb[54].mxu0 }
 0x2ba   :  { %v4929_v33 = vpop.f32.mrb[55].mxu0 }
 0x2bb   :  { %v3846_v30 = vadd.f32 %v4927_v19, %v9404_v58  ;;  %v4930_v59 = vadd.f32 %v4929_v33, %v4928_v26 }
 0x2bd   :  { %v3849_v17 = vadd.f32 %v4930_v59, %v9406_v31  ;;  %v3943_v24 = vadd.f32 %v4991_v0, %v3846_v30 }
 0x2bf   :  { %v3946_v27 = vadd.f32 %v4994_v53, %v3849_v17 }
 0x2cc   :  { %v4995_v34 = vpop.f32.mrb[56].mxu1  ;;  %v4931_v54 = vpop.f32.mrb[56].mxu0 }
 0x2cd   :  { %v4996_v50 = vpop.f32.mrb[57].mxu1  ;;  %v4932_v29 = vpop.f32.mrb[57].mxu0 }
 0x2ce   :  { %v4997_v40 = vadd.f32 %v4996_v50, %v4995_v34  ;;  %v4998_v6 = vpop.f32.mrb[58].mxu1  ;;  %v4933_v42 = vadd.f32 %v4932_v29, %v4931_v54  ;;  %v4934_v52 = vpop.f32.mrb[58].mxu0 }
 0x2cf   :  { %v4999_v32 = vpop.f32.mrb[59].mxu1  ;;  %v4935_v3 = vpop.f32.mrb[59].mxu0 }
 0x2d0   :  { %v5000_v22 = vadd.f32 %v4999_v32, %v4998_v6  ;;  %v3854_v28 = vadd.f32 %v4933_v42, %v9408_v8  ;;  %v4936_v9 = vadd.f32 %v4935_v3, %v4934_v52 }
 0x2d2   :  { %v3857_v58 = vadd.f32 %v4936_v9, %v9410_v43  ;;  %v9450_v44 = vadd.f32 %v4997_v40, %v3854_v28 }
 0x2d4   :  { %v9452_v31 = vadd.f32 %v5000_v22, %v3857_v58 }
 0x2e4   :  { %v5001_v63 = vpop.f32.mrb[60].mxu1  ;;  %v4937_v14 = vpop.f32.mrb[60].mxu0 }
 0x2e5   :  { %v5002_v61 = vpop.f32.mrb[61].mxu1  ;;  %v4938_v2 = vpop.f32.mrb[61].mxu0 }
 0x2e6   :  { %v5003_v10 = vadd.f32 %v5002_v61, %v5001_v63  ;;  %v5004_v5 = vpop.f32.mrb[62].mxu1  ;;  %v4939_v56 = vadd.f32 %v4938_v2, %v4937_v14  ;;  %v4940_v7 = vpop.f32.mrb[62].mxu0 }
 0x2e7   :  { %v5005_v23 = vpop.f32.mrb[63].mxu1  ;;  %v4941_v46 = vpop.f32.mrb[63].mxu0 }
 0x2e8   :  { %v5006_v16 = vadd.f32 %v5005_v23, %v5004_v5  ;;  %v3862_v8 = vadd.f32 %v4939_v56, %v9412_v15  ;;  %v4942_v35 = vadd.f32 %v4941_v46, %v4940_v7 }
 0x2ea   :  { %v3865_v43 = vadd.f32 %v4942_v35, %v9414_v39  ;;  %v9456_v25 = vadd.f32 %v5003_v10, %v3862_v8 }
 0x2ec   :  { %v5041_v51 = vpop.f32.mrb[64].mxu0  ;;  %v9458_v12 = vadd.f32 %v5006_v16, %v3865_v43 }
 0x2ed   :  { %v4008_v13 = vadd.f32 %v5041_v51, %v9424_v49  ;;  %v3999_v45 = vpop.f32.mrb[65].mxu0 }
 0x2ee   :  { %v4000_v36 = vadd.f32 %v3999_v45, %v9418_v41  ;;  %v5042_v55 = vpop.f32.mrb[66].mxu0 }
 0x2ef   :  { %v4064_v60 = vmul.f32 0.2, %v4008_v13  ;;  %v4011_v47 = vadd.f32 %v5042_v55, %v9426_v57  ;;  %v4002_v4 = vpop.f32.mrb[67].mxu0 }
 0x2f0   :  { %v4062_v0 = vmul.f32 0.2, %v4000_v36  ;;  %v4003_v15 = vadd.f32 %v4002_v4, %v9420_v37 }
 0x2f1   :  { %v4080_v38 = vmax.f32 %v4008_v13, %v4064_v60  ;;  %v4065_v39 = vmul.f32 0.2, %v4011_v47  ;;  %v5049_v19 = vpop.f32.mrb[64].mxu1 }
 0x2f2   :  { %v4078_v26 = vmax.f32 %v4000_v36, %v4062_v0  ;;  %v4063_v18 = vmul.f32 0.2, %v4003_v15  ;;  %v4040_v33 = vadd.f32 %v5049_v19, %v3943_v24  ;;  %v4031_v53 = vpop.f32.mrb[65].mxu1 }
 0x2f3   :  { %4096 = vst [vmem:[#allocation3 + $0x10] sm:$0xff] %v4080_v38  ;;  %v4081_v49 = vmax.f32 %v4011_v47, %v4065_v39  ;;  %v4032_v30 = vadd.f32 %v4031_v53, %v9442_v1  ;;  %v5050_v41 = vpop.f32.mrb[66].mxu1 }
 0x2f4   :  { %4094 = vst [vmem:[#allocation3] sm:$0xff] %v4078_v26  ;;  %v4079_v59 = vmax.f32 %v4003_v15, %v4063_v18  ;;  %v4072_v17 = vmul.f32 0.2, %v4040_v33  ;;  %v4043_v57 = vadd.f32 %v5050_v41, %v3946_v27  ;;  %v5045_v34 = vpop.f32.mrb[68].mxu0  ;;  %v4034_v54 = vpop.f32.mrb[67].mxu1 }
 0x2f5   :  { %4097 = vst [vmem:[#allocation3 + $0x18] sm:$0xff] %v4081_v49  ;;  %v4070_v37 = vmul.f32 0.2, %v4032_v30  ;;  %v4024_v50 = vadd.f32 %v5045_v34, %v9436_v48  ;;  %v4035_v29 = vadd.f32 %v4034_v54, %v9444_v11  ;;  %v4015_v40 = vpop.f32.mrb[69].mxu0 }
 0x2f6   :  { %4095 = vst [vmem:[#allocation3 + $0x8] sm:$0xff] %v4079_v59  ;;  %v4088_v24 = vmax.f32 %v4040_v33, %v4072_v17  ;;  %v4073_v6 = vmul.f32 0.2, %v4043_v57  ;;  %v4016_v42 = vadd.f32 %v4015_v40, %v9430_v21  ;;  %v5046_v1 = vpop.f32.mrb[70].mxu0 }
 0x2f7   :  { %v4086_v52 = vmax.f32 %v4032_v30, %v4070_v37  ;;  %v4068_v32 = vmul.f32 0.2, %v4024_v50  ;;  %v4071_v3 = vmul.f32 0.2, %v4035_v29  ;;  %v4027_v27 = vadd.f32 %v5046_v1, %v9438_v20  ;;  %v4018_v22 = vpop.f32.mrb[71].mxu0 }
 0x2f8   :  { %4104 = vst [vmem:[#allocation3 + $0x50] sm:$0xff] %v4088_v24  ;;  %v4089_v28 = vmax.f32 %v4043_v57, %v4073_v6  ;;  %v4066_v9 = vmul.f32 0.2, %v4016_v42  ;;  %v4019_v48 = vadd.f32 %v4018_v22, %v9432_v62 }
 0x2f9   :  { %4102 = vst [vmem:[#allocation3 + $0x40] sm:$0xff] %v4086_v52  ;;  %v4084_v11 = vmax.f32 %v4024_v50, %v4068_v32  ;;  %v4087_v58 = vmax.f32 %v4035_v29, %v4071_v3  ;;  %v4069_v63 = vmul.f32 0.2, %v4027_v27 }
 0x2fa   :  { %4105 = vst [vmem:[#allocation3 + $0x58] sm:$0xff] %v4089_v28  ;;  %v4082_v14 = vmax.f32 %v4016_v42, %v4066_v9  ;;  %v4067_v61 = vmul.f32 0.2, %v4019_v48 }
 0x2fb   :  { %4100 = vst [vmem:[#allocation3 + $0x30] sm:$0xff] %v4084_v11  ;;  %4103 = vst [vmem:[#allocation3 + $0x48] sm:$0xff] %v4087_v58  ;;  %v4085_v21 = vmax.f32 %v4027_v27, %v4069_v63 }
 0x2fc   :  { %4098 = vst [vmem:[#allocation3 + $0x20] sm:$0xff] %v4082_v14  ;;  %v4083_v2 = vmax.f32 %v4019_v48, %v4067_v61 }
 0x2fd   :  { %4101 = vst [vmem:[#allocation3 + $0x38] sm:$0xff] %v4085_v21 }
 0x2fe   :  { %v5053_v20 = vpop.f32.mrb[68].mxu1  ;;  %4099 = vst [vmem:[#allocation3 + $0x28] sm:$0xff] %v4083_v2 }
 0x2ff   :  { %v4056_v10 = vadd.f32 %v5053_v20, %v9456_v25  ;;  %v4047_v5 = vpop.f32.mrb[69].mxu1 }
 0x300   :  { %v4048_v62 = vadd.f32 %v4047_v5, %v9450_v44  ;;  %v5054_v56 = vpop.f32.mrb[70].mxu1 }
 0x301   :  { %v4076_v7 = vmul.f32 0.2, %v4056_v10  ;;  %v4059_v23 = vadd.f32 %v5054_v56, %v9458_v12  ;;  %v4050_v46 = vpop.f32.mrb[71].mxu1 }
 0x302   :  { %v4074_v16 = vmul.f32 0.2, %v4048_v62  ;;  %v4051_v8 = vadd.f32 %v4050_v46, %v9452_v31 }
 0x303   :  { %v4092_v35 = vmax.f32 %v4056_v10, %v4076_v7  ;;  %v4077_v43 = vmul.f32 0.2, %v4059_v23 }
 0x304   :  { %v4090_v51 = vmax.f32 %v4048_v62, %v4074_v16  ;;  %v4075_v13 = vmul.f32 0.2, %v4051_v8 }
 0x305   :  { %4108 = vst [vmem:[#allocation3 + $0x70] sm:$0xff] %v4092_v35  ;;  %v4093_v45 = vmax.f32 %v4059_v23, %v4077_v43 }
 0x306   :  { %4106 = vst [vmem:[#allocation3 + $0x60] sm:$0xff] %v4090_v51  ;;  %v4091_v25 = vmax.f32 %v4051_v8, %v4075_v13 }
 0x307   :  { %4109 = vst [vmem:[#allocation3 + $0x78] sm:$0xff] %v4093_v45 }
 0x308   :  { %4107 = vst [vmem:[#allocation3 + $0x68] sm:$0xff] %v4091_v25 }
 0x309   :  { %6267 = shalt.err (!%p6264_p4)
}
 0x30a   :  { %s6268_s13 = scalar_lea.hbm %s9489_s3, 2048 }
 0x30b   :  { %p6269_p5 = scmp.ne.s32.totalorder %s9489_s3, %s6268_s13  ;;  %p6272_p6 = scmp.lt.u32.totalorder %s6268_s13, %s9489_s3 }
 0x30d   :  { %p6274_p7 = pnand %p6272_p6, %p6269_p5 }
 0x30f   :  { %6277 = shalt.err (!%p6274_p7)
}
 0x310   :  { %s6284_s17 = smov 128   ;;  %s6285_s19 = smov 8  }
 0x311   :  { %4121 = dma.vmem_to_hbm [thread:$0]  %s4116_s8, 2048, %s9489_s3, [#allocation4], %s6284_s17, %s6284_s17, %s6285_s19  }
 0x312   :  { %6278 = dma.done.wait [#allocation4], 2048  }
 0x313   :  { %6279 = vsyncadd [#allocation4], 4294965248 }
 0x314   :  { %4125 = vsyncpa [#allocation4], 1 }

</bundles_post_ra>
